<compile_context>
chip_gen: v6e
topology: v6e:2x2x1
jax: 0.10.0
libtpu: 0.0.40
codegen_flags: <defaults>
</compile_context>

<pallas_src>
import functools

import jax
import jax.numpy as jnp
from jax.experimental import pallas as pl
from jax.experimental.pallas import tpu as pltpu

N_SAMPLES = 8          # samples per ray
LATENT = 32            # ray-bending latent size
HIDDEN = 64            # MLP hidden width
NEAR, FAR = 2.0, 6.0

TILE_R = 256           # rays per grid step (2 x 128-lane groups)
C3 = 8                 # padded raw channels (0..2 rgb, 3 sigma, rest 0)

# packed per-ray INPUT slab rows (rays on lanes)
RAY_ROWS = 16          # 0..2 rays_o, 3..5 rays_d, 6..8 target, rest pad

# packed per-ray OUTPUT slab rows (rays on lanes)
ROW_RGB = 0            # rows 0..2
ROW_DISP = 3
ROW_ACC = 4
ROW_DEPTH = 5
ROW_SQERR = 6          # per-ray sum over RGB of (rgb_map - target)^2
ROW_PAD = 7
ROW_W0 = 8             # rows 8..15: visibility weights per sample
OUT_ROWS = ROW_W0 + N_SAMPLES   # 16


# ----------------------------------------------------------------------------
# Fused kernel: NeRF MLP + raw2outputs + MSE partials, one ray tile per step.
# ----------------------------------------------------------------------------
def _fused_render_kernel(ray_ref, lat_ref,
                         w1x_ref, w1y_ref, w1z_ref, w1l_ref, b1_ref,
                         w2_ref, b2_ref, w3_ref, b3_ref,
                         out_ref, h1_ref, h2_ref, raw_ref):
    R = out_ref.shape[1]

    slab = ray_ref[...]                                   # (16, R) f32
    ox, oy, oz = slab[0:1, :], slab[1:2, :], slab[2:3, :]
    dx, dy, dz = slab[3:4, :], slab[4:5, :], slab[5:6, :]
    tgt = slab[6:9, :]                                    # (3, R)

    # ||rays_d|| per ray
    norm_d = jnp.sqrt(dx * dx + dy * dy + dz * dz)        # (1, R)

    # stratified sampling (perturb=0, lindisp=False) -> trace-time constants
    z_vals = [NEAR + (FAR - NEAR) * s / (N_SAMPLES - 1) for s in range(N_SAMPLES)]
    deltas = [z_vals[s + 1] - z_vals[s] if s + 1 < N_SAMPLES else 1e10
              for s in range(N_SAMPLES)]

    # ---- layer 1, algebraic split (no per-sample matmul) -------------------
    #   h1(s) = relu(base + z_s * hd)
    #   base  = W1_latent @ latent + b1 + W1_xyz @ rays_o     (per-ray, shared)
    #   hd    = W1_xyz @ rays_d                               (per-ray, shared)
    # W1_xyz @ {o,d} as 3 VPU rank-1 broadcast-FMAs (sequenced to bound vregs).
    ho = jnp.zeros((HIDDEN, R), jnp.float32)
    hd = jnp.zeros((HIDDEN, R), jnp.float32)
    for col_ref, vo, vd in ((w1x_ref, ox, dx), (w1y_ref, oy, dy), (w1z_ref, oz, dz)):
        wcol = jnp.broadcast_to(col_ref[...], (HIDDEN, R))      # (H, R)
        ho = ho + wcol * vo
        hd = hd + wcol * vd

    # per-ray latent contribution (bf16 MXU matmul, K=LATENT) + bias
    lat_h = jnp.dot(w1l_ref[...], lat_ref[...],
                    preferred_element_type=jnp.float32)         # (H, R) f32
    base = lat_h + b1_ref[...] + ho                             # (H, R)

    # batched H1 activations -> bf16 VMEM scratch (lanes: sample-major blocks)
    for s in range(N_SAMPLES):
        h1 = jnp.maximum(base + z_vals[s] * hd, 0.0)
        h1_ref[:, s * R:(s + 1) * R] = h1.astype(jnp.bfloat16)

    # ---- layers 2 & 3: ONE bf16 MXU matmul each over all samples -----------
    h2 = jnp.dot(w2_ref[...], h1_ref[...],
                 preferred_element_type=jnp.float32)             # (H, 8R) f32
    h2_ref[...] = jnp.maximum(h2 + b2_ref[...], 0.0).astype(jnp.bfloat16)
    raw_ref[...] = jnp.dot(w3_ref[...], h2_ref[...],
                           preferred_element_type=jnp.float32) + b3_ref[...]

    # ---- raw2outputs: sequential alpha-compositing (VPU) -------------------
    T = jnp.ones((1, R), jnp.float32)            # exclusive cumprod of (1-alpha+1e-10)
    rgb_map = jnp.zeros((3, R), jnp.float32)
    depth = jnp.zeros((1, R), jnp.float32)
    acc = jnp.zeros((1, R), jnp.float32)

    for s in range(N_SAMPLES):
        raw_s = raw_ref[:, s * R:(s + 1) * R]                    # (C3, R)
        rgb = jax.nn.sigmoid(raw_s[0:3, :])                      # (3, R)
        sigma = jnp.maximum(raw_s[3:4, :], 0.0)                  # (1, R)
        alpha = 1.0 - jnp.exp(-sigma * (norm_d * deltas[s]))     # (1, R)

        w = alpha * T                                            # (1, R)
        out_ref[ROW_W0 + s:ROW_W0 + s + 1, :] = w                # visibility weights
        rgb_map = rgb_map + w * rgb
        depth = depth + w * z_vals[s]
        acc = acc + w
        T = T * (1.0 - alpha + 1e-10)

    # matches reference: NaN disp possible when acc == 0 (0/0), as in PyTorch
    disp = 1.0 / jnp.maximum(1e-10, depth / acc)                 # (1, R)

    # img2mse partials: per-ray squared error summed over RGB
    diff = rgb_map - tgt
    sqerr = jnp.sum(diff * diff, axis=0, keepdims=True)          # (1, R)

    out_ref[ROW_RGB:ROW_RGB + 3, :] = rgb_map
    out_ref[ROW_DISP:ROW_DISP + 1, :] = disp
    out_ref[ROW_ACC:ROW_ACC + 1, :] = acc
    out_ref[ROW_DEPTH:ROW_DEPTH + 1, :] = depth
    out_ref[ROW_SQERR:ROW_SQERR + 1, :] = sqerr
    out_ref[ROW_PAD:ROW_PAD + 1, :] = jnp.zeros((1, R), jnp.float32)


def fused_render(ray_slab, lat_t, params, *, tile_r=None):
    (w1x, w1y, w1z, w1l_t, b1, w2_t, b2, w3_t, b3) = params
    N = ray_slab.shape[1]
    if tile_r is None:
        # keep grid >= 2 when possible so the "parallel" axis spans both v7x TCs
        tile_r = TILE_R if (N % TILE_R == 0 and N >= 2 * TILE_R) else 128
    assert N % tile_r == 0, "number of rays must be a multiple of the ray tile"

    def ray_spec(rows):
        return pl.BlockSpec((rows, tile_r), lambda i: (0, i))

    def full_spec(arr):
        nd = arr.ndim
        return pl.BlockSpec(arr.shape, lambda i, _nd=nd: (0,) * _nd)

    nlanes = N_SAMPLES * tile_r
    return pl.pallas_call(
        _fused_render_kernel,
        out_shape=jax.ShapeDtypeStruct((OUT_ROWS, N), jnp.float32),
        grid_spec=pltpu.PrefetchScalarGridSpec(
            num_scalar_prefetch=0,
            grid=(N // tile_r,),
            in_specs=[
                ray_spec(RAY_ROWS), ray_spec(LATENT),
                full_spec(w1x), full_spec(w1y), full_spec(w1z),
                full_spec(w1l_t), full_spec(b1),
                full_spec(w2_t), full_spec(b2), full_spec(w3_t), full_spec(b3),
            ],
            out_specs=ray_spec(OUT_ROWS),
            scratch_shapes=[
                pltpu.VMEM((HIDDEN, nlanes), jnp.bfloat16),   # batched H1
                pltpu.VMEM((HIDDEN, nlanes), jnp.bfloat16),   # batched H2
                pltpu.VMEM((C3, nlanes), jnp.float32),        # batched raw
            ],
        ),
        compiler_params=pltpu.CompilerParams(dimension_semantics=("parallel",)),
    )(ray_slab, lat_t, w1x, w1y, w1z, w1l_t, b1, w2_t, b2, w3_t, b3)


# ----------------------------------------------------------------------------
# Training wrapper (JAX glue around the single fused Pallas kernel)
# ----------------------------------------------------------------------------
class TrainingWrapper:
    def __init__(self, key, num_timesteps=4):
        ks = jax.random.split(key, 8)
        d_in = 3 + LATENT
        # deterministic synthetic parameters (no checkpoint load)
        w1 = 0.1 * jax.random.normal(ks[0], (d_in, HIDDEN), jnp.float32)
        b1 = 0.1 * jax.random.normal(ks[1], (HIDDEN,), jnp.float32)
        w2 = 0.1 * jax.random.normal(ks[2], (HIDDEN, HIDDEN), jnp.float32)
        b2 = 0.1 * jax.random.normal(ks[3], (HIDDEN,), jnp.float32)
        w3 = 0.1 * jax.random.normal(ks[4], (HIDDEN, 4), jnp.float32)
        b3 = 0.1 * jax.random.normal(ks[5], (4,), jnp.float32)

        # One-time pre-transpose / pack for the lane-dense fused kernel.
        # Layer 1 splits into a per-point xyz part (VPU rank-1 columns) and a
        # per-ray latent part (bf16 MXU).  Layers 2/3 are bf16 for the MXU.
        w1xyz_t = w1[:3, :].T                                       # (H, 3) f32
        w1x = w1xyz_t[:, 0:1]
        w1y = w1xyz_t[:, 1:2]
        w1z = w1xyz_t[:, 2:3]
        w1l_t = w1[3:, :].T.astype(jnp.bfloat16)                    # (H, LATENT)
        w2_t = w2.T.astype(jnp.bfloat16)                            # (H, H)
        w3_t = jnp.zeros((C3, HIDDEN), jnp.float32).at[:4, :].set(w3.T).astype(jnp.bfloat16)
        b3_p = jnp.zeros((C3, 1), jnp.float32).at[:4, 0].set(b3)
        self.mlp_params = (w1x, w1y, w1z, w1l_t, b1.reshape(HIDDEN, 1),
                           w2_t, b2.reshape(HIDDEN, 1), w3_t, b3_p)

        # per-timestep ray-bending latents (torch.stack(latents, 0) equivalent)
        self.latents = 0.1 * jax.random.normal(ks[6], (num_timesteps, LATENT), jnp.float32)
        # TODO(synk): text_encoder.encode(text, genre) (string processing) has no Pallas
        # equivalent; text_genre_latents fall back to zeros, as in the module's except-path.

    @functools.partial(jax.jit, static_argnums=0)
    def forward(self, rays_o, rays_d, target_s, batch_pixel_indices, imageid_to_timestepid):
        N_rays = rays_o.shape[0]

        # gather per-ray ray-bending latents (additional_pixel_information)
        timesteps = jnp.take(imageid_to_timestepid, batch_pixel_indices[:, 0], axis=0)
        ray_latents = jnp.take(self.latents, timesteps, axis=0)     # (N, LATENT)

        # pack rays_o / rays_d / target into ONE lane-dense (16, N) slab
        slab = (jnp.zeros((RAY_ROWS, N_rays), jnp.float32)
                .at[0:3, :].set(rays_o.T)
                .at[3:6, :].set(rays_d.T)
                .at[6:9, :].set(target_s.T))
        lat_t = ray_latents.T.astype(jnp.bfloat16)                  # (LATENT, N)

        out = fused_render(slab, lat_t, self.mlp_params)            # (16, N)

        rgb_map = out[ROW_RGB:ROW_RGB + 3, :].T                     # (N, 3)
        disp_map = out[ROW_DISP, :]                                 # (N,)
        acc_map = out[ROW_ACC, :]                                   # (N,)
        # depth_map = out[ROW_DEPTH, :]; vis_weights = out[ROW_W0:, :].T  (unused)

        img_loss = jnp.sum(out[ROW_SQERR, :]) / jnp.float32(N_rays * 3)
        # ray_bender is None and offsets/divergence loss weights are 0 -> loss = img_loss
        loss = img_loss
        return loss, rgb_map, disp_map, acc_map


# ----------------------------------------------------------------------------
if __name__ == "__main__":
    key = jax.random.PRNGKey(0)
    k_o, k_d, k_t, k_idx, k_w = jax.random.split(key, 5)

    N_RAYS = 512          # 2 tiles of TILE_R=256 -> grid of 2 ("parallel" for 2 TCs)
    NUM_IMAGES = 6
    NUM_TIMESTEPS = 4

    rays_o = jax.random.normal(k_o, (N_RAYS, 3), jnp.float32)
    rays_d = jax.random.normal(k_d, (N_RAYS, 3), jnp.float32)
    rays_d = rays_d / jnp.linalg.norm(rays_d, axis=-1, keepdims=True)
    target_s = jax.random.uniform(k_t, (N_RAYS, 3), jnp.float32)
    batch_pixel_indices = jax.random.randint(k_idx, (N_RAYS, 2), 0, NUM_IMAGES)
    imageid_to_timestepid = jnp.arange(NUM_IMAGES, dtype=jnp.int32) % NUM_TIMESTEPS

    wrapper = TrainingWrapper(k_w, num_timesteps=NUM_TIMESTEPS)
    loss, rgb, disp, acc = wrapper.forward(
        rays_o, rays_d, target_s, batch_pixel_indices, imageid_to_timestepid)
    jax.block_until_ready((loss, rgb, disp, acc))

    assert loss.shape == () and rgb.shape == (N_RAYS, 3)
    assert disp.shape == (N_RAYS,) and acc.shape == (N_RAYS,)
    assert bool(jnp.isfinite(loss))
    print("KERNEL_OK")
</pallas_src>

<mosaic_0001>
module attributes {stable_mosaic.version = 11 : i64} {
  func.func @_fused_render_kernel(%arg0: i32, %arg1: memref<16x256xf32, #tpu.memory_space<vmem>>, %arg2: memref<32x256xbf16, #tpu.memory_space<vmem>>, %arg3: memref<64x1xf32, #tpu.memory_space<vmem>>, %arg4: memref<64x1xf32, #tpu.memory_space<vmem>>, %arg5: memref<64x1xf32, #tpu.memory_space<vmem>>, %arg6: memref<64x32xbf16, #tpu.memory_space<vmem>>, %arg7: memref<64x1xf32, #tpu.memory_space<vmem>>, %arg8: memref<64x64xbf16, #tpu.memory_space<vmem>>, %arg9: memref<64x1xf32, #tpu.memory_space<vmem>>, %arg10: memref<8x64xbf16, #tpu.memory_space<vmem>>, %arg11: memref<8x1xf32, #tpu.memory_space<vmem>>, %arg12: memref<16x256xf32, #tpu.memory_space<vmem>>, %arg13: memref<64x2048xbf16, #tpu.memory_space<vmem>>, %arg14: memref<64x2048xbf16, #tpu.memory_space<vmem>>, %arg15: memref<8x2048xf32, #tpu.memory_space<vmem>>) attributes {dimension_semantics = [#tpu.dimension_semantics<parallel>], iteration_bounds = array<i64: 2>, scalar_prefetch = 0 : i64, scratch_operands = 3 : i64, tpu.core_type = #tpu.core_type<tc>, window_params = [{transform_indices = @transform_0, window_bounds = array<i64: 16, 256>}, {transform_indices = @transform_1, window_bounds = array<i64: 32, 256>}, {pipeline_mode = #tpu.pipeline_mode<synchronous>, transform_indices = @transform_2, window_bounds = array<i64: 64, 1>}, {pipeline_mode = #tpu.pipeline_mode<synchronous>, transform_indices = @transform_3, window_bounds = array<i64: 64, 1>}, {pipeline_mode = #tpu.pipeline_mode<synchronous>, transform_indices = @transform_4, window_bounds = array<i64: 64, 1>}, {pipeline_mode = #tpu.pipeline_mode<synchronous>, transform_indices = @transform_5, window_bounds = array<i64: 64, 32>}, {pipeline_mode = #tpu.pipeline_mode<synchronous>, transform_indices = @transform_6, window_bounds = array<i64: 64, 1>}, {pipeline_mode = #tpu.pipeline_mode<synchronous>, transform_indices = @transform_7, window_bounds = array<i64: 64, 64>}, {pipeline_mode = #tpu.pipeline_mode<synchronous>, transform_indices = @transform_8, window_bounds = array<i64: 64, 1>}, {pipeline_mode = #tpu.pipeline_mode<synchronous>, transform_indices = @transform_9, window_bounds = array<i64: 8, 64>}, {pipeline_mode = #tpu.pipeline_mode<synchronous>, transform_indices = @transform_10, window_bounds = array<i64: 8, 1>}, {transform_indices = @transform_11, window_bounds = array<i64: 16, 256>}]} {
    %c0 = arith.constant 0 : index
    %c0_0 = arith.constant 0 : index
    %0 = vector.load %arg1[%c0, %c0_0] : memref<16x256xf32, #tpu.memory_space<vmem>>, vector<16x256xf32>
    %1 = vector.extract_strided_slice %0 {offsets = [0, 0], sizes = [1, 256], strides = [1, 1]} : vector<16x256xf32> to vector<1x256xf32>
    %2 = vector.extract_strided_slice %0 {offsets = [1, 0], sizes = [1, 256], strides = [1, 1]} : vector<16x256xf32> to vector<1x256xf32>
    %3 = vector.extract_strided_slice %0 {offsets = [2, 0], sizes = [1, 256], strides = [1, 1]} : vector<16x256xf32> to vector<1x256xf32>
    %4 = vector.extract_strided_slice %0 {offsets = [3, 0], sizes = [1, 256], strides = [1, 1]} : vector<16x256xf32> to vector<1x256xf32>
    %5 = vector.extract_strided_slice %0 {offsets = [4, 0], sizes = [1, 256], strides = [1, 1]} : vector<16x256xf32> to vector<1x256xf32>
    %6 = vector.extract_strided_slice %0 {offsets = [5, 0], sizes = [1, 256], strides = [1, 1]} : vector<16x256xf32> to vector<1x256xf32>
    %7 = vector.extract_strided_slice %0 {offsets = [6, 0], sizes = [3, 256], strides = [1, 1]} : vector<16x256xf32> to vector<3x256xf32>
    %8 = arith.mulf %4, %4 : vector<1x256xf32>
    %9 = arith.mulf %5, %5 : vector<1x256xf32>
    %10 = arith.addf %8, %9 : vector<1x256xf32>
    %11 = arith.mulf %6, %6 : vector<1x256xf32>
    %12 = arith.addf %10, %11 : vector<1x256xf32>
    %13 = math.sqrt %12 : vector<1x256xf32>
    %cst = arith.constant 0.000000e+00 : f32
    %14 = vector.broadcast %cst : f32 to vector<64x256xf32>
    %cst_1 = arith.constant 0.000000e+00 : f32
    %15 = vector.broadcast %cst_1 : f32 to vector<64x256xf32>
    %c0_2 = arith.constant 0 : index
    %c0_3 = arith.constant 0 : index
    %16 = vector.load %arg3[%c0_2, %c0_3] : memref<64x1xf32, #tpu.memory_space<vmem>>, vector<64x1xf32>
    %17 = vector.shape_cast %16 : vector<64x1xf32> to vector<64x1xf32>
    %18 = vector.broadcast %17 : vector<64x1xf32> to vector<64x256xf32>
    %19 = vector.broadcast %1 : vector<1x256xf32> to vector<64x256xf32>
    %20 = arith.mulf %18, %19 : vector<64x256xf32>
    %21 = arith.addf %14, %20 : vector<64x256xf32>
    %22 = vector.broadcast %4 : vector<1x256xf32> to vector<64x256xf32>
    %23 = arith.mulf %18, %22 : vector<64x256xf32>
    %24 = arith.addf %15, %23 : vector<64x256xf32>
    %c0_4 = arith.constant 0 : index
    %c0_5 = arith.constant 0 : index
    %25 = vector.load %arg4[%c0_4, %c0_5] : memref<64x1xf32, #tpu.memory_space<vmem>>, vector<64x1xf32>
    %26 = vector.shape_cast %25 : vector<64x1xf32> to vector<64x1xf32>
    %27 = vector.broadcast %26 : vector<64x1xf32> to vector<64x256xf32>
    %28 = vector.broadcast %2 : vector<1x256xf32> to vector<64x256xf32>
    %29 = arith.mulf %27, %28 : vector<64x256xf32>
    %30 = arith.addf %21, %29 : vector<64x256xf32>
    %31 = vector.broadcast %5 : vector<1x256xf32> to vector<64x256xf32>
    %32 = arith.mulf %27, %31 : vector<64x256xf32>
    %33 = arith.addf %24, %32 : vector<64x256xf32>
    %c0_6 = arith.constant 0 : index
    %c0_7 = arith.constant 0 : index
    %34 = vector.load %arg5[%c0_6, %c0_7] : memref<64x1xf32, #tpu.memory_space<vmem>>, vector<64x1xf32>
    %35 = vector.shape_cast %34 : vector<64x1xf32> to vector<64x1xf32>
    %36 = vector.broadcast %35 : vector<64x1xf32> to vector<64x256xf32>
    %37 = vector.broadcast %3 : vector<1x256xf32> to vector<64x256xf32>
    %38 = arith.mulf %36, %37 : vector<64x256xf32>
    %39 = arith.addf %30, %38 : vector<64x256xf32>
    %40 = vector.broadcast %6 : vector<1x256xf32> to vector<64x256xf32>
    %41 = arith.mulf %36, %40 : vector<64x256xf32>
    %42 = arith.addf %33, %41 : vector<64x256xf32>
    %c0_8 = arith.constant 0 : index
    %c0_9 = arith.constant 0 : index
    %43 = vector.load %arg6[%c0_8, %c0_9] : memref<64x32xbf16, #tpu.memory_space<vmem>>, vector<64x32xbf16>
    %c0_10 = arith.constant 0 : index
    %c0_11 = arith.constant 0 : index
    %44 = vector.load %arg2[%c0_10, %c0_11] : memref<32x256xbf16, #tpu.memory_space<vmem>>, vector<32x256xbf16>
    %cst_12 = arith.constant dense<0.000000e+00> : vector<64x256xf32>
    %45 = tpu.matmul %43, %44, %cst_12 {dimension_numbers = #tpu.dot_dimension_numbers<[1], [0], [0], [1], [0, 0, 1, 1], [], []>} : vector<64x32xbf16>, vector<32x256xbf16>, vector<64x256xf32> -> vector<64x256xf32>
    %c0_13 = arith.constant 0 : index
    %c0_14 = arith.constant 0 : index
    %46 = vector.load %arg7[%c0_13, %c0_14] : memref<64x1xf32, #tpu.memory_space<vmem>>, vector<64x1xf32>
    %47 = vector.broadcast %46 : vector<64x1xf32> to vector<64x256xf32>
    %48 = arith.addf %45, %47 : vector<64x256xf32>
    %49 = arith.addf %48, %39 : vector<64x256xf32>
    %cst_15 = arith.constant 2.000000e+00 : f32
    %50 = vector.broadcast %cst_15 : f32 to vector<64x256xf32>
    %51 = arith.mulf %50, %42 : vector<64x256xf32>
    %52 = arith.addf %49, %51 : vector<64x256xf32>
    %cst_16 = arith.constant 0.000000e+00 : f32
    %53 = vector.broadcast %cst_16 : f32 to vector<64x256xf32>
    %54 = arith.maximumf %52, %53 : vector<64x256xf32>
    %55 = arith.truncf %54 : vector<64x256xf32> to vector<64x256xbf16>
    %c0_17 = arith.constant 0 : index
    %c0_18 = arith.constant 0 : index
    %56 = vector.load %arg13[%c0_17, %c0_18] : memref<64x2048xbf16, #tpu.memory_space<vmem>>, vector<64x256xbf16>
    tpu.vector_store %arg13[%c0_17, %c0_18], %55 {strides = array<i32>} : memref<64x2048xbf16, #tpu.memory_space<vmem>>, vector<64x256xbf16>,
    %cst_19 = arith.constant 2.57142854 : f32
    %57 = vector.broadcast %cst_19 : f32 to vector<64x256xf32>
    %58 = arith.mulf %57, %42 : vector<64x256xf32>
    %59 = arith.addf %49, %58 : vector<64x256xf32>
    %cst_20 = arith.constant 0.000000e+00 : f32
    %60 = vector.broadcast %cst_20 : f32 to vector<64x256xf32>
    %61 = arith.maximumf %59, %60 : vector<64x256xf32>
    %62 = arith.truncf %61 : vector<64x256xf32> to vector<64x256xbf16>
    %c0_21 = arith.constant 0 : index
    %c256 = arith.constant 256 : index
    %63 = vector.load %arg13[%c0_21, %c256] : memref<64x2048xbf16, #tpu.memory_space<vmem>>, vector<64x256xbf16>
    tpu.vector_store %arg13[%c0_21, %c256], %62 {strides = array<i32>} : memref<64x2048xbf16, #tpu.memory_space<vmem>>, vector<64x256xbf16>,
    %cst_22 = arith.constant 3.14285707 : f32
    %64 = vector.broadcast %cst_22 : f32 to vector<64x256xf32>
    %65 = arith.mulf %64, %42 : vector<64x256xf32>
    %66 = arith.addf %49, %65 : vector<64x256xf32>
    %cst_23 = arith.constant 0.000000e+00 : f32
    %67 = vector.broadcast %cst_23 : f32 to vector<64x256xf32>
    %68 = arith.maximumf %66, %67 : vector<64x256xf32>
    %69 = arith.truncf %68 : vector<64x256xf32> to vector<64x256xbf16>
    %c0_24 = arith.constant 0 : index
    %c512 = arith.constant 512 : index
    %70 = vector.load %arg13[%c0_24, %c512] : memref<64x2048xbf16, #tpu.memory_space<vmem>>, vector<64x256xbf16>
    tpu.vector_store %arg13[%c0_24, %c512], %69 {strides = array<i32>} : memref<64x2048xbf16, #tpu.memory_space<vmem>>, vector<64x256xbf16>,
    %cst_25 = arith.constant 3.71428561 : f32
    %71 = vector.broadcast %cst_25 : f32 to vector<64x256xf32>
    %72 = arith.mulf %71, %42 : vector<64x256xf32>
    %73 = arith.addf %49, %72 : vector<64x256xf32>
    %cst_26 = arith.constant 0.000000e+00 : f32
    %74 = vector.broadcast %cst_26 : f32 to vector<64x256xf32>
    %75 = arith.maximumf %73, %74 : vector<64x256xf32>
    %76 = arith.truncf %75 : vector<64x256xf32> to vector<64x256xbf16>
    %c0_27 = arith.constant 0 : index
    %c768 = arith.constant 768 : index
    %77 = vector.load %arg13[%c0_27, %c768] : memref<64x2048xbf16, #tpu.memory_space<vmem>>, vector<64x256xbf16>
    tpu.vector_store %arg13[%c0_27, %c768], %76 {strides = array<i32>} : memref<64x2048xbf16, #tpu.memory_space<vmem>>, vector<64x256xbf16>,
    %cst_28 = arith.constant 4.28571415 : f32
    %78 = vector.broadcast %cst_28 : f32 to vector<64x256xf32>
    %79 = arith.mulf %78, %42 : vector<64x256xf32>
    %80 = arith.addf %49, %79 : vector<64x256xf32>
    %cst_29 = arith.constant 0.000000e+00 : f32
    %81 = vector.broadcast %cst_29 : f32 to vector<64x256xf32>
    %82 = arith.maximumf %80, %81 : vector<64x256xf32>
    %83 = arith.truncf %82 : vector<64x256xf32> to vector<64x256xbf16>
    %c0_30 = arith.constant 0 : index
    %c1024 = arith.constant 1024 : index
    %84 = vector.load %arg13[%c0_30, %c1024] : memref<64x2048xbf16, #tpu.memory_space<vmem>>, vector<64x256xbf16>
    tpu.vector_store %arg13[%c0_30, %c1024], %83 {strides = array<i32>} : memref<64x2048xbf16, #tpu.memory_space<vmem>>, vector<64x256xbf16>,
    %cst_31 = arith.constant 4.85714293 : f32
    %85 = vector.broadcast %cst_31 : f32 to vector<64x256xf32>
    %86 = arith.mulf %85, %42 : vector<64x256xf32>
    %87 = arith.addf %49, %86 : vector<64x256xf32>
    %cst_32 = arith.constant 0.000000e+00 : f32
    %88 = vector.broadcast %cst_32 : f32 to vector<64x256xf32>
    %89 = arith.maximumf %87, %88 : vector<64x256xf32>
    %90 = arith.truncf %89 : vector<64x256xf32> to vector<64x256xbf16>
    %c0_33 = arith.constant 0 : index
    %c1280 = arith.constant 1280 : index
    %91 = vector.load %arg13[%c0_33, %c1280] : memref<64x2048xbf16, #tpu.memory_space<vmem>>, vector<64x256xbf16>
    tpu.vector_store %arg13[%c0_33, %c1280], %90 {strides = array<i32>} : memref<64x2048xbf16, #tpu.memory_space<vmem>>, vector<64x256xbf16>,
    %cst_34 = arith.constant 5.42857122 : f32
    %92 = vector.broadcast %cst_34 : f32 to vector<64x256xf32>
    %93 = arith.mulf %92, %42 : vector<64x256xf32>
    %94 = arith.addf %49, %93 : vector<64x256xf32>
    %cst_35 = arith.constant 0.000000e+00 : f32
    %95 = vector.broadcast %cst_35 : f32 to vector<64x256xf32>
    %96 = arith.maximumf %94, %95 : vector<64x256xf32>
    %97 = arith.truncf %96 : vector<64x256xf32> to vector<64x256xbf16>
    %c0_36 = arith.constant 0 : index
    %c1536 = arith.constant 1536 : index
    %98 = vector.load %arg13[%c0_36, %c1536] : memref<64x2048xbf16, #tpu.memory_space<vmem>>, vector<64x256xbf16>
    tpu.vector_store %arg13[%c0_36, %c1536], %97 {strides = array<i32>} : memref<64x2048xbf16, #tpu.memory_space<vmem>>, vector<64x256xbf16>,
    %cst_37 = arith.constant 6.000000e+00 : f32
    %99 = vector.broadcast %cst_37 : f32 to vector<64x256xf32>
    %100 = arith.mulf %99, %42 : vector<64x256xf32>
    %101 = arith.addf %49, %100 : vector<64x256xf32>
    %cst_38 = arith.constant 0.000000e+00 : f32
    %102 = vector.broadcast %cst_38 : f32 to vector<64x256xf32>
    %103 = arith.maximumf %101, %102 : vector<64x256xf32>
    %104 = arith.truncf %103 : vector<64x256xf32> to vector<64x256xbf16>
    %c0_39 = arith.constant 0 : index
    %c1792 = arith.constant 1792 : index
    %105 = vector.load %arg13[%c0_39, %c1792] : memref<64x2048xbf16, #tpu.memory_space<vmem>>, vector<64x256xbf16>
    tpu.vector_store %arg13[%c0_39, %c1792], %104 {strides = array<i32>} : memref<64x2048xbf16, #tpu.memory_space<vmem>>, vector<64x256xbf16>,
    %c0_40 = arith.constant 0 : index
    %c0_41 = arith.constant 0 : index
    %106 = vector.load %arg8[%c0_40, %c0_41] : memref<64x64xbf16, #tpu.memory_space<vmem>>, vector<64x64xbf16>
    %c0_42 = arith.constant 0 : index
    %c0_43 = arith.constant 0 : index
    %107 = vector.load %arg13[%c0_42, %c0_43] : memref<64x2048xbf16, #tpu.memory_space<vmem>>, vector<64x2048xbf16>
    %cst_44 = arith.constant dense<0.000000e+00> : vector<64x2048xf32>
    %108 = tpu.matmul %106, %107, %cst_44 {dimension_numbers = #tpu.dot_dimension_numbers<[1], [0], [0], [1], [0, 0, 1, 1], [], []>} : vector<64x64xbf16>, vector<64x2048xbf16>, vector<64x2048xf32> -> vector<64x2048xf32>
    %c0_45 = arith.constant 0 : index
    %c0_46 = arith.constant 0 : index
    %109 = vector.load %arg9[%c0_45, %c0_46] : memref<64x1xf32, #tpu.memory_space<vmem>>, vector<64x1xf32>
    %110 = vector.broadcast %109 : vector<64x1xf32> to vector<64x2048xf32>
    %111 = arith.addf %108, %110 : vector<64x2048xf32>
    %cst_47 = arith.constant 0.000000e+00 : f32
    %112 = vector.broadcast %cst_47 : f32 to vector<64x2048xf32>
    %113 = arith.maximumf %111, %112 : vector<64x2048xf32>
    %114 = arith.truncf %113 : vector<64x2048xf32> to vector<64x2048xbf16>
    %c0_48 = arith.constant 0 : index
    %c0_49 = arith.constant 0 : index
    %115 = vector.load %arg14[%c0_48, %c0_49] : memref<64x2048xbf16, #tpu.memory_space<vmem>>, vector<64x2048xbf16>
    tpu.vector_store %arg14[%c0_48, %c0_49], %114 {strides = array<i32>} : memref<64x2048xbf16, #tpu.memory_space<vmem>>, vector<64x2048xbf16>,
    %c0_50 = arith.constant 0 : index
    %c0_51 = arith.constant 0 : index
    %116 = vector.load %arg10[%c0_50, %c0_51] : memref<8x64xbf16, #tpu.memory_space<vmem>>, vector<8x64xbf16>
    %c0_52 = arith.constant 0 : index
    %c0_53 = arith.constant 0 : index
    %117 = vector.load %arg14[%c0_52, %c0_53] : memref<64x2048xbf16, #tpu.memory_space<vmem>>, vector<64x2048xbf16>
    %cst_54 = arith.constant dense<0.000000e+00> : vector<8x2048xf32>
    %118 = tpu.matmul %116, %117, %cst_54 {dimension_numbers = #tpu.dot_dimension_numbers<[1], [0], [0], [1], [0, 0, 1, 1], [], []>} : vector<8x64xbf16>, vector<64x2048xbf16>, vector<8x2048xf32> -> vector<8x2048xf32>
    %c0_55 = arith.constant 0 : index
    %c0_56 = arith.constant 0 : index
    %119 = vector.load %arg11[%c0_55, %c0_56] : memref<8x1xf32, #tpu.memory_space<vmem>>, vector<8x1xf32>
    %120 = vector.broadcast %119 : vector<8x1xf32> to vector<8x2048xf32>
    %121 = arith.addf %118, %120 : vector<8x2048xf32>
    %c0_57 = arith.constant 0 : index
    %c0_58 = arith.constant 0 : index
    %122 = vector.load %arg15[%c0_57, %c0_58] : memref<8x2048xf32, #tpu.memory_space<vmem>>, vector<8x2048xf32>
    tpu.vector_store %arg15[%c0_57, %c0_58], %121 {strides = array<i32>} : memref<8x2048xf32, #tpu.memory_space<vmem>>, vector<8x2048xf32>,
    %cst_59 = arith.constant 1.000000e+00 : f32
    %123 = vector.broadcast %cst_59 : f32 to vector<1x256xf32>
    %cst_60 = arith.constant 0.000000e+00 : f32
    %124 = vector.broadcast %cst_60 : f32 to vector<3x256xf32>
    %cst_61 = arith.constant 0.000000e+00 : f32
    %125 = vector.broadcast %cst_61 : f32 to vector<1x256xf32>
    %cst_62 = arith.constant 0.000000e+00 : f32
    %126 = vector.broadcast %cst_62 : f32 to vector<1x256xf32>
    %c0_63 = arith.constant 0 : index
    %c0_64 = arith.constant 0 : index
    %127 = vector.load %arg15[%c0_63, %c0_64] : memref<8x2048xf32, #tpu.memory_space<vmem>>, vector<8x256xf32>
    %128 = vector.extract_strided_slice %127 {offsets = [0, 0], sizes = [3, 256], strides = [1, 1]} : vector<8x256xf32> to vector<3x256xf32>
    %129 = arith.negf %128 : vector<3x256xf32>
    %130 = math.exp %129 : vector<3x256xf32>
    %cst_65 = arith.constant 1.000000e+00 : f32
    %131 = vector.broadcast %cst_65 : f32 to vector<3x256xf32>
    %132 = arith.addf %131, %130 : vector<3x256xf32>
    %133 = arith.divf %131, %132 : vector<3x256xf32>
    %134 = vector.extract_strided_slice %127 {offsets = [3, 0], sizes = [1, 256], strides = [1, 1]} : vector<8x256xf32> to vector<1x256xf32>
    %cst_66 = arith.constant 0.000000e+00 : f32
    %135 = vector.broadcast %cst_66 : f32 to vector<1x256xf32>
    %136 = arith.maximumf %134, %135 : vector<1x256xf32>
    %cst_67 = arith.constant 0.000000e+00 : f32
    %137 = vector.broadcast %cst_67 : f32 to vector<1x256xf32>
    %138 = arith.subf %137, %136 : vector<1x256xf32>
    %cst_68 = arith.constant 0.571428597 : f32
    %139 = vector.broadcast %cst_68 : f32 to vector<1x256xf32>
    %140 = arith.mulf %13, %139 : vector<1x256xf32>
    %141 = arith.mulf %138, %140 : vector<1x256xf32>
    %142 = math.exp %141 : vector<1x256xf32>
    %cst_69 = arith.constant 1.000000e+00 : f32
    %143 = vector.broadcast %cst_69 : f32 to vector<1x256xf32>
    %144 = arith.subf %143, %142 : vector<1x256xf32>
    %145 = arith.mulf %144, %123 : vector<1x256xf32>
    %c8 = arith.constant 8 : index
    %c0_70 = arith.constant 0 : index
    %146 = vector.load %arg12[%c8, %c0_70] : memref<16x256xf32, #tpu.memory_space<vmem>>, vector<1x256xf32>
    tpu.vector_store %arg12[%c8, %c0_70], %145 {strides = array<i32>} : memref<16x256xf32, #tpu.memory_space<vmem>>, vector<1x256xf32>,
    %147 = vector.broadcast %145 : vector<1x256xf32> to vector<3x256xf32>
    %148 = arith.mulf %147, %133 : vector<3x256xf32>
    %149 = arith.addf %124, %148 : vector<3x256xf32>
    %cst_71 = arith.constant 2.000000e+00 : f32
    %150 = vector.broadcast %cst_71 : f32 to vector<1x256xf32>
    %151 = arith.mulf %145, %150 : vector<1x256xf32>
    %152 = arith.addf %125, %151 : vector<1x256xf32>
    %153 = arith.addf %126, %145 : vector<1x256xf32>
    %cst_72 = arith.constant 1.000000e+00 : f32
    %154 = vector.broadcast %cst_72 : f32 to vector<1x256xf32>
    %155 = arith.subf %154, %144 : vector<1x256xf32>
    %cst_73 = arith.constant 1.000000e-10 : f32
    %156 = vector.broadcast %cst_73 : f32 to vector<1x256xf32>
    %157 = arith.addf %155, %156 : vector<1x256xf32>
    %158 = arith.mulf %123, %157 : vector<1x256xf32>
    %c0_74 = arith.constant 0 : index
    %c256_75 = arith.constant 256 : index
    %159 = vector.load %arg15[%c0_74, %c256_75] : memref<8x2048xf32, #tpu.memory_space<vmem>>, vector<8x256xf32>
    %160 = vector.extract_strided_slice %159 {offsets = [0, 0], sizes = [3, 256], strides = [1, 1]} : vector<8x256xf32> to vector<3x256xf32>
    %161 = arith.negf %160 : vector<3x256xf32>
    %162 = math.exp %161 : vector<3x256xf32>
    %cst_76 = arith.constant 1.000000e+00 : f32
    %163 = vector.broadcast %cst_76 : f32 to vector<3x256xf32>
    %164 = arith.addf %163, %162 : vector<3x256xf32>
    %165 = arith.divf %163, %164 : vector<3x256xf32>
    %166 = vector.extract_strided_slice %159 {offsets = [3, 0], sizes = [1, 256], strides = [1, 1]} : vector<8x256xf32> to vector<1x256xf32>
    %cst_77 = arith.constant 0.000000e+00 : f32
    %167 = vector.broadcast %cst_77 : f32 to vector<1x256xf32>
    %168 = arith.maximumf %166, %167 : vector<1x256xf32>
    %cst_78 = arith.constant 0.000000e+00 : f32
    %169 = vector.broadcast %cst_78 : f32 to vector<1x256xf32>
    %170 = arith.subf %169, %168 : vector<1x256xf32>
    %cst_79 = arith.constant 0.571428597 : f32
    %171 = vector.broadcast %cst_79 : f32 to vector<1x256xf32>
    %172 = arith.mulf %13, %171 : vector<1x256xf32>
    %173 = arith.mulf %170, %172 : vector<1x256xf32>
    %174 = math.exp %173 : vector<1x256xf32>
    %cst_80 = arith.constant 1.000000e+00 : f32
    %175 = vector.broadcast %cst_80 : f32 to vector<1x256xf32>
    %176 = arith.subf %175, %174 : vector<1x256xf32>
    %177 = arith.mulf %176, %158 : vector<1x256xf32>
    %c9 = arith.constant 9 : index
    %c0_81 = arith.constant 0 : index
    %178 = vector.load %arg12[%c9, %c0_81] : memref<16x256xf32, #tpu.memory_space<vmem>>, vector<1x256xf32>
    tpu.vector_store %arg12[%c9, %c0_81], %177 {strides = array<i32>} : memref<16x256xf32, #tpu.memory_space<vmem>>, vector<1x256xf32>,
    %179 = vector.broadcast %177 : vector<1x256xf32> to vector<3x256xf32>
    %180 = arith.mulf %179, %165 : vector<3x256xf32>
    %181 = arith.addf %149, %180 : vector<3x256xf32>
    %cst_82 = arith.constant 2.57142854 : f32
    %182 = vector.broadcast %cst_82 : f32 to vector<1x256xf32>
    %183 = arith.mulf %177, %182 : vector<1x256xf32>
    %184 = arith.addf %152, %183 : vector<1x256xf32>
    %185 = arith.addf %153, %177 : vector<1x256xf32>
    %cst_83 = arith.constant 1.000000e+00 : f32
    %186 = vector.broadcast %cst_83 : f32 to vector<1x256xf32>
    %187 = arith.subf %186, %176 : vector<1x256xf32>
    %cst_84 = arith.constant 1.000000e-10 : f32
    %188 = vector.broadcast %cst_84 : f32 to vector<1x256xf32>
    %189 = arith.addf %187, %188 : vector<1x256xf32>
    %190 = arith.mulf %158, %189 : vector<1x256xf32>
    %c0_85 = arith.constant 0 : index
    %c512_86 = arith.constant 512 : index
    %191 = vector.load %arg15[%c0_85, %c512_86] : memref<8x2048xf32, #tpu.memory_space<vmem>>, vector<8x256xf32>
    %192 = vector.extract_strided_slice %191 {offsets = [0, 0], sizes = [3, 256], strides = [1, 1]} : vector<8x256xf32> to vector<3x256xf32>
    %193 = arith.negf %192 : vector<3x256xf32>
    %194 = math.exp %193 : vector<3x256xf32>
    %cst_87 = arith.constant 1.000000e+00 : f32
    %195 = vector.broadcast %cst_87 : f32 to vector<3x256xf32>
    %196 = arith.addf %195, %194 : vector<3x256xf32>
    %197 = arith.divf %195, %196 : vector<3x256xf32>
    %198 = vector.extract_strided_slice %191 {offsets = [3, 0], sizes = [1, 256], strides = [1, 1]} : vector<8x256xf32> to vector<1x256xf32>
    %cst_88 = arith.constant 0.000000e+00 : f32
    %199 = vector.broadcast %cst_88 : f32 to vector<1x256xf32>
    %200 = arith.maximumf %198, %199 : vector<1x256xf32>
    %cst_89 = arith.constant 0.000000e+00 : f32
    %201 = vector.broadcast %cst_89 : f32 to vector<1x256xf32>
    %202 = arith.subf %201, %200 : vector<1x256xf32>
    %cst_90 = arith.constant 0.571428597 : f32
    %203 = vector.broadcast %cst_90 : f32 to vector<1x256xf32>
    %204 = arith.mulf %13, %203 : vector<1x256xf32>
    %205 = arith.mulf %202, %204 : vector<1x256xf32>
    %206 = math.exp %205 : vector<1x256xf32>
    %cst_91 = arith.constant 1.000000e+00 : f32
    %207 = vector.broadcast %cst_91 : f32 to vector<1x256xf32>
    %208 = arith.subf %207, %206 : vector<1x256xf32>
    %209 = arith.mulf %208, %190 : vector<1x256xf32>
    %c10 = arith.constant 10 : index
    %c0_92 = arith.constant 0 : index
    %210 = vector.load %arg12[%c10, %c0_92] : memref<16x256xf32, #tpu.memory_space<vmem>>, vector<1x256xf32>
    tpu.vector_store %arg12[%c10, %c0_92], %209 {strides = array<i32>} : memref<16x256xf32, #tpu.memory_space<vmem>>, vector<1x256xf32>,
    %211 = vector.broadcast %209 : vector<1x256xf32> to vector<3x256xf32>
    %212 = arith.mulf %211, %197 : vector<3x256xf32>
    %213 = arith.addf %181, %212 : vector<3x256xf32>
    %cst_93 = arith.constant 3.14285707 : f32
    %214 = vector.broadcast %cst_93 : f32 to vector<1x256xf32>
    %215 = arith.mulf %209, %214 : vector<1x256xf32>
    %216 = arith.addf %184, %215 : vector<1x256xf32>
    %217 = arith.addf %185, %209 : vector<1x256xf32>
    %cst_94 = arith.constant 1.000000e+00 : f32
    %218 = vector.broadcast %cst_94 : f32 to vector<1x256xf32>
    %219 = arith.subf %218, %208 : vector<1x256xf32>
    %cst_95 = arith.constant 1.000000e-10 : f32
    %220 = vector.broadcast %cst_95 : f32 to vector<1x256xf32>
    %221 = arith.addf %219, %220 : vector<1x256xf32>
    %222 = arith.mulf %190, %221 : vector<1x256xf32>
    %c0_96 = arith.constant 0 : index
    %c768_97 = arith.constant 768 : index
    %223 = vector.load %arg15[%c0_96, %c768_97] : memref<8x2048xf32, #tpu.memory_space<vmem>>, vector<8x256xf32>
    %224 = vector.extract_strided_slice %223 {offsets = [0, 0], sizes = [3, 256], strides = [1, 1]} : vector<8x256xf32> to vector<3x256xf32>
    %225 = arith.negf %224 : vector<3x256xf32>
    %226 = math.exp %225 : vector<3x256xf32>
    %cst_98 = arith.constant 1.000000e+00 : f32
    %227 = vector.broadcast %cst_98 : f32 to vector<3x256xf32>
    %228 = arith.addf %227, %226 : vector<3x256xf32>
    %229 = arith.divf %227, %228 : vector<3x256xf32>
    %230 = vector.extract_strided_slice %223 {offsets = [3, 0], sizes = [1, 256], strides = [1, 1]} : vector<8x256xf32> to vector<1x256xf32>
    %cst_99 = arith.constant 0.000000e+00 : f32
    %231 = vector.broadcast %cst_99 : f32 to vector<1x256xf32>
    %232 = arith.maximumf %230, %231 : vector<1x256xf32>
    %cst_100 = arith.constant 0.000000e+00 : f32
    %233 = vector.broadcast %cst_100 : f32 to vector<1x256xf32>
    %234 = arith.subf %233, %232 : vector<1x256xf32>
    %cst_101 = arith.constant 0.571428597 : f32
    %235 = vector.broadcast %cst_101 : f32 to vector<1x256xf32>
    %236 = arith.mulf %13, %235 : vector<1x256xf32>
    %237 = arith.mulf %234, %236 : vector<1x256xf32>
    %238 = math.exp %237 : vector<1x256xf32>
    %cst_102 = arith.constant 1.000000e+00 : f32
    %239 = vector.broadcast %cst_102 : f32 to vector<1x256xf32>
    %240 = arith.subf %239, %238 : vector<1x256xf32>
    %241 = arith.mulf %240, %222 : vector<1x256xf32>
    %c11 = arith.constant 11 : index
    %c0_103 = arith.constant 0 : index
    %242 = vector.load %arg12[%c11, %c0_103] : memref<16x256xf32, #tpu.memory_space<vmem>>, vector<1x256xf32>
    tpu.vector_store %arg12[%c11, %c0_103], %241 {strides = array<i32>} : memref<16x256xf32, #tpu.memory_space<vmem>>, vector<1x256xf32>,
    %243 = vector.broadcast %241 : vector<1x256xf32> to vector<3x256xf32>
    %244 = arith.mulf %243, %229 : vector<3x256xf32>
    %245 = arith.addf %213, %244 : vector<3x256xf32>
    %cst_104 = arith.constant 3.71428561 : f32
    %246 = vector.broadcast %cst_104 : f32 to vector<1x256xf32>
    %247 = arith.mulf %241, %246 : vector<1x256xf32>
    %248 = arith.addf %216, %247 : vector<1x256xf32>
    %249 = arith.addf %217, %241 : vector<1x256xf32>
    %cst_105 = arith.constant 1.000000e+00 : f32
    %250 = vector.broadcast %cst_105 : f32 to vector<1x256xf32>
    %251 = arith.subf %250, %240 : vector<1x256xf32>
    %cst_106 = arith.constant 1.000000e-10 : f32
    %252 = vector.broadcast %cst_106 : f32 to vector<1x256xf32>
    %253 = arith.addf %251, %252 : vector<1x256xf32>
    %254 = arith.mulf %222, %253 : vector<1x256xf32>
    %c0_107 = arith.constant 0 : index
    %c1024_108 = arith.constant 1024 : index
    %255 = vector.load %arg15[%c0_107, %c1024_108] : memref<8x2048xf32, #tpu.memory_space<vmem>>, vector<8x256xf32>
    %256 = vector.extract_strided_slice %255 {offsets = [0, 0], sizes = [3, 256], strides = [1, 1]} : vector<8x256xf32> to vector<3x256xf32>
    %257 = arith.negf %256 : vector<3x256xf32>
    %258 = math.exp %257 : vector<3x256xf32>
    %cst_109 = arith.constant 1.000000e+00 : f32
    %259 = vector.broadcast %cst_109 : f32 to vector<3x256xf32>
    %260 = arith.addf %259, %258 : vector<3x256xf32>
    %261 = arith.divf %259, %260 : vector<3x256xf32>
    %262 = vector.extract_strided_slice %255 {offsets = [3, 0], sizes = [1, 256], strides = [1, 1]} : vector<8x256xf32> to vector<1x256xf32>
    %cst_110 = arith.constant 0.000000e+00 : f32
    %263 = vector.broadcast %cst_110 : f32 to vector<1x256xf32>
    %264 = arith.maximumf %262, %263 : vector<1x256xf32>
    %cst_111 = arith.constant 0.000000e+00 : f32
    %265 = vector.broadcast %cst_111 : f32 to vector<1x256xf32>
    %266 = arith.subf %265, %264 : vector<1x256xf32>
    %cst_112 = arith.constant 0.571428597 : f32
    %267 = vector.broadcast %cst_112 : f32 to vector<1x256xf32>
    %268 = arith.mulf %13, %267 : vector<1x256xf32>
    %269 = arith.mulf %266, %268 : vector<1x256xf32>
    %270 = math.exp %269 : vector<1x256xf32>
    %cst_113 = arith.constant 1.000000e+00 : f32
    %271 = vector.broadcast %cst_113 : f32 to vector<1x256xf32>
    %272 = arith.subf %271, %270 : vector<1x256xf32>
    %273 = arith.mulf %272, %254 : vector<1x256xf32>
    %c12 = arith.constant 12 : index
    %c0_114 = arith.constant 0 : index
    %274 = vector.load %arg12[%c12, %c0_114] : memref<16x256xf32, #tpu.memory_space<vmem>>, vector<1x256xf32>
    tpu.vector_store %arg12[%c12, %c0_114], %273 {strides = array<i32>} : memref<16x256xf32, #tpu.memory_space<vmem>>, vector<1x256xf32>,
    %275 = vector.broadcast %273 : vector<1x256xf32> to vector<3x256xf32>
    %276 = arith.mulf %275, %261 : vector<3x256xf32>
    %277 = arith.addf %245, %276 : vector<3x256xf32>
    %cst_115 = arith.constant 4.28571415 : f32
    %278 = vector.broadcast %cst_115 : f32 to vector<1x256xf32>
    %279 = arith.mulf %273, %278 : vector<1x256xf32>
    %280 = arith.addf %248, %279 : vector<1x256xf32>
    %281 = arith.addf %249, %273 : vector<1x256xf32>
    %cst_116 = arith.constant 1.000000e+00 : f32
    %282 = vector.broadcast %cst_116 : f32 to vector<1x256xf32>
    %283 = arith.subf %282, %272 : vector<1x256xf32>
    %cst_117 = arith.constant 1.000000e-10 : f32
    %284 = vector.broadcast %cst_117 : f32 to vector<1x256xf32>
    %285 = arith.addf %283, %284 : vector<1x256xf32>
    %286 = arith.mulf %254, %285 : vector<1x256xf32>
    %c0_118 = arith.constant 0 : index
    %c1280_119 = arith.constant 1280 : index
    %287 = vector.load %arg15[%c0_118, %c1280_119] : memref<8x2048xf32, #tpu.memory_space<vmem>>, vector<8x256xf32>
    %288 = vector.extract_strided_slice %287 {offsets = [0, 0], sizes = [3, 256], strides = [1, 1]} : vector<8x256xf32> to vector<3x256xf32>
    %289 = arith.negf %288 : vector<3x256xf32>
    %290 = math.exp %289 : vector<3x256xf32>
    %cst_120 = arith.constant 1.000000e+00 : f32
    %291 = vector.broadcast %cst_120 : f32 to vector<3x256xf32>
    %292 = arith.addf %291, %290 : vector<3x256xf32>
    %293 = arith.divf %291, %292 : vector<3x256xf32>
    %294 = vector.extract_strided_slice %287 {offsets = [3, 0], sizes = [1, 256], strides = [1, 1]} : vector<8x256xf32> to vector<1x256xf32>
    %cst_121 = arith.constant 0.000000e+00 : f32
    %295 = vector.broadcast %cst_121 : f32 to vector<1x256xf32>
    %296 = arith.maximumf %294, %295 : vector<1x256xf32>
    %cst_122 = arith.constant 0.000000e+00 : f32
    %297 = vector.broadcast %cst_122 : f32 to vector<1x256xf32>
    %298 = arith.subf %297, %296 : vector<1x256xf32>
    %cst_123 = arith.constant 0.571428597 : f32
    %299 = vector.broadcast %cst_123 : f32 to vector<1x256xf32>
    %300 = arith.mulf %13, %299 : vector<1x256xf32>
    %301 = arith.mulf %298, %300 : vector<1x256xf32>
    %302 = math.exp %301 : vector<1x256xf32>
    %cst_124 = arith.constant 1.000000e+00 : f32
    %303 = vector.broadcast %cst_124 : f32 to vector<1x256xf32>
    %304 = arith.subf %303, %302 : vector<1x256xf32>
    %305 = arith.mulf %304, %286 : vector<1x256xf32>
    %c13 = arith.constant 13 : index
    %c0_125 = arith.constant 0 : index
    %306 = vector.load %arg12[%c13, %c0_125] : memref<16x256xf32, #tpu.memory_space<vmem>>, vector<1x256xf32>
    tpu.vector_store %arg12[%c13, %c0_125], %305 {strides = array<i32>} : memref<16x256xf32, #tpu.memory_space<vmem>>, vector<1x256xf32>,
    %307 = vector.broadcast %305 : vector<1x256xf32> to vector<3x256xf32>
    %308 = arith.mulf %307, %293 : vector<3x256xf32>
    %309 = arith.addf %277, %308 : vector<3x256xf32>
    %cst_126 = arith.constant 4.85714293 : f32
    %310 = vector.broadcast %cst_126 : f32 to vector<1x256xf32>
    %311 = arith.mulf %305, %310 : vector<1x256xf32>
    %312 = arith.addf %280, %311 : vector<1x256xf32>
    %313 = arith.addf %281, %305 : vector<1x256xf32>
    %cst_127 = arith.constant 1.000000e+00 : f32
    %314 = vector.broadcast %cst_127 : f32 to vector<1x256xf32>
    %315 = arith.subf %314, %304 : vector<1x256xf32>
    %cst_128 = arith.constant 1.000000e-10 : f32
    %316 = vector.broadcast %cst_128 : f32 to vector<1x256xf32>
    %317 = arith.addf %315, %316 : vector<1x256xf32>
    %318 = arith.mulf %286, %317 : vector<1x256xf32>
    %c0_129 = arith.constant 0 : index
    %c1536_130 = arith.constant 1536 : index
    %319 = vector.load %arg15[%c0_129, %c1536_130] : memref<8x2048xf32, #tpu.memory_space<vmem>>, vector<8x256xf32>
    %320 = vector.extract_strided_slice %319 {offsets = [0, 0], sizes = [3, 256], strides = [1, 1]} : vector<8x256xf32> to vector<3x256xf32>
    %321 = arith.negf %320 : vector<3x256xf32>
    %322 = math.exp %321 : vector<3x256xf32>
    %cst_131 = arith.constant 1.000000e+00 : f32
    %323 = vector.broadcast %cst_131 : f32 to vector<3x256xf32>
    %324 = arith.addf %323, %322 : vector<3x256xf32>
    %325 = arith.divf %323, %324 : vector<3x256xf32>
    %326 = vector.extract_strided_slice %319 {offsets = [3, 0], sizes = [1, 256], strides = [1, 1]} : vector<8x256xf32> to vector<1x256xf32>
    %cst_132 = arith.constant 0.000000e+00 : f32
    %327 = vector.broadcast %cst_132 : f32 to vector<1x256xf32>
    %328 = arith.maximumf %326, %327 : vector<1x256xf32>
    %cst_133 = arith.constant 0.000000e+00 : f32
    %329 = vector.broadcast %cst_133 : f32 to vector<1x256xf32>
    %330 = arith.subf %329, %328 : vector<1x256xf32>
    %cst_134 = arith.constant 0.571428597 : f32
    %331 = vector.broadcast %cst_134 : f32 to vector<1x256xf32>
    %332 = arith.mulf %13, %331 : vector<1x256xf32>
    %333 = arith.mulf %330, %332 : vector<1x256xf32>
    %334 = math.exp %333 : vector<1x256xf32>
    %cst_135 = arith.constant 1.000000e+00 : f32
    %335 = vector.broadcast %cst_135 : f32 to vector<1x256xf32>
    %336 = arith.subf %335, %334 : vector<1x256xf32>
    %337 = arith.mulf %336, %318 : vector<1x256xf32>
    %c14 = arith.constant 14 : index
    %c0_136 = arith.constant 0 : index
    %338 = vector.load %arg12[%c14, %c0_136] : memref<16x256xf32, #tpu.memory_space<vmem>>, vector<1x256xf32>
    tpu.vector_store %arg12[%c14, %c0_136], %337 {strides = array<i32>} : memref<16x256xf32, #tpu.memory_space<vmem>>, vector<1x256xf32>,
    %339 = vector.broadcast %337 : vector<1x256xf32> to vector<3x256xf32>
    %340 = arith.mulf %339, %325 : vector<3x256xf32>
    %341 = arith.addf %309, %340 : vector<3x256xf32>
    %cst_137 = arith.constant 5.42857122 : f32
    %342 = vector.broadcast %cst_137 : f32 to vector<1x256xf32>
    %343 = arith.mulf %337, %342 : vector<1x256xf32>
    %344 = arith.addf %312, %343 : vector<1x256xf32>
    %345 = arith.addf %313, %337 : vector<1x256xf32>
    %cst_138 = arith.constant 1.000000e+00 : f32
    %346 = vector.broadcast %cst_138 : f32 to vector<1x256xf32>
    %347 = arith.subf %346, %336 : vector<1x256xf32>
    %cst_139 = arith.constant 1.000000e-10 : f32
    %348 = vector.broadcast %cst_139 : f32 to vector<1x256xf32>
    %349 = arith.addf %347, %348 : vector<1x256xf32>
    %350 = arith.mulf %318, %349 : vector<1x256xf32>
    %c0_140 = arith.constant 0 : index
    %c1792_141 = arith.constant 1792 : index
    %351 = vector.load %arg15[%c0_140, %c1792_141] : memref<8x2048xf32, #tpu.memory_space<vmem>>, vector<8x256xf32>
    %352 = vector.extract_strided_slice %351 {offsets = [0, 0], sizes = [3, 256], strides = [1, 1]} : vector<8x256xf32> to vector<3x256xf32>
    %353 = arith.negf %352 : vector<3x256xf32>
    %354 = math.exp %353 : vector<3x256xf32>
    %cst_142 = arith.constant 1.000000e+00 : f32
    %355 = vector.broadcast %cst_142 : f32 to vector<3x256xf32>
    %356 = arith.addf %355, %354 : vector<3x256xf32>
    %357 = arith.divf %355, %356 : vector<3x256xf32>
    %358 = vector.extract_strided_slice %351 {offsets = [3, 0], sizes = [1, 256], strides = [1, 1]} : vector<8x256xf32> to vector<1x256xf32>
    %cst_143 = arith.constant 0.000000e+00 : f32
    %359 = vector.broadcast %cst_143 : f32 to vector<1x256xf32>
    %360 = arith.maximumf %358, %359 : vector<1x256xf32>
    %cst_144 = arith.constant 0.000000e+00 : f32
    %361 = vector.broadcast %cst_144 : f32 to vector<1x256xf32>
    %362 = arith.subf %361, %360 : vector<1x256xf32>
    %cst_145 = arith.constant 1.000000e+10 : f32
    %363 = vector.broadcast %cst_145 : f32 to vector<1x256xf32>
    %364 = arith.mulf %13, %363 : vector<1x256xf32>
    %365 = arith.mulf %362, %364 : vector<1x256xf32>
    %366 = math.exp %365 : vector<1x256xf32>
    %cst_146 = arith.constant 1.000000e+00 : f32
    %367 = vector.broadcast %cst_146 : f32 to vector<1x256xf32>
    %368 = arith.subf %367, %366 : vector<1x256xf32>
    %369 = arith.mulf %368, %350 : vector<1x256xf32>
    %c15 = arith.constant 15 : index
    %c0_147 = arith.constant 0 : index
    %370 = vector.load %arg12[%c15, %c0_147] : memref<16x256xf32, #tpu.memory_space<vmem>>, vector<1x256xf32>
    tpu.vector_store %arg12[%c15, %c0_147], %369 {strides = array<i32>} : memref<16x256xf32, #tpu.memory_space<vmem>>, vector<1x256xf32>,
    %371 = vector.broadcast %369 : vector<1x256xf32> to vector<3x256xf32>
    %372 = arith.mulf %371, %357 : vector<3x256xf32>
    %373 = arith.addf %341, %372 : vector<3x256xf32>
    %cst_148 = arith.constant 6.000000e+00 : f32
    %374 = vector.broadcast %cst_148 : f32 to vector<1x256xf32>
    %375 = arith.mulf %369, %374 : vector<1x256xf32>
    %376 = arith.addf %344, %375 : vector<1x256xf32>
    %377 = arith.addf %345, %369 : vector<1x256xf32>
    %378 = arith.divf %376, %377 : vector<1x256xf32>
    %cst_149 = arith.constant 1.000000e-10 : f32
    %379 = vector.broadcast %cst_149 : f32 to vector<1x256xf32>
    %380 = arith.maximumf %379, %378 : vector<1x256xf32>
    %cst_150 = arith.constant 1.000000e+00 : f32
    %381 = vector.broadcast %cst_150 : f32 to vector<1x256xf32>
    %382 = arith.divf %381, %380 : vector<1x256xf32>
    %383 = arith.subf %373, %7 : vector<3x256xf32>
    %384 = arith.mulf %383, %383 : vector<3x256xf32>
    %cst_151 = arith.constant dense<0.000000e+00> : vector<256xf32>
    %385 = vector.multi_reduction <add>, %384, %cst_151 [0] : vector<3x256xf32> to vector<256xf32>
    %386 = vector.shape_cast %385 : vector<256xf32> to vector<1x256xf32>
    %c0_152 = arith.constant 0 : index
    %c0_153 = arith.constant 0 : index
    %387 = vector.load %arg12[%c0_152, %c0_153] : memref<16x256xf32, #tpu.memory_space<vmem>>, vector<3x256xf32>
    tpu.vector_store %arg12[%c0_152, %c0_153], %373 {strides = array<i32>} : memref<16x256xf32, #tpu.memory_space<vmem>>, vector<3x256xf32>,
    %c3 = arith.constant 3 : index
    %c0_154 = arith.constant 0 : index
    %388 = vector.load %arg12[%c3, %c0_154] : memref<16x256xf32, #tpu.memory_space<vmem>>, vector<1x256xf32>
    tpu.vector_store %arg12[%c3, %c0_154], %382 {strides = array<i32>} : memref<16x256xf32, #tpu.memory_space<vmem>>, vector<1x256xf32>,
    %c4 = arith.constant 4 : index
    %c0_155 = arith.constant 0 : index
    %389 = vector.load %arg12[%c4, %c0_155] : memref<16x256xf32, #tpu.memory_space<vmem>>, vector<1x256xf32>
    tpu.vector_store %arg12[%c4, %c0_155], %377 {strides = array<i32>} : memref<16x256xf32, #tpu.memory_space<vmem>>, vector<1x256xf32>,
    %c5 = arith.constant 5 : index
    %c0_156 = arith.constant 0 : index
    %390 = vector.load %arg12[%c5, %c0_156] : memref<16x256xf32, #tpu.memory_space<vmem>>, vector<1x256xf32>
    tpu.vector_store %arg12[%c5, %c0_156], %376 {strides = array<i32>} : memref<16x256xf32, #tpu.memory_space<vmem>>, vector<1x256xf32>,
    %c6 = arith.constant 6 : index
    %c0_157 = arith.constant 0 : index
    %391 = vector.load %arg12[%c6, %c0_157] : memref<16x256xf32, #tpu.memory_space<vmem>>, vector<1x256xf32>
    tpu.vector_store %arg12[%c6, %c0_157], %386 {strides = array<i32>} : memref<16x256xf32, #tpu.memory_space<vmem>>, vector<1x256xf32>,
    %cst_158 = arith.constant 0.000000e+00 : f32
    %392 = vector.broadcast %cst_158 : f32 to vector<1x256xf32>
    %c7 = arith.constant 7 : index
    %c0_159 = arith.constant 0 : index
    %393 = vector.load %arg12[%c7, %c0_159] : memref<16x256xf32, #tpu.memory_space<vmem>>, vector<1x256xf32>
    tpu.vector_store %arg12[%c7, %c0_159], %392 {strides = array<i32>} : memref<16x256xf32, #tpu.memory_space<vmem>>, vector<1x256xf32>,
    return
  }
  func.func @transform_0(%arg0: i32) -> (i32, i32) {
    %c0_i32 = arith.constant 0 : i32
    %c0_i32_0 = arith.constant 0 : i32
    return %c0_i32, %arg0 : i32, i32
  }
  func.func @transform_1(%arg0: i32) -> (i32, i32) {
    %c0_i32 = arith.constant 0 : i32
    %c0_i32_0 = arith.constant 0 : i32
    return %c0_i32, %arg0 : i32, i32
  }
  func.func @transform_2(%arg0: i32) -> (i32, i32) {
    %c0_i32 = arith.constant 0 : i32
    %c0_i32_0 = arith.constant 0 : i32
    %c0_i32_1 = arith.constant 0 : i32
    return %c0_i32, %c0_i32_0 : i32, i32
  }
  func.func @transform_3(%arg0: i32) -> (i32, i32) {
    %c0_i32 = arith.constant 0 : i32
    %c0_i32_0 = arith.constant 0 : i32
    %c0_i32_1 = arith.constant 0 : i32
    return %c0_i32, %c0_i32_0 : i32, i32
  }
  func.func @transform_4(%arg0: i32) -> (i32, i32) {
    %c0_i32 = arith.constant 0 : i32
    %c0_i32_0 = arith.constant 0 : i32
    %c0_i32_1 = arith.constant 0 : i32
    return %c0_i32, %c0_i32_0 : i32, i32
  }
  func.func @transform_5(%arg0: i32) -> (i32, i32) {
    %c0_i32 = arith.constant 0 : i32
    %c0_i32_0 = arith.constant 0 : i32
    %c0_i32_1 = arith.constant 0 : i32
    return %c0_i32, %c0_i32_0 : i32, i32
  }
  func.func @transform_6(%arg0: i32) -> (i32, i32) {
    %c0_i32 = arith.constant 0 : i32
    %c0_i32_0 = arith.constant 0 : i32
    %c0_i32_1 = arith.constant 0 : i32
    return %c0_i32, %c0_i32_0 : i32, i32
  }
  func.func @transform_7(%arg0: i32) -> (i32, i32) {
    %c0_i32 = arith.constant 0 : i32
    %c0_i32_0 = arith.constant 0 : i32
    %c0_i32_1 = arith.constant 0 : i32
    return %c0_i32, %c0_i32_0 : i32, i32
  }
  func.func @transform_8(%arg0: i32) -> (i32, i32) {
    %c0_i32 = arith.constant 0 : i32
    %c0_i32_0 = arith.constant 0 : i32
    %c0_i32_1 = arith.constant 0 : i32
    return %c0_i32, %c0_i32_0 : i32, i32
  }
  func.func @transform_9(%arg0: i32) -> (i32, i32) {
    %c0_i32 = arith.constant 0 : i32
    %c0_i32_0 = arith.constant 0 : i32
    %c0_i32_1 = arith.constant 0 : i32
    return %c0_i32, %c0_i32_0 : i32, i32
  }
  func.func @transform_10(%arg0: i32) -> (i32, i32) {
    %c0_i32 = arith.constant 0 : i32
    %c0_i32_0 = arith.constant 0 : i32
    %c0_i32_1 = arith.constant 0 : i32
    return %c0_i32, %c0_i32_0 : i32, i32
  }
  func.func @transform_11(%arg0: i32) -> (i32, i32) {
    %c0_i32 = arith.constant 0 : i32
    %c0_i32_0 = arith.constant 0 : i32
    return %c0_i32, %arg0 : i32, i32
  }
}

</mosaic_0001>

<bundles_post_ra>
// kernel: forward.1
= control target key start
LH: loop header
LB: loop body
LE: loop exit
PB: predicated region body
PF: predicated region fallthrough
CT: control target
= control target key end

     0   :  { %s6002_s17 = smov 0   ;;  %s6004_s18 = smov 0   ;;  %s8222_s0 = inlined_call_operand.vmem [shape: f32[16,512], index: 0, kind: input, shape index: {}]   ;;  %s8223_s1 = inlined_call_operand.vmem [shape: bf16[32,512], index: 1, kind: input, shape index: {}]   ;;  %s8224_s2 = inlined_call_operand.vmem [shape: f32[64,1], index: 2, kind: input, shape index: {}]   ;;  %s8225_s3 = inlined_call_operand.vmem [shape: f32[64,1], index: 3, kind: input, shape index: {}]   ;;  %s8226_s4 = inlined_call_operand.vmem [shape: f32[64,1], index: 4, kind: input, shape index: {}]   ;;  %s8227_s5 = inlined_call_operand.vmem [shape: bf16[64,32], index: 5, kind: input, shape index: {}]   ;;  %s8228_s6 = inlined_call_operand.vmem [shape: f32[64,1], index: 6, kind: input, shape index: {}]   ;;  %s8229_s7 = inlined_call_operand.vmem [shape: bf16[64,64], index: 7, kind: input, shape index: {}]   ;;  %s8230_s8 = inlined_call_operand.vmem [shape: f32[64,1], index: 8, kind: input, shape index: {}]   ;;  %s8231_s9 = inlined_call_operand.vmem [shape: bf16[8,64], index: 9, kind: input, shape index: {}]   ;;  %s8232_s10 = inlined_call_operand.vmem [shape: f32[8,1], index: 10, kind: input, shape index: {}]   ;;  %s8233_s11 = inlined_call_operand.vmem [shape: f32[16,512], index: 11, kind: output, shape index: {}]  }
   0x1   :  { %s6006_s19 = smov 0  }
   0x2 LB: > { %s5144_s20 = sadd.s32 4294967295, %s5937_s19   ;;  %s6019_s21 = sadd.s32 1, %s5937_s19   ;;  %s5937_s19 = sphi %s6006_s19, %s8511_s19   ;;  %s5933_s18 = sphi %s6004_s18, %s8510_s18   ;;  %s5929_s17 = sphi %s6002_s17, %s8509_s17  }
   0x3   : > { %s25_s22 = ssub.s32 %s5937_s19, %s6019_s21  ;;  %s28_s23 = sadd.s32 1, %s5933_s18 }
   0x4   : > { %p26_p0 = scmp.eq.s32.totalorder %s25_s22, 0  ;;  %p35_p1 = scmp.ne.s32.totalorder %s5933_s18, %s5929_s17 }
   0x5   : > { %p36_p2 = scmp.eq.s32.totalorder %s5937_s19, 0  ;;  %p280_p3 = scmp.eq.s32.totalorder %s5144_s20, 1 }
   0x6   : > { %s6030_s24 = scalar_select %p26_p0, %s5933_s18, %s28_s23  }
   0x7   : > { %p6032_p4 = por %p36_p2, %p35_p1  ;;  %p6036_p5 = por %p280_p3, %p35_p1 }
   0x8   : > { %p5147_p6 = scmp.ge.s32.totalorder %s5937_s19, 2 }
   0xa   : > { %329 = sbr.rel (%p5147_p6) target bundleno = 27 (0x1b), region = 52 }
   0xf   : > { %332 = sbr.rel (!%p6032_p4) target bundleno = 21 (0x15), region = 56  ;;  %s334_s27 = sand.u32 (%p6032_p4), 1, %s5933_s18  }
  0x10   : > { %s5504_s28 = sshll.u32 (%p6032_p4), %s5937_s19, 4  ;;  %s5148_s29 = sshll.u32 (%p6032_p4), %s334_s27, 5 }
  0x11   : > { %s339_s13 = scalar_lea.vmem (%p6032_p4), %s8222_s0, %s5504_s28  ;;  %s336_s14 = scalar_lea.vmem (%p6032_p4), [#allocation5], %s5148_s29 }
  0x12   : > { %v352_v0 = vld [vmem:[%s339_s13] sm:$0xff] (%p6032_p4)  ;;  %v354_v1 = vld [vmem:[%s339_s13 + $0x8] sm:$0xff] (%p6032_p4) }
  0x13   : > { %v356_v2 = vld [vmem:[%s339_s13 + $0x20] sm:$0xff] (%p6032_p4)  ;;  %353 = vst [vmem:[%s336_s14] sm:$0xff] (%p6032_p4), %v352_v0  ;;  %355 = vst [vmem:[%s336_s14 + $0x8] sm:$0xff] (%p6032_p4), %v354_v1  ;;  %v358_v3 = vld [vmem:[%s339_s13 + $0x28] sm:$0xff] (%p6032_p4) }
  0x14   : > { %357 = vst [vmem:[%s336_s14 + $0x10] sm:$0xff] %v356_v2  ;;  %359 = vst [vmem:[%s336_s14 + $0x18] sm:$0xff] %v358_v3 }
  0x15 PF: > { %365 = sbr.rel (!%p6032_p4) target bundleno = 27 (0x1b), region = 79  ;;  %s367_s15 = sand.u32 (%p6032_p4), 1, %s5933_s18  }
  0x16   : > { %s5505_s16 = sshll.u32 (%p6032_p4), %s5937_s19, 3  ;;  %s5151_s22 = sshll.u32 (%p6032_p4), %s367_s15, 5 }
  0x17   : > { %s372_s28 = scalar_lea.vmem (%p6032_p4), %s8223_s1, %s5505_s16  ;;  %s369_s29 = scalar_lea.vmem (%p6032_p4), [#allocation6], %s5151_s22 }
  0x18   : > { %v407_v4 = vld [vmem:[%s372_s28] sm:$0xff] (%p6032_p4)  ;;  %v409_v5 = vld [vmem:[%s372_s28 + $0x10] sm:$0xff] (%p6032_p4) }
  0x19   : > { %v411_v6 = vld [vmem:[%s372_s28 + $0x20] sm:$0xff] (%p6032_p4)  ;;  %408 = vst [vmem:[%s369_s29] sm:$0xff] (%p6032_p4), %v407_v4  ;;  %410 = vst [vmem:[%s369_s29 + $0x8] sm:$0xff] (%p6032_p4), %v409_v5  ;;  %v413_v7 = vld [vmem:[%s372_s28 + $0x30] sm:$0xff] (%p6032_p4) }
  0x1a   : > { %412 = vst [vmem:[%s369_s29 + $0x10] sm:$0xff] %v411_v6  ;;  %414 = vst [vmem:[%s369_s29 + $0x18] sm:$0xff] %v413_v7 }
  0x1b PF: > { %p5154_p7 = scmp.ge.s32.totalorder %s5937_s19, 1  ;;  %p419_p8 = scmp.lt.s32.totalorder %s5937_s19, 3 }
  0x1d   : > { %p420_p9 = pnand %p5154_p7, %p419_p8 }
  0x1f   : > { %423 = sbr.rel (%p420_p9) target bundleno = 933 (0x3a5), region = 117 }
  0x24   : > { %v647_v8 = vld [vmem:[%s8225_s3 + $0x30] sm:$0xff]  ;;  %s426_s14 = sand.u32 1, %s5929_s17   ;;  %v8234_v10 = vmov 0   ;;  %v561_v11 = vlaneseq  ;;  %v648_v12 = vld [vmem:[%s8225_s3 + $0x38] sm:$0xff]  ;;  %v8255_v14 = vmov 0  ;;  %v5940_v17 = vmov 0.0  }
  0x25   : > { %v519_v9 = vld [vmem:[%s8224_s2 + $0x30] sm:$0xff]  ;;  %5791 = vset.pattern.permute.xlu1 %v8234_v10  ;;  %5790 = vset.pattern.permute.xlu0 %v8234_v10  ;;  %s6066_s15 = sshll.u32 %s426_s14, 5  ;;  %v520_v13 = vld [vmem:[%s8224_s2 + $0x38] sm:$0xff]  ;;  %v518_v24 = vld [vmem:[%s8224_s2 + $0x28] sm:$0xff]  ;;  %vm997_vm1 = vcmask 261120   ;;  %vm2391_vm2 = vcmask 523264  }
  0x26   : > { %681 = vperm.xlu1 %5791, %v647_v8   ;;  %553 = vperm.xlu0 %5790, %v519_v9   ;;  %vm6075_vm0 = vcmp.lt.s32.totalorder %v561_v11, 256  ;;  %s435_s17 = scalar_lea.vmem [#allocation6], %s6066_s15  ;;  %s6083_s28 = scalar_lea.vmem [#allocation7], %s6066_s15  ;;  %v776_v21 = vld [vmem:[%s8226_s4 + $0x38] sm:$0xff]  ;;  %v775_v22 = vld [vmem:[%s8226_s4 + $0x30] sm:$0xff]  ;;  %v517_v25 = vld [vmem:[%s8224_s2 + $0x20] sm:$0xff] }
  0x27   : > { %v8256_v14 = vsel %vm6075_vm0, 4294967295, %v8255_v14  ;;  %1042 = vmatprep.mubr.bf16.mxu0 %v8234_v10  ;;  %2436 = vmatprep.mubr.bf16.mxu1 %v8234_v10  ;;  %v907_v15 = vld [vmem:[%s435_s17 + $0x10] sm:$0xff]  ;;  %v908_v16 = vld [vmem:[%s435_s17 + $0x18] sm:$0xff]  ;;  %5498 = vst.msk [vmem:[%s6083_s28 + $0x7] ss:$8 sm:$0x3] %vm6075_vm0, %v5940_v17 }
  0x28   : > { %8257 = vst [vmem:[#allocation8_spill] sm:$0xff] %v8256_v14  ;;  %v5792_v18 = vld [vmem:[%s435_s17 + $0x14] ss:$8 sps:$4 sm:$0xff]   ;;  %v5164_v19 = vcombine.low %v907_v15, %v908_v16  ;;  %v5794_v20 = vld [vmem:[%s435_s17 + $0x4] ss:$8 sps:$4 sm:$0xff]   ;;  %v6220_v3 = vshrl.u32 %v561_v11, 7 }
  0x29   : > { %1022 = vmatprep.subr.bf16.mxu0 %v5792_v18  ;;  %v5796_v23 = vld [vmem:[%s435_s17] ss:$8 sps:$4 sm:$0xff]   ;;  %v916_v29 = vld [vmem:[%s8228_s6 + $0x38] sm:$0xff]  ;;  %v915_v30 = vld [vmem:[%s8228_s6 + $0x30] sm:$0xff]  ;;  %s6225_s14 = scalar_lea.vmem [#allocation5], %s6066_s15  ;;  %vm4914_vm7 = vcmask 1041408  }
  0x2a   : > { %686 = vperm.xlu1 %5791, %v648_v12   ;;  %558 = vperm.xlu0 %5790, %v520_v13   ;;  %v5797_v26 = vld [vmem:[%s8227_s5] sm:$0xff]   ;;  %v646_v27 = vld [vmem:[%s8225_s3 + $0x28] sm:$0xff]  ;;  %v516_v34 = vld [vmem:[%s8224_s2 + $0x18] sm:$0xff]  ;;  %8258 = vst [vmem:[#allocation9_spill] sm:$0xff] %v6220_v3  ;;  %v691_v6 = vsub.s32 1, %v6220_v3  ;;  %v731_v7 = vsub.s32 4, %v6220_v3 }
  0x2b   : > { %1023 = vmatpush1.bf16.msra.mxu0 %v5164_v19  ;;  %v645_v28 = vld [vmem:[%s8225_s3 + $0x20] sm:$0xff]  ;;  %v5798_v31 = vld [vmem:[%s8227_s5 + $0x8] sm:$0xff]   ;;  %v515_v35 = vld [vmem:[%s8224_s2 + $0x10] sm:$0xff]  ;;  %v563_v12 = vsub.s32 0, %v6220_v3  ;;  %v6231_v13 = vsub.s32 3, %v6220_v3  ;;  %vm4927_vm8 = vcmask 1042432  }
  0x2c   : > { %1024 = vmatprep.subr.bf16.mxu0 %v5794_v20  ;;  %v774_v32 = vld [vmem:[%s8226_s4 + $0x28] sm:$0xff]  ;;  %v773_v33 = vld [vmem:[%s8226_s4 + $0x20] sm:$0xff]  ;;  %v5799_v36 = vld [vmem:[%s8227_s5 + $0x10] sm:$0xff]   ;;  %s5634_s13 = sshll.u32 (%p6036_p5), %s5144_s20, 4 }
  0x2d   : > { %v644_v37 = vld [vmem:[%s8225_s3 + $0x18] sm:$0xff]  ;;  %v643_v38 = vld [vmem:[%s8225_s3 + $0x10] sm:$0xff]  ;;  %v914_v39 = vld [vmem:[%s8228_s6 + $0x28] sm:$0xff]  ;;  %8259 = vst [vmem:[#allocation10_spill] sm:$0xff] %v6231_v13  ;;  %s5046_s16 = scalar_lea.vmem (%p6036_p5), %s8233_s11, %s5634_s13 }
  0x2e   : > { %814 = vperm.xlu1 %5791, %v776_v21   ;;  %809 = vperm.xlu0 %5790, %v775_v22   ;;  %v913_v40 = vld [vmem:[%s8228_s6 + $0x20] sm:$0xff]  ;;  %v5800_v41 = vld [vmem:[%s8227_s5 + $0x18] sm:$0xff]   ;;  %v771_v43 = vld [vmem:[%s8226_s4 + $0x10] sm:$0xff] }
  0x2f   : > { %1025 = vmatpush1.bf16.msra.mxu0 %v5796_v23  ;;  %v772_v42 = vld [vmem:[%s8226_s4 + $0x18] sm:$0xff]  ;;  %v514_v44 = vld [vmem:[%s8224_s2 + $0x8] sm:$0xff]  ;;  %v513_v45 = vld [vmem:[%s8224_s2] sm:$0xff] }
  0x30   : > { %v642_v46 = vld [vmem:[%s8225_s3 + $0x8] sm:$0xff]  ;;  %v641_v47 = vld [vmem:[%s8225_s3] sm:$0xff]  ;;  %v912_v48 = vld [vmem:[%s8228_s6 + $0x18] sm:$0xff] }
  0x31   : > { %v911_v49 = vld [vmem:[%s8228_s6 + $0x10] sm:$0xff]  ;;  %v770_v50 = vld [vmem:[%s8226_s4 + $0x8] sm:$0xff]  ;;  %v769_v51 = vld [vmem:[%s8226_s4] sm:$0xff] }
  0x32   : > { %548 = vperm.xlu1 %5791, %v518_v24   ;;  %543 = vperm.xlu0 %5790, %v517_v25   ;;  %v910_v52 = vld [vmem:[%s8228_s6 + $0x8] sm:$0xff]  ;;  %v909_v53 = vld [vmem:[%s8228_s6] sm:$0xff]  ;;  %v2010_v54 = vld [vmem:[%s8230_s8 + $0x38] sm:$0xff] }
  0x33   : > { %5166 = vmatmul.mubr.msk.bf16.vlgmr.msra.gmra.mxu0 %vm997_vm1, %v5797_v26  ;;  %v2009_v55 = vld [vmem:[%s8230_s8 + $0x30] sm:$0xff]  ;;  %v2008_v56 = vld [vmem:[%s8230_s8 + $0x28] sm:$0xff]  ;;  %v2007_v57 = vld [vmem:[%s8230_s8 + $0x20] sm:$0xff]  ;;  %v819_v26 = vsub.s32 2, %v6220_v3 }
  0x34   : > { %1052 = vmatprep.mubr.bf16.mxu0 %v8234_v10  ;;  %v2006_v58 = vld [vmem:[%s8230_s8 + $0x18] sm:$0xff]  ;;  %v2005_v59 = vld [vmem:[%s8230_s8 + $0x10] sm:$0xff]  ;;  %v2004_v60 = vld [vmem:[%s8230_s8 + $0x8] sm:$0xff] }
  0x35   : > { %v2003_v61 = vld [vmem:[%s8230_s8] sm:$0xff]  ;;  %v480_v9 = vld [vmem:[%s6225_s14 + $0x8] sm:$0xff] }
  0x36   : > { %676 = vperm.xlu1 %5791, %v646_v27   ;;  %671 = vperm.xlu0 %5790, %v645_v28   ;;  %v3629_v62 = vld [vmem:[%s8232_s10] sm:$0xff]  ;;  %v6239_v17 = vrot.slane %v480_v9, %v691_v6  ;;  %v6243_v19 = vrot.slane %v480_v9, %v731_v7  ;;  %v6247_v21 = vrot.slane %v480_v9, %v563_v12  ;;  %v859_v27 = vsub.s32 5, %v6220_v3 }
  0x37   : > { %v479_v8 = vld [vmem:[%s6225_s14] sm:$0xff]  ;;  %v6253_v23 = vrot.slane %v480_v9, %v6231_v13 }
  0x38   : > { %v6237_v16 = vrot.slane %v479_v8, %v691_v6  ;;  %v6241_v18 = vrot.slane %v479_v8, %v731_v7  ;;  %v6245_v20 = vrot.slane %v479_v8, %v563_v12  ;;  %v6250_v22 = vrot.slane %v479_v8, %v6231_v13 }
  0x3a   : > { %954 = vperm.xlu1 %5791, %v916_v29   ;;  %949 = vperm.xlu0 %5790, %v915_v30  }
  0x3b   : > { %5167 = vmatmul.mubr.msk.bf16.gmra.mxu0 %vm997_vm1, %v5798_v31 }
  0x3c   : > { %1062 = vmatprep.mubr.bf16.mxu0 %v8234_v10 }
  0x3e   : > { %804 = vperm.xlu1 %5791, %v774_v32   ;;  %799 = vperm.xlu0 %5790, %v773_v33  }
  0x42   : > { %538 = vperm.xlu1 %5791, %v516_v34   ;;  %533 = vperm.xlu0 %5790, %v515_v35  }
  0x43   : > { %5168 = vmatmul.mubr.msk.bf16.gmra.mxu0 %vm997_vm1, %v5799_v36 }
  0x44   : > { %1072 = vmatprep.mubr.bf16.mxu0 %v8234_v10 }
  0x46   : > { %666 = vperm.xlu1 %5791, %v644_v37   ;;  %661 = vperm.xlu0 %5790, %v643_v38  }
  0x4a   : > { %944 = vperm.xlu1 %5791, %v914_v39   ;;  %939 = vperm.xlu0 %5790, %v913_v40  }
  0x4b   : > { %5169 = vmatmul.mubr.msk.bf16.gmra.mxu0 %vm997_vm1, %v5800_v41 }
  0x4c   : > { %2509 = vmatprep.mubr.bf16.mxu0 %v8234_v10 }
  0x4e   : > { %794 = vperm.xlu1 %5791, %v772_v42   ;;  %789 = vperm.xlu0 %5790, %v771_v43  }
  0x52   : > { %528 = vperm.xlu1 %5791, %v514_v44   ;;  %523 = vperm.xlu0 %5790, %v513_v45  }
  0x56   : > { %656 = vperm.xlu1 %5791, %v642_v46   ;;  %651 = vperm.xlu0 %5790, %v641_v47   ;;  %v6281_v46 = vrot.slane %v479_v8, %v819_v26  ;;  %v6283_v47 = vrot.slane %v480_v9, %v819_v26 }
  0x5a   : > { %934 = vperm.xlu1 %5791, %v912_v48   ;;  %929 = vperm.xlu0 %5790, %v911_v49   ;;  %v6285_v48 = vrot.slane %v479_v8, %v859_v27  ;;  %v6287_v49 = vrot.slane %v480_v9, %v859_v27 }
  0x5e   : > { %784 = vperm.xlu1 %5791, %v770_v50   ;;  %779 = vperm.xlu0 %5790, %v769_v51  }
  0x62   : > { %924 = vperm.xlu1 %5791, %v910_v52   ;;  %919 = vperm.xlu0 %5790, %v909_v53  }
  0x66   : > { %2048 = vperm.xlu1 %5791, %v2010_v54   ;;  %2043 = vperm.xlu0 %5790, %v2009_v55  }
  0x6a   : > { %2038 = vperm.xlu1 %5791, %v2008_v56   ;;  %2033 = vperm.xlu0 %5790, %v2007_v57  }
  0x6e   : > { %2028 = vperm.xlu1 %5791, %v2006_v58   ;;  %2023 = vperm.xlu0 %5790, %v2005_v59  }
  0x72   : > { %2018 = vperm.xlu1 %5791, %v2004_v60   ;;  %2013 = vperm.xlu0 %5790, %v2003_v61  }
  0x76   : > { %3632 = vperm.xlu0 %5790, %v3629_v62  }
  0xa1   : > { %v682_v63 = vpop.permute.xlu1 %681  ;;  %v554_v0 = vpop.permute.xlu0 %553 }
  0xa2   : > { %v709_v28 = vmul.f32 %v6237_v16, %v682_v63  ;;  %v710_v29 = vmul.f32 %v6239_v17, %v682_v63  ;;  %v749_v30 = vmul.f32 %v6241_v18, %v682_v63  ;;  %v750_v31 = vmul.f32 %v6243_v19, %v682_v63 }
  0xa3   : > { %v581_v32 = vmul.f32 %v6245_v20, %v554_v0  ;;  %v582_v33 = vmul.f32 %v6247_v21, %v554_v0  ;;  %v621_v34 = vmul.f32 %v6250_v22, %v554_v0  ;;  %v622_v35 = vmul.f32 %v6253_v23, %v554_v0 }
  0xa5   : > { %v687_v1 = vpop.permute.xlu1 %686  ;;  %v559_v2 = vpop.permute.xlu0 %558  ;;  %v765_v50 = vadd.f32 %v749_v30, %v621_v34  ;;  %v766_v51 = vadd.f32 %v750_v31, %v622_v35  ;;  %v725_v54 = vadd.f32 %v709_v28, %v581_v32  ;;  %v726_v55 = vadd.f32 %v710_v29, %v582_v33 }
  0xa6   : > { %v711_v36 = vmul.f32 %v6237_v16, %v687_v1  ;;  %v712_v37 = vmul.f32 %v6239_v17, %v687_v1  ;;  %v751_v38 = vmul.f32 %v6241_v18, %v687_v1  ;;  %v752_v39 = vmul.f32 %v6243_v19, %v687_v1 }
  0xa7   : > { %v583_v42 = vmul.f32 %v6245_v20, %v559_v2  ;;  %v584_v43 = vmul.f32 %v6247_v21, %v559_v2  ;;  %v623_v44 = vmul.f32 %v6250_v22, %v559_v2  ;;  %v624_v45 = vmul.f32 %v6253_v23, %v559_v2 }
  0xa9   : > { %v815_v4 = vpop.permute.xlu1 %814  ;;  %v810_v5 = vpop.permute.xlu0 %809  ;;  %v767_v56 = vadd.f32 %v751_v38, %v623_v44  ;;  %v768_v57 = vadd.f32 %v752_v39, %v624_v45  ;;  %v727_v58 = vadd.f32 %v711_v36, %v583_v42  ;;  %v728_v59 = vadd.f32 %v712_v37, %v584_v43 }
  0xaa   : > { %v839_v60 = vmul.f32 %v6281_v46, %v815_v4  ;;  %v840_v61 = vmul.f32 %v6283_v47, %v815_v4  ;;  %v879_v62 = vmul.f32 %v6285_v48, %v815_v4  ;;  %v880_v63 = vmul.f32 %v6287_v49, %v815_v4 }
  0xab   : > { %v837_v0 = vmul.f32 %v6281_v46, %v810_v5  ;;  %v838_v1 = vmul.f32 %v6283_v47, %v810_v5  ;;  %v877_v2 = vmul.f32 %v6285_v48, %v810_v5  ;;  %v878_v6 = vmul.f32 %v6287_v49, %v810_v5 }
  0xac   : > { %v6305_v9 = vadd.f32 %v879_v62, %v767_v56  ;;  %v6307_v12 = vadd.f32 %v880_v63, %v768_v57  ;;  %v6309_v26 = vadd.f32 %v839_v60, %v727_v58  ;;  %v6311_v27 = vadd.f32 %v840_v61, %v728_v59 }
  0xad   : > { %v6233_v15 = vpop.permute.xlu1 %548  ;;  %v6235_v11 = vpop.permute.xlu0 %543  ;;  %v6313_v4 = vadd.f32 %v877_v2, %v765_v50  ;;  %v6315_v28 = vadd.f32 %v878_v6, %v766_v51  ;;  %v6317_v29 = vadd.f32 %v837_v0, %v725_v54  ;;  %v6319_v30 = vadd.f32 %v838_v1, %v726_v55 }
  0xae   : > { %8261 = vst [vmem:[#allocation12_spill] sm:$0xff] %v6309_v26  ;;  %8262 = vst [vmem:[#allocation13_spill] sm:$0xff] %v6311_v27  ;;  %v579_v5 = vmul.f32 %v6245_v20, %v6233_v15  ;;  %v580_v31 = vmul.f32 %v6247_v21, %v6233_v15  ;;  %v619_v32 = vmul.f32 %v6250_v22, %v6233_v15  ;;  %v6357_v51 = vmul.f32 2.0, %v6307_v12 }
  0xaf   : > { %8263 = vst [vmem:[#allocation14_spill] sm:$0xff] %v6317_v29  ;;  %8264 = vst [vmem:[#allocation15_spill] sm:$0xff] %v6319_v30  ;;  %v620_v33 = vmul.f32 %v6253_v23, %v6233_v15  ;;  %v577_v36 = vmul.f32 %v6245_v20, %v6235_v11  ;;  %v578_v37 = vmul.f32 %v6247_v21, %v6235_v11  ;;  %v6369_v57 = vmul.f32 2.5714285, %v6307_v12 }
  0xb0   : > { %v617_v38 = vmul.f32 %v6250_v22, %v6235_v11  ;;  %v618_v39 = vmul.f32 %v6253_v23, %v6235_v11  ;;  %v6354_v11 = vmul.f32 2.0, %v6315_v28  ;;  %8266 = vst [vmem:[#allocation17_spill] sm:$0xff] %v6357_v51  ;;  %v6372_v58 = vmul.f32 2.0, %v6313_v4 }
  0xb1   : > { %v6255_v24 = vpop.permute.xlu1 %676  ;;  %v6257_v25 = vpop.permute.xlu0 %671  ;;  %8268 = vst [vmem:[#allocation19_spill] sm:$0xff] %v6369_v57  ;;  %v6377_v60 = vmul.f32 2.0, %v6305_v9  ;;  %v6380_v61 = vmul.f32 2.5714285, %v6313_v4  ;;  %v6383_v62 = vmul.f32 2.5714285, %v6305_v9 }
  0xb2   : > { %v707_v42 = vmul.f32 %v6237_v16, %v6255_v24  ;;  %v708_v15 = vmul.f32 %v6239_v17, %v6255_v24  ;;  %v747_v43 = vmul.f32 %v6241_v18, %v6255_v24  ;;  %v748_v44 = vmul.f32 %v6243_v19, %v6255_v24  ;;  %8265 = vst [vmem:[#allocation16_spill] sm:$0xff] %v6354_v11 }
  0xb3   : > { %v745_v45 = vmul.f32 %v6241_v18, %v6257_v25  ;;  %v746_v50 = vmul.f32 %v6243_v19, %v6257_v25  ;;  %v705_v54 = vmul.f32 %v6237_v16, %v6257_v25  ;;  %v6366_v24 = vmul.f32 2.5714285, %v6315_v28  ;;  %8269 = vst [vmem:[#allocation20_spill] sm:$0xff] %v6372_v58  ;;  %8270 = vst [vmem:[#allocation21_spill] sm:$0xff] %v6377_v60 }
  0xb4   : > { %v706_v59 = vmul.f32 %v6239_v17, %v6257_v25  ;;  %8271 = vst [vmem:[#allocation22_spill] sm:$0xff] %v6380_v61  ;;  %8272 = vst [vmem:[#allocation23_spill] sm:$0xff] %v6383_v62  ;;  %v763_v63 = vadd.f32 %v747_v43, %v619_v32  ;;  %v764_v0 = vadd.f32 %v748_v44, %v620_v33  ;;  %v6386_v14 = vmul.f32 3.142857, %v6315_v28 }
  0xb5   : > { %v6273_v40 = vpop.permute.xlu1 %954  ;;  %v6275_v41 = vpop.permute.xlu0 %949  ;;  %8267 = vst [vmem:[#allocation18_spill] sm:$0xff] %v6366_v24  ;;  %v723_v1 = vadd.f32 %v707_v42, %v579_v5  ;;  %v724_v2 = vadd.f32 %v708_v15, %v580_v31  ;;  %v761_v6 = vadd.f32 %v745_v45, %v617_v38  ;;  %v762_v10 = vadd.f32 %v746_v50, %v618_v39 }
  0xb6   : > { %8260 = vst [vmem:[#allocation11_spill] sm:$0xff] %v6273_v40  ;;  %8273 = vst [vmem:[#allocation24_spill] sm:$0xff] %v6386_v14  ;;  %v6389_v25 = vmul.f32 3.142857, %v6307_v12  ;;  %v6391_v13 = vadd.f32 %v705_v54, %v577_v36  ;;  %v6394_v3 = vmul.f32 3.7142856, %v6315_v28  ;;  %v6424_v45 = vadd.f32 %v706_v59, %v578_v37 }
  0xb7   : > { %v6397_v57 = vmul.f32 3.7142856, %v6307_v12  ;;  %v6400_v32 = vmul.f32 3.142857, %v6313_v4  ;;  %v6419_v43 = vmul.f32 3.142857, %v6305_v9 }
  0xb8   : > { %8274 = vst [vmem:[#allocation25_spill] sm:$0xff] %v6389_v25  ;;  %8275 = vst [vmem:[#allocation26_spill] sm:$0xff] %v6394_v3  ;;  %v6422_v44 = vmul.f32 6.0, %v6315_v28  ;;  %v6430_v50 = vmul.f32 3.7142856, %v6305_v9 }
  0xb9   : > { %v6289_v52 = vpop.permute.xlu1 %804  ;;  %v6291_v53 = vpop.permute.xlu0 %799  ;;  %8276 = vst [vmem:[#allocation27_spill] sm:$0xff] %v6397_v57  ;;  %8277 = vst [vmem:[#allocation28_spill] sm:$0xff] %v6400_v32  ;;  %v6433_v54 = vmul.f32 4.285714, %v6315_v28  ;;  %v6445_v37 = vmul.f32 4.857143, %v6315_v28 }
  0xba   : > { %v835_v5 = vmul.f32 %v6281_v46, %v6289_v52  ;;  %v836_v31 = vmul.f32 %v6283_v47, %v6289_v52  ;;  %v875_v33 = vmul.f32 %v6285_v48, %v6289_v52  ;;  %v876_v36 = vmul.f32 %v6287_v49, %v6289_v52  ;;  %8278 = vst [vmem:[#allocation29_spill] sm:$0xff] %v6419_v43 }
  0xbb   : > { %v873_v39 = vmul.f32 %v6285_v48, %v6291_v53  ;;  %v874_v42 = vmul.f32 %v6287_v49, %v6291_v53  ;;  %8279 = vst [vmem:[#allocation30_spill] sm:$0xff] %v6422_v44  ;;  %v6427_v52 = vmul.f32 3.7142856, %v6313_v4  ;;  %8281 = vst [vmem:[#allocation32_spill] sm:$0xff] %v6430_v50  ;;  %v833_v32 = vmul.f32 %v6281_v46, %v6291_v53 }
  0xbc   : > { %8282 = vst [vmem:[#allocation33_spill] sm:$0xff] %v6433_v54  ;;  %v6439_v3 = vmul.f32 %v6283_v47, %v6291_v53  ;;  %v6442_v44 = vmul.f32 4.285714, %v6307_v12  ;;  %8284 = vst [vmem:[#allocation35_spill] sm:$0xff] %v6445_v37  ;;  %v6447_v59 = vadd.f32 %v875_v33, %v763_v63  ;;  %v6451_v50 = vadd.f32 %v835_v5, %v723_v1 }
  0xbd   : > { %v6301_v7 = vpop.permute.xlu1 %538  ;;  %v6303_v8 = vpop.permute.xlu0 %533  ;;  %8280 = vst [vmem:[#allocation31_spill] sm:$0xff] %v6427_v52  ;;  %v6449_v52 = vadd.f32 %v876_v36, %v764_v0  ;;  %v6453_v54 = vadd.f32 %v836_v31, %v724_v2  ;;  %v6455_v43 = vadd.f32 %v873_v39, %v761_v6  ;;  %v6457_v14 = vadd.f32 %v874_v42, %v762_v10 }
  0xbe   : > { %8283 = vst [vmem:[#allocation34_spill] sm:$0xff] %v6442_v44  ;;  %8285 = vst [vmem:[#allocation36_spill] sm:$0xff] %v6451_v50  ;;  %v575_v53 = vmul.f32 %v6245_v20, %v6301_v7  ;;  %v576_v44 = vmul.f32 %v6247_v21, %v6301_v7  ;;  %v615_v63 = vmul.f32 %v6250_v22, %v6301_v7  ;;  %v6511_v58 = vmul.f32 2.0, %v6447_v59 }
  0xbf   : > { %8286 = vst [vmem:[#allocation37_spill] sm:$0xff] %v6453_v54  ;;  %v616_v0 = vmul.f32 %v6253_v23, %v6301_v7  ;;  %v573_v1 = vmul.f32 %v6245_v20, %v6303_v8  ;;  %v574_v2 = vmul.f32 %v6247_v21, %v6303_v8  ;;  %v613_v6 = vmul.f32 %v6250_v22, %v6303_v8 }
  0xc0   : > { %v614_v5 = vmul.f32 %v6253_v23, %v6303_v8  ;;  %v6494_v57 = vmul.f32 2.0, %v6457_v14  ;;  %v6497_v25 = vmul.f32 2.0, %v6449_v52  ;;  %v6500_v51 = vmul.f32 2.5714285, %v6457_v14  ;;  %8292 = vst [vmem:[#allocation43_spill] sm:$0xff] %v6511_v58 }
  0xc1   : > { %v6329_v34 = vpop.permute.xlu1 %666  ;;  %v6331_v35 = vpop.permute.xlu0 %661  ;;  %v6505_v62 = vmul.f32 2.5714285, %v6449_v52  ;;  %v6508_v61 = vmul.f32 2.0, %v6455_v43  ;;  %v6514_v11 = vmul.f32 2.5714285, %v6455_v43 }
  0xc2   : > { %v743_v31 = vmul.f32 %v6241_v18, %v6329_v34  ;;  %v744_v7 = vmul.f32 %v6243_v19, %v6329_v34  ;;  %v703_v36 = vmul.f32 %v6237_v16, %v6329_v34  ;;  %v704_v39 = vmul.f32 %v6239_v17, %v6329_v34  ;;  %8287 = vst [vmem:[#allocation38_spill] sm:$0xff] %v6494_v57 }
  0xc3   : > { %v741_v42 = vmul.f32 %v6241_v18, %v6331_v35  ;;  %v742_v8 = vmul.f32 %v6243_v19, %v6331_v35  ;;  %v701_v37 = vmul.f32 %v6237_v16, %v6331_v35  ;;  %8288 = vst [vmem:[#allocation39_spill] sm:$0xff] %v6497_v25  ;;  %8289 = vst [vmem:[#allocation40_spill] sm:$0xff] %v6500_v51  ;;  %v6517_v27 = vmul.f32 2.5714285, %v6447_v59 }
  0xc4   : > { %v702_v34 = vmul.f32 %v6239_v17, %v6331_v35  ;;  %8290 = vst [vmem:[#allocation41_spill] sm:$0xff] %v6505_v62  ;;  %8291 = vst [vmem:[#allocation42_spill] sm:$0xff] %v6508_v61  ;;  %v759_v60 = vadd.f32 %v743_v31, %v615_v63  ;;  %v760_v24 = vadd.f32 %v744_v7, %v616_v0  ;;  %v6524_v29 = vmul.f32 3.142857, %v6457_v14 }
  0xc5   : > { %v6361_v55 = vpop.permute.xlu1 %944  ;;  %v6363_v56 = vpop.permute.xlu0 %939  ;;  %8293 = vst [vmem:[#allocation44_spill] sm:$0xff] %v6514_v11  ;;  %8294 = vst [vmem:[#allocation45_spill] sm:$0xff] %v6517_v27  ;;  %v757_v51 = vadd.f32 %v741_v42, %v613_v6  ;;  %v758_v25 = vadd.f32 %v742_v8, %v614_v5  ;;  %v719_v57 = vadd.f32 %v703_v36, %v575_v53  ;;  %v6527_v63 = vmul.f32 3.142857, %v6449_v52 }
  0xc6   : > { %v720_v62 = vadd.f32 %v704_v39, %v576_v44  ;;  %v717_v50 = vadd.f32 %v701_v37, %v573_v1  ;;  %8295 = vst [vmem:[#allocation46_spill] sm:$0xff] %v6524_v29  ;;  %v6530_v0 = vmul.f32 3.7142856, %v6457_v14  ;;  %v718_v31 = vadd.f32 %v702_v34, %v574_v2 }
  0xc7   : > { %8296 = vst [vmem:[#allocation47_spill] sm:$0xff] %v6527_v63  ;;  %v6533_v6 = vmul.f32 3.7142856, %v6449_v52  ;;  %v6536_v5 = vmul.f32 3.142857, %v6455_v43  ;;  %v6558_v8 = vadd.f32 %v833_v32, %v6391_v13 }
  0xc8   : > { %8297 = vst [vmem:[#allocation48_spill] sm:$0xff] %v6530_v0  ;;  %v6539_v44 = vmul.f32 3.142857, %v6447_v59  ;;  %v6561_v34 = vmul.f32 3.7142856, %v6455_v43 }
  0xc9   : > { %v6410_v38 = vpop.permute.xlu1 %794  ;;  %v6416_v15 = vpop.permute.xlu0 %789  ;;  %8298 = vst [vmem:[#allocation49_spill] sm:$0xff] %v6533_v6  ;;  %8299 = vst [vmem:[#allocation50_spill] sm:$0xff] %v6536_v5  ;;  %v6573_v6 = vadd.f32 %v6439_v3, %v6424_v45  ;;  %v6579_v13 = vmul.f32 4.285714, %v6305_v9  ;;  %v6582_v32 = vmul.f32 4.857143, %v6313_v4 }
  0xca   : > { %8300 = vst [vmem:[#allocation51_spill] sm:$0xff] %v6539_v44  ;;  %v831_v37 = vmul.f32 %v6281_v46, %v6410_v38  ;;  %v832_v53 = vmul.f32 %v6283_v47, %v6410_v38  ;;  %v871_v1 = vmul.f32 %v6285_v48, %v6410_v38  ;;  %v872_v2 = vmul.f32 %v6287_v49, %v6410_v38 }
  0xcb   : > { %v829_v7 = vmul.f32 %v6281_v46, %v6416_v15  ;;  %v830_v36 = vmul.f32 %v6283_v47, %v6416_v15  ;;  %v869_v39 = vmul.f32 %v6285_v48, %v6416_v15  ;;  %v870_v42 = vmul.f32 %v6287_v49, %v6416_v15  ;;  %8301 = vst [vmem:[#allocation52_spill] sm:$0xff] %v6561_v34 }
  0xcc   : > { %v6564_v38 = vmul.f32 3.7142856, %v6447_v59  ;;  %v6567_v44 = vmul.f32 4.857143, %v6307_v12  ;;  %8304 = vst [vmem:[#allocation55_spill] sm:$0xff] %v6573_v6  ;;  %8306 = vst [vmem:[#allocation57_spill] sm:$0xff] %v6579_v13  ;;  %v6584_v34 = vadd.f32 %v871_v1, %v759_v60  ;;  %v6590_v0 = vadd.f32 %v831_v37, %v719_v57 }
  0xcd   : > { %v6471_v10 = vpop.permute.xlu1 %528  ;;  %v6481_v33 = vpop.permute.xlu0 %523  ;;  %v6576_v15 = vmul.f32 4.285714, %v6313_v4  ;;  %8307 = vst [vmem:[#allocation58_spill] sm:$0xff] %v6582_v32  ;;  %v6592_v29 = vadd.f32 %v832_v53, %v720_v62  ;;  %v6594_v3 = vadd.f32 %v869_v39, %v757_v51  ;;  %v6596_v45 = vadd.f32 %v870_v42, %v758_v25 }
  0xce   : > { %8302 = vst [vmem:[#allocation53_spill] sm:$0xff] %v6564_v38  ;;  %8303 = vst [vmem:[#allocation54_spill] sm:$0xff] %v6567_v44  ;;  %v6586_v38 = vadd.f32 %v872_v2, %v760_v24  ;;  %v6600_v13 = vadd.f32 %v830_v36, %v718_v31  ;;  %v571_v60 = vmul.f32 %v6245_v20, %v6471_v10  ;;  %v6760_v54 = vmul.f32 4.285714, %v6447_v59 }
  0xcf   : > { %8305 = vst [vmem:[#allocation56_spill] sm:$0xff] %v6576_v15  ;;  %v6598_v15 = vadd.f32 %v829_v7, %v717_v50  ;;  %v572_v24 = vmul.f32 %v6247_v21, %v6471_v10  ;;  %v612_v57 = vmul.f32 %v6253_v23, %v6471_v10  ;;  %v611_v51 = vmul.f32 %v6250_v22, %v6471_v10 }
  0xd0   : > { %v610_v25 = vmul.f32 %v6253_v23, %v6481_v33  ;;  %v569_v37 = vmul.f32 %v6245_v20, %v6481_v33  ;;  %v570_v53 = vmul.f32 %v6247_v21, %v6481_v33  ;;  %v609_v1 = vmul.f32 %v6250_v22, %v6481_v33  ;;  %8326 = vst [vmem:[#allocation77_spill] sm:$0xff] %v6760_v54 }
  0xd1   : > { %v6519_v35 = vpop.permute.xlu1 %656  ;;  %v6521_v26 = vpop.permute.xlu0 %651  ;;  %v6627_v23 = vmul.f32 2.0, %v6596_v45  ;;  %v6630_v7 = vmul.f32 2.0, %v6586_v38  ;;  %v6636_v20 = vmul.f32 2.5714285, %v6586_v38  ;;  %v6640_v33 = vmul.f32 2.0, %v6594_v3 }
  0xd2   : > { %v740_v62 = vmul.f32 %v6243_v19, %v6519_v35  ;;  %v739_v50 = vmul.f32 %v6241_v18, %v6519_v35  ;;  %v738_v31 = vmul.f32 %v6243_v19, %v6521_v26  ;;  %v737_v10 = vmul.f32 %v6241_v18, %v6521_v26 }
  0xd3   : > { %v6633_v19 = vmul.f32 2.5714285, %v6596_v45  ;;  %8308 = vst [vmem:[#allocation59_spill] sm:$0xff] %v6636_v20  ;;  %v6643_v18 = vmul.f32 2.0, %v6584_v34  ;;  %v699_v11 = vmul.f32 %v6237_v16, %v6519_v35  ;;  %v6780_v54 = vmul.f32 4.857143, %v6586_v38 }
  0xd4   : > { %v756_v21 = vadd.f32 %v740_v62, %v612_v57  ;;  %v755_v39 = vadd.f32 %v739_v50, %v611_v51  ;;  %v754_v42 = vadd.f32 %v738_v31, %v610_v25  ;;  %v753_v27 = vadd.f32 %v737_v10, %v609_v1 }
  0xd5   : > { %v6569_v5 = vpop.permute.xlu1 %934  ;;  %v6588_v44 = vpop.permute.xlu0 %929  ;;  %v6649_v57 = vmul.f32 2.5714285, %v6594_v3  ;;  %v6652_v62 = vmul.f32 2.5714285, %v6584_v34  ;;  %v700_v51 = vmul.f32 %v6239_v17, %v6519_v35  ;;  %v697_v25 = vmul.f32 %v6237_v16, %v6521_v26  ;;  %8332 = vst [vmem:[#allocation83_spill] sm:$0xff] %v6780_v54 }
  0xd6   : > { %v6668_v31 = vmul.f32 3.142857, %v6586_v38  ;;  %v6671_v1 = vmul.f32 3.7142856, %v6596_v45  ;;  %v6678_v16 = vmul.f32 3.7142856, %v6586_v38 }
  0xd8   : > { %8310 = vst [vmem:[#allocation61_spill] sm:$0xff] %v6668_v31  ;;  %8311 = vst [vmem:[#allocation62_spill] sm:$0xff] %v6671_v1  ;;  %v6692_v31 = vmul.f32 3.7142856, %v6584_v34  ;;  %v6757_v1 = vmul.f32 4.285714, %v6455_v43 }
  0xd9   : > { %v785_v2 = vpop.permute.xlu1 %784  ;;  %v780_v22 = vpop.permute.xlu0 %779  ;;  %8313 = vst [vmem:[#allocation64_spill] sm:$0xff] %v6678_v16 }
  0xda   : > { %v868_v36 = vmul.f32 %v6287_v49, %v785_v2  ;;  %v867_v32 = vmul.f32 %v6285_v48, %v785_v2  ;;  %v866_v63 = vmul.f32 %v6287_v49, %v780_v22  ;;  %v865_v58 = vmul.f32 %v6285_v48, %v780_v22  ;;  %8317 = vst [vmem:[#allocation68_spill] sm:$0xff] %v6692_v31 }
  0xdb   : > { %v698_v49 = vmul.f32 %v6239_v17, %v6521_v26  ;;  %v6665_v48 = vmul.f32 3.142857, %v6596_v45  ;;  %v6681_v17 = vmul.f32 3.142857, %v6594_v3  ;;  %8325 = vst [vmem:[#allocation76_spill] sm:$0xff] %v6757_v1  ;;  %v825_v6 = vmul.f32 %v6281_v46, %v780_v22 }
  0xdc   : > { %v6662_v50 = vadd.f32 %v868_v36, %v756_v21  ;;  %v6673_v10 = vadd.f32 %v867_v32, %v755_v39  ;;  %v6675_v35 = vadd.f32 %v866_v63, %v754_v42  ;;  %v6683_v26 = vadd.f32 %v865_v58, %v753_v27 }
  0xdd   : > { %8309 = vst [vmem:[#allocation60_spill] sm:$0xff] %v6665_v48  ;;  %8314 = vst [vmem:[#allocation65_spill] sm:$0xff] %v6681_v17  ;;  %v6686_v21 = vmul.f32 3.142857, %v6584_v34  ;;  %v6689_v36 = vmul.f32 3.7142856, %v6594_v3  ;;  %v715_v32 = vadd.f32 %v699_v11, %v571_v60  ;;  %v716_v27 = vadd.f32 %v700_v51, %v572_v24 }
  0xde   : > { %8312 = vst [vmem:[#allocation63_spill] sm:$0xff] %v6673_v10  ;;  %v6695_v63 = vmul.f32 4.857143, %v6305_v9  ;;  %v6698_v39 = vmul.f32 4.285714, %v6457_v14  ;;  %v6704_v58 = vmul.f32 2.0, %v6662_v50  ;;  %v713_v51 = vadd.f32 %v697_v25, %v569_v37 }
  0xdf   : > { %8315 = vst [vmem:[#allocation66_spill] sm:$0xff] %v6686_v21  ;;  %8316 = vst [vmem:[#allocation67_spill] sm:$0xff] %v6689_v36  ;;  %v6701_v42 = vmul.f32 4.285714, %v6449_v52  ;;  %v6707_v17 = vmul.f32 2.5714285, %v6662_v50  ;;  %v714_v31 = vadd.f32 %v698_v49, %v570_v53  ;;  %v827_v37 = vmul.f32 %v6281_v46, %v785_v2 }
  0xe0   : > { %8318 = vst [vmem:[#allocation69_spill] sm:$0xff] %v6695_v63  ;;  %8319 = vst [vmem:[#allocation70_spill] sm:$0xff] %v6698_v39  ;;  %v6710_v36 = vmul.f32 4.857143, %v6457_v14  ;;  %v6713_v11 = vmul.f32 2.0, %v6675_v35  ;;  %v6719_v39 = vmul.f32 2.0, %v6673_v10  ;;  %v828_v53 = vmul.f32 %v6283_v47, %v785_v2 }
  0xe1   : > { %8320 = vst [vmem:[#allocation71_spill] sm:$0xff] %v6701_v42  ;;  %v6716_v60 = vmul.f32 2.5714285, %v6675_v35  ;;  %v6722_v24 = vmul.f32 2.5714285, %v6673_v10  ;;  %v826_v2 = vmul.f32 %v6283_v47, %v780_v22  ;;  %v843_v20 = vadd.f32 %v827_v37, %v715_v32 }
  0xe2   : > { %8321 = vst [vmem:[#allocation72_spill] sm:$0xff] %v6710_v36  ;;  %v6725_v42 = vmul.f32 2.5714285, %v6683_v26  ;;  %v6728_v63 = vmul.f32 3.142857, %v6675_v35  ;;  %v844_v47 = vadd.f32 %v828_v53, %v716_v27  ;;  %v841_v32 = vadd.f32 %v825_v6, %v713_v51 }
  0xe3   : > { %v6731_v36 = vmul.f32 3.142857, %v6662_v50  ;;  %v6734_v21 = vmul.f32 3.7142856, %v6675_v35  ;;  %v6737_v16 = vmul.f32 3.7142856, %v6662_v50  ;;  %v842_v27 = vadd.f32 %v826_v2, %v714_v31  ;;  %v920_v2 = vpop.permute.xlu0 %919 }
  0xe4   : > { %v6740_v61 = vmul.f32 3.142857, %v6683_v26  ;;  %v6744_v25 = vmul.f32 3.142857, %v6673_v10  ;;  %v6747_v40 = vmul.f32 3.7142856, %v6683_v26 }
  0xe5   : > { %v6750_v30 = vmul.f32 3.7142856, %v6673_v10  ;;  %v6754_v49 = vmul.f32 4.857143, %v6449_v52  ;;  %v6767_v48 = vmul.f32 4.857143, %v6447_v59 }
  0xe6   : > { %8322 = vst [vmem:[#allocation73_spill] sm:$0xff] %v6744_v25  ;;  %v6764_v25 = vmul.f32 4.857143, %v6455_v43  ;;  %v6777_v1 = vmul.f32 4.857143, %v6596_v45  ;;  %v1099_v51 = vmul.f32 2.0, %v6683_v26 }
  0xe7   : > { %8323 = vst [vmem:[#allocation74_spill] sm:$0xff] %v6750_v30  ;;  %8324 = vst [vmem:[#allocation75_spill] sm:$0xff] %v6754_v49  ;;  %v6770_v30 = vmul.f32 4.285714, %v6596_v45  ;;  %v6774_v49 = vmul.f32 4.285714, %v6586_v38 }
  0xe8   : > { %8327 = vst [vmem:[#allocation78_spill] sm:$0xff] %v6764_v25  ;;  %8328 = vst [vmem:[#allocation79_spill] sm:$0xff] %v6767_v48  ;;  %v6783_v25 = vmul.f32 4.285714, %v6594_v3  ;;  %v6786_v48 = vmul.f32 4.285714, %v6584_v34 }
  0xe9   : > { %8329 = vst [vmem:[#allocation80_spill] sm:$0xff] %v6770_v30  ;;  %8330 = vst [vmem:[#allocation81_spill] sm:$0xff] %v6774_v49  ;;  %v6789_v30 = vmul.f32 4.857143, %v6594_v3  ;;  %v6792_v22 = vmul.f32 4.857143, %v6584_v34 }
  0xea   : > { %8331 = vst [vmem:[#allocation82_spill] sm:$0xff] %v6777_v1  ;;  %8333 = vst [vmem:[#allocation84_spill] sm:$0xff] %v6783_v25  ;;  %v6795_v1 = vmul.f32 4.285714, %v6675_v35  ;;  %v6798_v54 = vmul.f32 4.285714, %v6662_v50 }
  0xeb   : > { %8334 = vst [vmem:[#allocation85_spill] sm:$0xff] %v6786_v48  ;;  %8335 = vst [vmem:[#allocation86_spill] sm:$0xff] %v6789_v30  ;;  %v6801_v25 = vmul.f32 4.857143, %v6675_v35  ;;  %v6804_v48 = vmul.f32 4.857143, %v6662_v50 }
  0xec   : > { %8336 = vst [vmem:[#allocation87_spill] sm:$0xff] %v6792_v22  ;;  %8337 = vst [vmem:[#allocation88_spill] sm:$0xff] %v6795_v1  ;;  %v6807_v30 = vmul.f32 4.285714, %v6683_v26  ;;  %v6810_v53 = vmul.f32 4.285714, %v6673_v10 }
  0xed   : > { %8338 = vst [vmem:[#allocation89_spill] sm:$0xff] %v6798_v54  ;;  %8339 = vst [vmem:[#allocation90_spill] sm:$0xff] %v6801_v25  ;;  %v6813_v1 = vmul.f32 4.857143, %v6683_v26  ;;  %v6816_v54 = vmul.f32 4.857143, %v6673_v10 }
  0xee   : > { %8340 = vst [vmem:[#allocation91_spill] sm:$0xff] %v6804_v48  ;;  %8341 = vst [vmem:[#allocation92_spill] sm:$0xff] %v6810_v53  ;;  %v6820_v25 = vmul.f32 5.428571, %v6315_v28  ;;  %v6823_v48 = vmul.f32 5.428571, %v6307_v12  ;;  %v925_v28 = vpop.permute.xlu1 %924 }
  0xef   : > { %8342 = vst [vmem:[#allocation93_spill] sm:$0xff] %v6813_v1  ;;  %8343 = vst [vmem:[#allocation94_spill] sm:$0xff] %v6816_v54  ;;  %v6826_v31 = vmul.f32 6.0, %v6307_v12  ;;  %v6829_v53 = vmul.f32 5.428571, %v6313_v4  ;;  %v6835_v54 = vmul.f32 6.0, %v6313_v4 }
  0xf0   : > { %8344 = vst [vmem:[#allocation95_spill] sm:$0xff] %v6820_v25  ;;  %8345 = vst [vmem:[#allocation96_spill] sm:$0xff] %v6823_v48  ;;  %v6832_v1 = vmul.f32 5.428571, %v6305_v9  ;;  %v6838_v22 = vmul.f32 6.0, %v6305_v9  ;;  %v6850_v4 = vmul.f32 6.0, %v6449_v52 }
  0xf1   : > { %8346 = vst [vmem:[#allocation97_spill] sm:$0xff] %v6826_v31  ;;  %8347 = vst [vmem:[#allocation98_spill] sm:$0xff] %v6829_v53  ;;  %v6841_v12 = vmul.f32 5.428571, %v6457_v14  ;;  %v6844_v31 = vmul.f32 6.0, %v6457_v14  ;;  %v6862_v14 = vmul.f32 6.0, %v6447_v59 }
  0xf2   : > { %8348 = vst [vmem:[#allocation99_spill] sm:$0xff] %v6832_v1  ;;  %8349 = vst [vmem:[#allocation100_spill] sm:$0xff] %v6835_v54  ;;  %v6847_v49 = vmul.f32 5.428571, %v6449_v52  ;;  %v6853_v9 = vmul.f32 5.428571, %v6455_v43 }
  0xf3   : > { %v1044_v46 = vpop.f32.mrf.mxu0  ;;  %8350 = vst [vmem:[#allocation101_spill] sm:$0xff] %v6838_v22  ;;  %8351 = vst [vmem:[#allocation102_spill] sm:$0xff] %v6841_v12  ;;  %v6868_v52 = vmul.f32 5.428571, %v6586_v38 }
  0xf4   : > { %v1045_v25 = vadd.f32 %v1044_v46, %v920_v2  ;;  %8352 = vst [vmem:[#allocation103_spill] sm:$0xff] %v6844_v31  ;;  %8353 = vst [vmem:[#allocation104_spill] sm:$0xff] %v6847_v49  ;;  %v6856_v46 = vmul.f32 5.428571, %v6447_v59  ;;  %v6881_v59 = vmul.f32 5.428571, %v6594_v3 }
  0xf5   : > { %v1046_v37 = vpop.f32.mrf.mxu0  ;;  %8354 = vst [vmem:[#allocation105_spill] sm:$0xff] %v6850_v4  ;;  %8355 = vst [vmem:[#allocation106_spill] sm:$0xff] %v6853_v9  ;;  %v6871_v4 = vmul.f32 6.0, %v6596_v45  ;;  %v6874_v9 = vmul.f32 6.0, %v6586_v38  ;;  %v6893_v38 = vmul.f32 6.0, %v6584_v34 }
  0xf6   : > { %v1047_v10 = vadd.f32 %v1046_v37, %v920_v2  ;;  %8356 = vst [vmem:[#allocation107_spill] sm:$0xff] %v6856_v46  ;;  %v6859_v37 = vmul.f32 6.0, %v6455_v43  ;;  %8358 = vst [vmem:[#allocation109_spill] sm:$0xff] %v6862_v14  ;;  %v6876_v46 = vadd.f32 %v1045_v25, %v841_v32  ;;  %v6899_v32 = vmul.f32 5.428571, %v6662_v50 }
  0xf7   : > { %v1048_v6 = vpop.f32.mrf.mxu0  ;;  %8360 = vst [vmem:[#allocation111_spill] sm:$0xff] %v6868_v52  ;;  %8361 = vst [vmem:[#allocation112_spill] sm:$0xff] %v6871_v4 }
  0xf8   : > { %v1049_v53 = vadd.f32 %v1048_v6, %v925_v28  ;;  %8357 = vst [vmem:[#allocation108_spill] sm:$0xff] %v6859_v37  ;;  %v6865_v6 = vmul.f32 5.428571, %v6596_v45  ;;  %8362 = vst [vmem:[#allocation113_spill] sm:$0xff] %v6874_v9  ;;  %v6878_v43 = vadd.f32 %v1047_v10, %v842_v27  ;;  %v6890_v45 = vmul.f32 5.428571, %v6584_v34 }
  0xf9   : > { %v1050_v48 = vpop.f32.mrf.mxu0  ;;  %8363 = vst [vmem:[#allocation114_spill] sm:$0xff] %v6876_v46  ;;  %8365 = vst [vmem:[#allocation116_spill] sm:$0xff] %v6881_v59  ;;  %v6896_v10 = vmul.f32 5.428571, %v6675_v35  ;;  %v6911_v34 = vmul.f32 5.428571, %v6683_v26 }
  0xfa   : > { %8359 = vst [vmem:[#allocation110_spill] sm:$0xff] %v6865_v6  ;;  %v1051_v2 = vadd.f32 %v1050_v48, %v925_v28  ;;  %8364 = vst [vmem:[#allocation115_spill] sm:$0xff] %v6878_v43  ;;  %v6884_v6 = vmul.f32 6.0, %v6594_v3  ;;  %v6886_v48 = vadd.f32 %v1049_v53, %v843_v20  ;;  %v6902_v3 = vmul.f32 6.0, %v6675_v35 }
  0xfb   : > { %v1054_v22 = vpop.f32.mrf.mxu0  ;;  %8367 = vst [vmem:[#allocation118_spill] sm:$0xff] %v6890_v45  ;;  %8368 = vst [vmem:[#allocation119_spill] sm:$0xff] %v6893_v38  ;;  %v6905_v20 = vmul.f32 6.0, %v6662_v50  ;;  %v6914_v53 = vmul.f32 6.0, %v6683_v26  ;;  %v1115_v35 = vadd.f32 %v1099_v51, %v6876_v46  ;;  %v1219_v50 = vadd.f32 %v6725_v42, %v6876_v46 }
  0xfc   : > { %8366 = vst [vmem:[#allocation117_spill] sm:$0xff] %v6884_v6  ;;  %v1055_v28 = vadd.f32 %v1054_v22, %v6588_v44  ;;  %8369 = vst [vmem:[#allocation120_spill] sm:$0xff] %v6896_v10  ;;  %v6907_v22 = vadd.f32 %v1051_v2, %v844_v47  ;;  %v6923_v47 = vadd.f32 %v6740_v61, %v6876_v46  ;;  %v8402_v6 = vld [vmem:[#allocation22_spill] sm:$0xff] }
  0xfd   : > { %v1056_v37 = vpop.f32.mrf.mxu0  ;;  %8370 = vst [vmem:[#allocation121_spill] sm:$0xff] %v6899_v32  ;;  %8371 = vst [vmem:[#allocation122_spill] sm:$0xff] %v6902_v3  ;;  %v1116_v32 = vadd.f32 %v6713_v11, %v6878_v43  ;;  %v1117_v26 = vadd.f32 %v6719_v39, %v6886_v48  ;;  %v1221_v11 = vadd.f32 %v6722_v24, %v6886_v48  ;;  %v8395_v3 = vld [vmem:[#allocation39_spill] sm:$0xff] }
  0xfe   : > { %8372 = vst [vmem:[#allocation123_spill] sm:$0xff] %v6905_v20  ;;  %8373 = vst [vmem:[#allocation124_spill] sm:$0xff] %v6907_v22  ;;  %v1057_v27 = vadd.f32 %v1056_v37, %v6588_v44  ;;  %v6926_v44 = vadd.f32 %v1055_v28, %v6598_v15  ;;  %v1220_v51 = vadd.f32 %v6716_v60, %v6878_v43 }
  0xff   : > { %v1058_v25 = vpop.f32.mrf.mxu0  ;;  %8374 = vst [vmem:[#allocation125_spill] sm:$0xff] %v6911_v34  ;;  %8375 = vst [vmem:[#allocation126_spill] sm:$0xff] %v6914_v53  ;;  %v6937_v42 = vadd.f32 %v6728_v63, %v6878_v43  ;;  %v6941_v61 = vadd.f32 %v6734_v21, %v6878_v43  ;;  %v6945_v15 = vadd.f32 %v6747_v40, %v6876_v46  ;;  %v1131_v53 = vmax.f32 %v1115_v35, 0.0 }
 0x100   : > { %8376 = vst [vmem:[#allocation127_spill] sm:$0xff] %v6923_v47  ;;  %v1059_v37 = vadd.f32 %v1058_v25, %v6569_v5  ;;  %v6948_v39 = vadd.f32 %v1057_v27, %v6600_v13  ;;  %v1118_v24 = vadd.f32 %v6704_v58, %v6907_v22  ;;  %v1222_v60 = vadd.f32 %v6707_v17, %v6907_v22 }
 0x101   : > { %v1060_v10 = vpop.f32.mrf.mxu0  ;;  %8377 = vst [vmem:[#allocation128_spill] sm:$0xff] %v6941_v61  ;;  %8378 = vst [vmem:[#allocation129_spill] sm:$0xff] %v6945_v15  ;;  %v6956_v63 = vadd.f32 %v6807_v30, %v6876_v46  ;;  %v1132_v25 = vmax.f32 %v1116_v32, 0.0  ;;  %v1235_v40 = vmax.f32 %v1219_v50, 0.0  ;;  %v1119_v13 = vadd.f32 %v6640_v33, %v6926_v44 }
 0x102   : > { %8379 = vst [vmem:[#allocation130_spill] sm:$0xff] %v6948_v39  ;;  %v1061_v21 = vadd.f32 %v1060_v10, %v6569_v5  ;;  %v6960_v34 = vadd.f32 %v1059_v37, %v6590_v0  ;;  %v1133_v58 = vmax.f32 %v1117_v26, 0.0  ;;  %v1237_v27 = vmax.f32 %v1221_v11, 0.0 }
 0x103   : > { %v1064_v2 = vpop.f32.mrf.mxu0  ;;  %8380 = vst [vmem:[#allocation131_spill] sm:$0xff] %v6956_v63  ;;  %v1223_v17 = vadd.f32 %v6649_v57, %v6926_v44  ;;  %v1236_v30 = vmax.f32 %v1220_v51, 0.0  ;;  %v6971_v0 = vadd.f32 %v6627_v23, %v6948_v39  ;;  %v1134_v32 = vmax.f32 %v1118_v24, 0.0 }
 0x104   : > { %v1065_v10 = vadd.f32 %v1064_v2, %v6363_v56  ;;  %v1238_v35 = vmax.f32 %v1222_v60, 0.0  ;;  %v6974_v33 = vadd.f32 %v1061_v21, %v6592_v29  ;;  %v6978_v57 = vadd.f32 %v6633_v19, %v6948_v39 }
 0x105   : > { %v1066_v28 = vpop.f32.mrf.mxu0  ;;  %v6982_v37 = vadd.f32 %v6731_v36, %v6907_v22  ;;  %v6986_v26 = vadd.f32 %v6737_v16, %v6907_v22  ;;  %v1121_v23 = vadd.f32 %v6643_v18, %v6960_v34  ;;  %v1135_v11 = vmax.f32 %v1119_v13, 0.0 }
 0x106   : > { %v6990_v2 = vpack.c.bf16 %v1133_v58, %v1131_v53  ;;  %v6992_v29 = vpack.c.bf16 %v1237_v27, %v1235_v40  ;;  %v1067_v51 = vadd.f32 %v1066_v28, %v6363_v56  ;;  %v1225_v36 = vadd.f32 %v6652_v62, %v6960_v34  ;;  %v8381_v28 = vld [vmem:[#allocation59_spill] sm:$0xff] }
 0x107   : > { %v1068_v20 = vpop.f32.mrf.mxu0  ;;  %v1239_v60 = vmax.f32 %v1223_v17, 0.0  ;;  %v6999_v16 = vadd.f32 %v1065_v10, %v6558_v8  ;;  %v1136_v21 = vmax.f32 %v6971_v0, 0.0  ;;  %v7002_v18 = vpack.c.bf16 %v1134_v32, %v1132_v25  ;;  %v8382_v17 = vld [vmem:[#allocation60_spill] sm:$0xff]  ;;  %v8383_v10 = vld [vmem:[#allocation55_spill] sm:$0xff]  ;;  %v8384_v32 = vld [vmem:[#allocation37_spill] sm:$0xff] }
 0x108   : > { %v7004_v53 = vpack.c.bf16 %v1238_v35, %v1236_v30  ;;  %v1122_v56 = vadd.f32 %v6630_v7, %v6974_v33  ;;  %v7011_v58 = vadd.f32 %v8381_v28, %v6974_v33  ;;  %v1069_v8 = vadd.f32 %v1068_v20, %v6361_v55 }
 0x109   : > { %v1070_v50 = vpop.f32.mrf.mxu0  ;;  %v1137_v25 = vmax.f32 %v1121_v23, 0.0  ;;  %v7018_v30 = vadd.f32 %v8382_v17, %v6948_v39  ;;  %v7021_v0 = vadd.f32 %v1067_v51, %v8383_v10  ;;  %v8389_v51 = vld [vmem:[#allocation61_spill] sm:$0xff] }
 0x10a   : > { %v1071_v19 = vadd.f32 %v1070_v50, %v6361_v55  ;;  %v1241_v50 = vmax.f32 %v1225_v36, 0.0  ;;  %v8386_v55 = vld [vmem:[#allocation15_spill] sm:$0xff]  ;;  %v7040_v10 = vadd.f32 %v8389_v51, %v6974_v33 }
 0x10b   : > { %v1074_v24 = vpop.f32.mrf.mxu0  ;;  %v7057_v46 = vpack.c.bf16 %v1137_v25, %v1135_v11  ;;  %v8399_v11 = vld [vmem:[#allocation18_spill] sm:$0xff] }
 0x10c   : > { %v1075_v40 = vadd.f32 %v1074_v24, %v6275_v41  ;;  %v7024_v7 = vadd.f32 %v1071_v19, %v8384_v32  ;;  %v8385_v24 = vld [vmem:[#allocation62_spill] sm:$0xff] }
 0x10d   : > { %v1076_v13 = vpop.f32.mrf.mxu0  ;;  %v7028_v28 = vadd.f32 %v8385_v24, %v6948_v39  ;;  %v8390_v19 = vld [vmem:[#allocation14_spill] sm:$0xff]  ;;  %v8391_v24 = vld [vmem:[#allocation44_spill] sm:$0xff] }
 0x10e   : > { %v1077_v27 = vadd.f32 %v1076_v13, %v6275_v41  ;;  %v8387_v41 = vld [vmem:[#allocation11_spill] sm:$0xff]  ;;  %v8388_v13 = vld [vmem:[#allocation42_spill] sm:$0xff]  ;;  %v7043_v32 = vadd.f32 %v1075_v40, %v8390_v19  ;;  %v7047_v5 = vadd.f32 %v8391_v24, %v6999_v16  ;;  %v1126_v24 = vadd.f32 %v8395_v3, %v7024_v7 }
 0x10f   : > { %v1078_v35 = vpop.f32.mrf.mxu0  ;;  %v7036_v17 = vadd.f32 %v8388_v13, %v6999_v16  ;;  %v8393_v13 = vld [vmem:[#allocation12_spill] sm:$0xff]  ;;  %v8394_v40 = vld [vmem:[#allocation38_spill] sm:$0xff] }
 0x110   : > { %v7031_v20 = vadd.f32 %v1077_v27, %v8386_v55  ;;  %v1079_v23 = vadd.f32 %v1078_v35, %v8387_v41  ;;  %v1138_v27 = vmax.f32 %v1122_v56, 0.0  ;;  %v1242_v55 = vmax.f32 %v7011_v58, 0.0  ;;  %v8392_v35 = vld [vmem:[#allocation36_spill] sm:$0xff]  ;;  %v8396_v56 = vld [vmem:[#allocation41_spill] sm:$0xff] }
 0x111   : > { %v1080_v36 = vpop.f32.mrf.mxu0  ;;  %v7051_v63 = vadd.f32 %v1069_v8, %v8392_v35  ;;  %v1124_v19 = vadd.f32 %v8394_v40, %v7021_v0  ;;  %v1230_v38 = vadd.f32 %v8396_v56, %v7024_v7  ;;  %v7065_v58 = vpack.c.bf16 %v1241_v50, %v1239_v60  ;;  %v8397_v8 = vld [vmem:[#allocation13_spill] sm:$0xff]  ;;  %v8401_v40 = vld [vmem:[#allocation20_spill] sm:$0xff]  ;;  %v8403_v60 = vld [vmem:[#allocation23_spill] sm:$0xff] }
 0x112   : > { %v7054_v62 = vadd.f32 %v1079_v23, %v8393_v13  ;;  %v1081_v51 = vadd.f32 %v1080_v36, %v8387_v41  ;;  %v8398_v23 = vld [vmem:[#allocation16_spill] sm:$0xff]  ;;  %v1232_v25 = vadd.f32 %v8399_v11, %v7031_v20  ;;  %v8400_v41 = vld [vmem:[#allocation21_spill] sm:$0xff]  ;;  %v1127_v3 = vadd.f32 %v8401_v40, %v7043_v32  ;;  %v8406_v11 = vld [vmem:[#allocation19_spill] sm:$0xff] }
 0x113   : > { %v1128_v13 = vadd.f32 %v8398_v23, %v7031_v20  ;;  %v1231_v56 = vadd.f32 %v8402_v6, %v7043_v32  ;;  %v8405_v23 = vld [vmem:[#allocation17_spill] sm:$0xff]  ;;  %v1142_v14 = vmax.f32 %v1126_v24, 0.0  ;;  %v1246_v31 = vmax.f32 %v1230_v38, 0.0 }
 0x114   : > { %v7068_v35 = vadd.f32 %v1081_v51, %v8397_v8  ;;  %v1129_v36 = vadd.f32 %v8400_v41, %v7054_v62  ;;  %v1233_v50 = vadd.f32 %v8403_v60, %v7054_v62  ;;  %v8404_v51 = vld [vmem:[#allocation40_spill] sm:$0xff]  ;;  %v8407_v41 = vld [vmem:[#allocation43_spill] sm:$0xff]  ;;  %v8408_v40 = vld [vmem:[#allocation45_spill] sm:$0xff]  ;;  %v1248_v12 = vmax.f32 %v1232_v25, 0.0 }
 0x115   : > { %v1228_v8 = vadd.f32 %v8404_v51, %v7021_v0  ;;  %v1125_v9 = vadd.f32 %v8407_v41, %v7051_v63  ;;  %v1229_v4 = vadd.f32 %v8408_v40, %v7051_v63  ;;  %v1144_v60 = vmax.f32 %v1128_v13, 0.0  ;;  %v8410_v13 = vld [vmem:[#allocation27_spill] sm:$0xff]  ;;  %v8417_v25 = vld [vmem:[#allocation28_spill] sm:$0xff] }
 0x116   : > { %v1130_v45 = vadd.f32 %v8405_v23, %v7068_v35  ;;  %v1234_v59 = vadd.f32 %v8406_v11, %v7068_v35  ;;  %v1145_v52 = vmax.f32 %v1129_v36, 0.0  ;;  %v1249_v6 = vmax.f32 %v1233_v50, 0.0 }
 0x117   : > { %v1143_v54 = vmax.f32 %v1127_v3, 0.0  ;;  %v1247_v1 = vmax.f32 %v1231_v56, 0.0  ;;  %v1140_v23 = vmax.f32 %v1124_v19, 0.0  ;;  %v5652_v22 = vpack.c.bf16 %v1138_v27, %v1136_v21  ;;  %v8418_v3 = vld [vmem:[#allocation32_spill] sm:$0xff] }
 0x118   : > { %v1146_v49 = vmax.f32 %v1130_v45, 0.0  ;;  %v1250_v51 = vmax.f32 %v1234_v59, 0.0  ;;  %v1244_v39 = vmax.f32 %v1228_v8, 0.0  ;;  %v1141_v15 = vmax.f32 %v1125_v9, 0.0  ;;  %v8409_v45 = vld [vmem:[#allocation25_spill] sm:$0xff]  ;;  %v8420_v8 = vld [vmem:[#allocation48_spill] sm:$0xff] }
 0x119   : > { %v5683_v41 = vpack.c.bf16 %v1145_v52, %v1143_v54  ;;  %v5685_v47 = vpack.c.bf16 %v1249_v6, %v1247_v1  ;;  %v5668_v61 = vpack.c.bf16 %v1142_v14, %v1140_v23  ;;  %v1245_v40 = vmax.f32 %v1229_v4, 0.0  ;;  %v8411_v54 = vld [vmem:[#allocation24_spill] sm:$0xff] }
 0x11a   : > { %v5684_v43 = vpack.c.bf16 %v1146_v49, %v1144_v60  ;;  %v5686_v11 = vpack.c.bf16 %v1250_v51, %v1248_v12  ;;  %v5670_v24 = vpack.c.bf16 %v1246_v31, %v1244_v39  ;;  %v1139_v38 = vmax.f32 %v7036_v17, 0.0  ;;  %v8412_v12 = vld [vmem:[#allocation29_spill] sm:$0xff]  ;;  %v8413_v31 = vld [vmem:[#allocation47_spill] sm:$0xff] }
 0x11b   : > { %v1338_v59 = vadd.f32 %v8409_v45, %v7068_v35  ;;  %v1442_v19 = vadd.f32 %v8410_v13, %v7068_v35  ;;  %v1243_v49 = vmax.f32 %v7047_v5, 0.0  ;;  %v1336_v1 = vadd.f32 %v8411_v54, %v7031_v20  ;;  %v8421_v51 = vld [vmem:[#allocation49_spill] sm:$0xff]  ;;  %v8425_v54 = vld [vmem:[#allocation64_spill] sm:$0xff] }
 0x11c   : > { %2412 = vmatprep.subr.bf16.mxu1 %v5684_v43  ;;  %2485 = vmatprep.subr.bf16.mxu0 %v5686_v11  ;;  %v1337_v4 = vadd.f32 %v8412_v12, %v7054_v62  ;;  %v1334_v9 = vadd.f32 %v8413_v31, %v7024_v7  ;;  %v8414_v14 = vmax.f32 %v6978_v57, 0.0  ;;  %v8415_v43 = vld [vmem:[#allocation26_spill] sm:$0xff]  ;;  %v1344_v21 = vmax.f32 %v7018_v30, 0.0  ;;  %v8419_v57 = vld [vmem:[#allocation31_spill] sm:$0xff]  ;;  %v8424_v45 = vld [vmem:[#allocation53_spill] sm:$0xff] }
 0x11d   : > { %2413 = vmatpush1.bf16.msra.mxu1 %v5683_v41  ;;  %2486 = vmatpush1.bf16.msra.mxu0 %v5685_v47  ;;  %v1440_v39 = vadd.f32 %v8415_v43, %v7031_v20  ;;  %v8416_v47 = vld [vmem:[#allocation46_spill] sm:$0xff]  ;;  %v5667_v17 = vpack.c.bf16 %v1141_v15, %v1139_v38  ;;  %v5669_v27 = vpack.c.bf16 %v1245_v40, %v1243_v49  ;;  %v1354_v56 = vmax.f32 %v1338_v59, 0.0  ;;  %v8426_v31 = vld [vmem:[#allocation52_spill] sm:$0xff] }
 0x11e   : > { %2414 = vmatprep.subr.bf16.mxu1 %v5668_v61  ;;  %2487 = vmatprep.subr.bf16.mxu0 %v5670_v24  ;;  %v5654_v52 = vpack.c.bf16 %v1242_v55, %v8414_v14  ;;  %v1332_v5 = vadd.f32 %v8416_v47, %v7021_v0  ;;  %v1335_v36 = vadd.f32 %v8417_v25, %v7043_v32  ;;  %v1458_v50 = vmax.f32 %v1442_v19, 0.0  ;;  %v8422_v41 = vld [vmem:[#allocation50_spill] sm:$0xff]  ;;  %v8423_v24 = vld [vmem:[#allocation51_spill] sm:$0xff] }
 0x11f   : > { %v1441_v61 = vadd.f32 %v8418_v3, %v7054_v62  ;;  %v1439_v55 = vadd.f32 %v8419_v57, %v7043_v32  ;;  %v1436_v6 = vadd.f32 %v8420_v8, %v7021_v0  ;;  %v1352_v60 = vmax.f32 %v1336_v1, 0.0  ;;  %v8427_v3 = vld [vmem:[#allocation66_spill] sm:$0xff]  ;;  %v8430_v57 = vld [vmem:[#allocation73_spill] sm:$0xff] }
 0x120   : > { %v1353_v15 = vmax.f32 %v1337_v4, 0.0  ;;  %v1350_v30 = vmax.f32 %v1334_v9, 0.0  ;;  %v1438_v23 = vadd.f32 %v8421_v51, %v7024_v7  ;;  %v1456_v11 = vmax.f32 %v1440_v39, 0.0 }
 0x121   : > { %2415 = vmatpush1.bf16.msra.mxu1 %v5667_v17  ;;  %2488 = vmatpush1.bf16.msra.mxu0 %v5669_v27  ;;  %v1331_v40 = vadd.f32 %v8422_v41, %v6999_v16  ;;  %v1333_v38 = vadd.f32 %v8423_v24, %v7051_v63  ;;  %v1437_v59 = vadd.f32 %v8424_v45, %v7051_v63  ;;  %v1351_v13 = vmax.f32 %v1335_v36, 0.0 }
 0x122   : > { %2416 = vmatprep.subr.bf16.mxu1 %v5652_v22  ;;  %2489 = vmatprep.subr.bf16.mxu0 %v5654_v52  ;;  %v1457_v19 = vmax.f32 %v1441_v61, 0.0  ;;  %v1348_v49 = vmax.f32 %v1332_v5, 0.0  ;;  %v1434_v1 = vadd.f32 %v8425_v54, %v6974_v33  ;;  %v5688_v12 = vpack.c.bf16 %v1354_v56, %v1352_v60  ;;  %v7143_v56 = vld [vmem:[%s8229_s7] sm:$0xff]   ;;  %v8436_v54 = vld [vmem:[#allocation35_spill] sm:$0xff] }
 0x123   : > { %v5690_v4 = vpack.c.bf16 %v1458_v50, %v1456_v11  ;;  %v1455_v22 = vmax.f32 %v1439_v55, 0.0  ;;  %v1435_v9 = vadd.f32 %v8426_v31, %v6999_v16  ;;  %v5687_v14 = vpack.c.bf16 %v1353_v15, %v1351_v13  ;;  %v8431_v55 = vld [vmem:[#allocation74_spill] sm:$0xff]  ;;  %v8432_v15 = vld [vmem:[#allocation67_spill] sm:$0xff]  ;;  %v8434_v13 = vld [vmem:[#allocation33_spill] sm:$0xff] }
 0x124   : > { %v5672_v52 = vpack.c.bf16 %v1350_v30, %v1348_v49  ;;  %v1452_v43 = vmax.f32 %v1436_v6, 0.0  ;;  %v1454_v39 = vmax.f32 %v1438_v23, 0.0  ;;  %v1347_v47 = vmax.f32 %v1331_v40, 0.0 }
 0x125   : > { %2417 = vmatpush1.bf16.msra.mxu1 %v7057_v46  ;;  %2490 = vmatpush1.bf16.msra.mxu0 %v7065_v58  ;;  %v1349_v5 = vmax.f32 %v1333_v38, 0.0  ;;  %v1453_v17 = vmax.f32 %v1437_v59, 0.0  ;;  %v1346_v27 = vmax.f32 %v7040_v10, 0.0  ;;  %v5689_v25 = vpack.c.bf16 %v1457_v19, %v1455_v22  ;;  %v8428_v58 = vld [vmem:[#allocation68_spill] sm:$0xff] }
 0x126   : > { %2418 = vmatprep.subr.bf16.mxu1 %v7002_v18  ;;  %2491 = vmatprep.subr.bf16.mxu0 %v7004_v53  ;;  %v1450_v36 = vmax.f32 %v1434_v1, 0.0  ;;  %v1329_v46 = vadd.f32 %v8427_v3, %v6960_v34  ;;  %v1433_v61 = vadd.f32 %v8428_v58, %v6960_v34  ;;  %v1451_v18 = vmax.f32 %v1435_v9, 0.0  ;;  %v8429_v53 = vld [vmem:[#allocation65_spill] sm:$0xff]  ;;  %v8438_v22 = vld [vmem:[#allocation128_spill] sm:$0xff] }
 0x127   : > { %v1327_v50 = vadd.f32 %v8429_v53, %v6926_v44  ;;  %v1325_v10 = vadd.f32 %v8430_v57, %v6886_v48  ;;  %v1429_v8 = vadd.f32 %v8431_v55, %v6886_v48  ;;  %v5674_v6 = vpack.c.bf16 %v1454_v39, %v1452_v43  ;;  %v8440_v43 = vld [vmem:[#allocation127_spill] sm:$0xff]  ;;  %v8445_v53 = vld [vmem:[#allocation69_spill] sm:$0xff]  ;;  %v8446_v55 = vld [vmem:[#allocation58_spill] sm:$0xff] }
 0x128   : > { %v1448_v60 = vmax.f32 %v7028_v28, 0.0  ;;  %v1431_v30 = vadd.f32 %v8432_v15, %v6926_v44  ;;  %v1342_v51 = vmax.f32 %v6982_v37, 0.0  ;;  %v5671_v23 = vpack.c.bf16 %v1349_v5, %v1347_v47  ;;  %v8441_v47 = vld [vmem:[#allocation129_spill] sm:$0xff]  ;;  %v8442_v5 = vld [vmem:[#allocation56_spill] sm:$0xff] }
 0x129   : > { %2419 = vmatpush1.bf16.msra.mxu1 %v6990_v2  ;;  %2492 = vmatpush1.bf16.msra.mxu0 %v6992_v29  ;;  %v5673_v11 = vpack.c.bf16 %v1453_v17, %v1451_v18  ;;  %v5656_v41 = vpack.c.bf16 %v1346_v27, %v1344_v21  ;;  %v1446_v40 = vmax.f32 %v6986_v26, 0.0  ;;  %v1345_v38 = vmax.f32 %v1329_v46, 0.0  ;;  %v8433_v29 = vld [vmem:[#allocation34_spill] sm:$0xff]  ;;  %v7185_v46 = vld [vmem:[%s8229_s7 + $0x8] sm:$0xff]  }
 0x12a   : > { %2558 = vmatprep.subr.bf16.mxu1 %v5688_v12  ;;  %2631 = vmatprep.subr.bf16.mxu0 %v5690_v4  ;;  %v5658_v24 = vpack.c.bf16 %v1450_v36, %v1448_v60  ;;  %v1449_v2 = vmax.f32 %v1433_v61, 0.0  ;;  %v1546_v45 = vadd.f32 %v8433_v29, %v7068_v35  ;;  %v1343_v37 = vmax.f32 %v1327_v50, 0.0  ;;  %v8437_v12 = vld [vmem:[#allocation54_spill] sm:$0xff] }
 0x12b   : > { %v1341_v28 = vmax.f32 %v1325_v10, 0.0  ;;  %v1445_v59 = vmax.f32 %v1429_v8, 0.0  ;;  %v1544_v21 = vadd.f32 %v8434_v13, %v7031_v20  ;;  %v1447_v26 = vmax.f32 %v1431_v30, 0.0  ;;  %v8448_v30 = vld [vmem:[#allocation75_spill] sm:$0xff] }
 0x12c   : > { %5302 = vmatmul.mubr.msk.bf16.vlgmr.msra.gmra.mxu1 %vm2391_vm2, %v7143_v56  ;;  %5306 = vmatmul.mubr.msk.bf16.vlgmr.msra.gmra.mxu0 %vm2391_vm2, %v7143_v56  ;;  %v8435_v19 = vmax.f32 %v6937_v42, 0.0  ;;  %v1648_v1 = vadd.f32 %v8436_v54, %v7031_v20  ;;  %v1650_v4 = vadd.f32 %v8437_v12, %v7068_v35  ;;  %v8439_v31 = vmax.f32 %v8438_v22, 0.0  ;;  %v8457_v22 = vld [vmem:[#allocation80_spill] sm:$0xff] }
 0x12d   : > { %2559 = vmatpush1.bf16.msra.mxu1 %v5687_v14  ;;  %2632 = vmatpush1.bf16.msra.mxu0 %v5689_v25  ;;  %v1339_v39 = vmax.f32 %v8440_v43, 0.0  ;;  %v1443_v14 = vmax.f32 %v8441_v47, 0.0  ;;  %v1543_v17 = vadd.f32 %v8442_v5, %v7043_v32  ;;  %v8443_v42 = vmov 0   ;;  %v8458_v43 = vld [vmem:[#allocation83_spill] sm:$0xff] }
 0x12e   : > { %v5640_v49 = vpack.c.bf16 %v1342_v51, %v8435_v19  ;;  %2560 = vmatprep.subr.bf16.mxu1 %v5672_v52  ;;  %2633 = vmatprep.subr.bf16.mxu0 %v5674_v6  ;;  %v5642_v9 = vpack.c.bf16 %v1446_v40, %v8439_v31  ;;  %v5655_v27 = vpack.c.bf16 %v1345_v38, %v1343_v37  ;;  %v1562_v36 = vmax.f32 %v1546_v45, 0.0  ;;  %v8444_v52 = vld [vmem:[#allocation57_spill] sm:$0xff]  ;;  %v8447_v6 = vld [vmem:[#allocation71_spill] sm:$0xff]  ;;  %v8451_v45 = vld [vmem:[#allocation70_spill] sm:$0xff] }
 0x12f   : > { %2446 = vmatprep.mubr.bf16.mxu1 %v8443_v42  ;;  %2519 = vmatprep.mubr.bf16.mxu0 %v8443_v42  ;;  %v5657_v25 = vpack.c.bf16 %v1449_v2, %v1447_v26  ;;  %v1545_v3 = vadd.f32 %v8444_v52, %v7054_v62  ;;  %v5639_v58 = vpack.c.bf16 %v1341_v28, %v1339_v39  ;;  %v1560_v18 = vmax.f32 %v1544_v21, 0.0  ;;  %v8449_v40 = vld [vmem:[#allocation77_spill] sm:$0xff]  ;;  %v8454_v21 = vld [vmem:[#allocation76_spill] sm:$0xff]  ;;  %v8455_v19 = vld [vmem:[#allocation78_spill] sm:$0xff] }
 0x130   : > { %v5641_v61 = vpack.c.bf16 %v1445_v59, %v1443_v14  ;;  %v1649_v50 = vadd.f32 %v8445_v53, %v7054_v62  ;;  %v1664_v57 = vmax.f32 %v1648_v1, 0.0  ;;  %v1666_v10 = vmax.f32 %v1650_v4, 0.0  ;;  %v8452_v28 = vld [vmem:[#allocation81_spill] sm:$0xff]  ;;  %v8456_v4 = vld [vmem:[#allocation130_spill] sm:$0xff] }
 0x131   : > { %2561 = vmatpush1.bf16.msra.mxu1 %v5671_v23  ;;  %2634 = vmatpush1.bf16.msra.mxu0 %v5673_v11  ;;  %v1647_v8 = vadd.f32 %v8446_v55, %v7043_v32  ;;  %v1542_v60 = vadd.f32 %v8447_v6, %v7024_v7  ;;  %v1559_v15 = vmax.f32 %v1543_v17, 0.0  ;;  %v1646_v51 = vadd.f32 %v8448_v30, %v7024_v7  ;;  %v8450_v23 = vld [vmem:[#allocation79_spill] sm:$0xff]  ;;  %v8459_v52 = vld [vmem:[#allocation82_spill] sm:$0xff] }
 0x132   : > { %2562 = vmatprep.subr.bf16.mxu1 %v5656_v41  ;;  %2635 = vmatprep.subr.bf16.mxu0 %v5658_v24  ;;  %v1541_v38 = vadd.f32 %v8449_v40, %v7051_v63  ;;  %v1645_v11 = vadd.f32 %v8450_v23, %v7051_v63  ;;  %v5692_v2 = vpack.c.bf16 %v1562_v36, %v1560_v18  ;;  %v1561_v29 = vmax.f32 %v1545_v3, 0.0  ;;  %v8453_v24 = vld [vmem:[#allocation72_spill] sm:$0xff] }
 0x133   : > { %v1540_v37 = vadd.f32 %v8451_v45, %v7021_v0  ;;  %v1538_v59 = vadd.f32 %v8452_v28, %v6974_v33  ;;  %v1665_v41 = vmax.f32 %v1649_v50, 0.0  ;;  %v1644_v13 = vadd.f32 %v8453_v24, %v7021_v0 }
 0x134   : > { %5303 = vmatmul.mubr.msk.bf16.gmra.mxu1 %vm2391_vm2, %v7185_v46  ;;  %5307 = vmatmul.mubr.msk.bf16.gmra.mxu0 %vm2391_vm2, %v7185_v46  ;;  %v1539_v26 = vadd.f32 %v8454_v21, %v6999_v16  ;;  %v1643_v54 = vadd.f32 %v8455_v19, %v6999_v16  ;;  %v5694_v1 = vpack.c.bf16 %v1666_v10, %v1664_v57  ;;  %v1558_v12 = vmax.f32 %v1542_v60, 0.0  ;;  %v8468_v19 = vld [vmem:[#allocation124_spill] sm:$0xff] }
 0x135   : > { %2563 = vmatpush1.bf16.msra.mxu1 %v5655_v27  ;;  %2636 = vmatpush1.bf16.msra.mxu0 %v5657_v25  ;;  %v1536_v31 = vadd.f32 %v8457_v22, %v8456_v4  ;;  %v1642_v39 = vadd.f32 %v8458_v43, %v6974_v33  ;;  %v1663_v47 = vmax.f32 %v1647_v8, 0.0  ;;  %v1662_v14 = vmax.f32 %v1646_v51, 0.0  ;;  %v8460_v8 = vld [vmem:[#allocation85_spill] sm:$0xff]  ;;  %v8461_v51 = vld [vmem:[#allocation63_spill] sm:$0xff] }
 0x136   : > { %2564 = vmatprep.subr.bf16.mxu1 %v5640_v49  ;;  %2637 = vmatprep.subr.bf16.mxu0 %v5642_v9  ;;  %v1557_v5 = vmax.f32 %v1541_v38, 0.0  ;;  %v1661_v17 = vmax.f32 %v1645_v11, 0.0  ;;  %v7219_v27 = vpack.c.bf16 %v1561_v29, %v1559_v15  ;;  %v1556_v25 = vmax.f32 %v1540_v37, 0.0  ;;  %v7226_v49 = vld [vmem:[%s8229_s7 + $0x10] sm:$0xff]   ;;  %v8462_v38 = vld [vmem:[#allocation84_spill] sm:$0xff]  ;;  %v8465_v37 = vld [vmem:[#allocation87_spill] sm:$0xff] }
 0x137   : > { %2456 = vmatprep.mubr.bf16.mxu1 %v8443_v42  ;;  %2529 = vmatprep.mubr.bf16.mxu0 %v8443_v42  ;;  %v1554_v36 = vmax.f32 %v1538_v59, 0.0  ;;  %v1640_v3 = vadd.f32 %v8459_v52, %v8456_v4  ;;  %v7228_v9 = vpack.c.bf16 %v1665_v41, %v1663_v47  ;;  %v1660_v18 = vmax.f32 %v1644_v13, 0.0  ;;  %v8463_v11 = vld [vmem:[#allocation98_spill] sm:$0xff]  ;;  %v8466_v59 = vld [vmem:[#allocation115_spill] sm:$0xff]  ;;  %v8467_v41 = vld [vmem:[#allocation88_spill] sm:$0xff] }
 0x138   : > { %v1555_v53 = vmax.f32 %v1539_v26, 0.0  ;;  %v1659_v50 = vmax.f32 %v1643_v54, 0.0  ;;  %v7230_v57 = vpack.c.bf16 %v1558_v12, %v1556_v25  ;;  %v1552_v10 = vmax.f32 %v1536_v31, 0.0  ;;  %v8464_v29 = vld [vmem:[#allocation86_spill] sm:$0xff]  ;;  %v8469_v54 = vld [vmem:[#allocation89_spill] sm:$0xff]  ;;  %v8470_v12 = vld [vmem:[#allocation99_spill] sm:$0xff] }
 0x139   : > { %2565 = vmatpush1.bf16.msra.mxu1 %v5639_v58  ;;  %2638 = vmatpush1.bf16.msra.mxu0 %v5641_v61  ;;  %v1658_v55 = vmax.f32 %v1642_v39, 0.0  ;;  %v7234_v6 = vadd.f32 %v8460_v8, %v6960_v34  ;;  %v7236_v60 = vpack.c.bf16 %v1662_v14, %v1660_v18  ;;  %v7243_v40 = vmul.f32 5.428571, %v8461_v51  ;;  %v8471_v31 = vld [vmem:[#allocation91_spill] sm:$0xff]  ;;  %v8472_v39 = vld [vmem:[#allocation100_spill] sm:$0xff]  ;;  %v8473_v14 = vld [vmem:[#allocation101_spill] sm:$0xff] }
 0x13a   : > { %2704 = vmatprep.subr.bf16.mxu1 %v5692_v2  ;;  %2777 = vmatprep.subr.bf16.mxu0 %v5694_v1  ;;  %v7238_v15 = vpack.c.bf16 %v1557_v5, %v1555_v53  ;;  %v7240_v30 = vpack.c.bf16 %v1661_v17, %v1659_v50  ;;  %v7245_v58 = vpack.c.bf16 %v1554_v36, %v1552_v10  ;;  %v1656_v61 = vmax.f32 %v1640_v3, 0.0  ;;  %v8474_v17 = vld [vmem:[#allocation102_spill] sm:$0xff]  ;;  %v8475_v3 = vld [vmem:[#allocation104_spill] sm:$0xff]  ;;  %v8476_v53 = vld [vmem:[#allocation103_spill] sm:$0xff] }
 0x13b   : > { %v7249_v23 = vadd.f32 %v8462_v38, %v6926_v44  ;;  %v1751_v2 = vadd.f32 %v8463_v11, %v7043_v32  ;;  %v7259_v45 = vadd.f32 %v8464_v29, %v6926_v44  ;;  %v7263_v28 = vadd.f32 %v8465_v37, %v6960_v34  ;;  %v7300_v10 = vld [vmem:[%s8229_s7 + $0x18] sm:$0xff]  }
 0x13c   : > { %5304 = vmatmul.mubr.msk.bf16.gmra.mxu1 %vm2391_vm2, %v7226_v49  ;;  %5308 = vmatmul.mubr.msk.bf16.gmra.mxu0 %vm2391_vm2, %v7226_v49  ;;  %v7267_v24 = vadd.f32 %v8467_v41, %v8466_v59  ;;  %v7270_v13 = vmul.f32 6.0, %v8461_v51  ;;  %v7274_v21 = vpack.c.bf16 %v1658_v55, %v1656_v61  ;;  %v1553_v26 = vmax.f32 %v7234_v6, 0.0  ;;  %v8479_v41 = vld [vmem:[#allocation107_spill] sm:$0xff] }
 0x13d   : > { %2466 = vmatprep.mubr.bf16.mxu1 %v8443_v42  ;;  %2539 = vmatprep.mubr.bf16.mxu0 %v8443_v42  ;;  %v7279_v1 = vadd.f32 %v8469_v54, %v8468_v19  ;;  %v1753_v22 = vadd.f32 %v8470_v12, %v7054_v62  ;;  %v7285_v43 = vadd.f32 %v8471_v31, %v8468_v19  ;;  %v1767_v36 = vmax.f32 %v1751_v2, 0.0  ;;  %v8478_v2 = vld [vmem:[#allocation106_spill] sm:$0xff]  ;;  %v8480_v12 = vld [vmem:[#allocation108_spill] sm:$0xff] }
 0x13e   : > { %v1855_v47 = vadd.f32 %v8472_v39, %v7043_v32  ;;  %v1857_v5 = vadd.f32 %v8473_v14, %v7054_v62  ;;  %v1748_v25 = vadd.f32 %v8474_v17, %v7021_v0  ;;  %v1750_v18 = vadd.f32 %v8475_v3, %v7024_v7  ;;  %v8477_v62 = vld [vmem:[#allocation105_spill] sm:$0xff]  ;;  %v8482_v14 = vld [vmem:[#allocation110_spill] sm:$0xff] }
 0x13f   : > { %v1769_v52 = vmax.f32 %v1753_v22, 0.0  ;;  %v1852_v50 = vadd.f32 %v8476_v53, %v7021_v0  ;;  %v1854_v51 = vadd.f32 %v8477_v62, %v7024_v7  ;;  %v1747_v29 = vadd.f32 %v8478_v2, %v6999_v16  ;;  %v8481_v7 = vld [vmem:[#allocation109_spill] sm:$0xff]  ;;  %v8486_v62 = vld [vmem:[#allocation116_spill] sm:$0xff] }
 0x140   : > { %v1871_v32 = vmax.f32 %v1855_v47, 0.0  ;;  %v1873_v55 = vmax.f32 %v1857_v5, 0.0  ;;  %v1764_v8 = vmax.f32 %v1748_v25, 0.0  ;;  %v1766_v38 = vmax.f32 %v1750_v18, 0.0  ;;  %v8484_v18 = vld [vmem:[#allocation112_spill] sm:$0xff] }
 0x141   : > { %v7304_v61 = vpack.c.bf16 %v1769_v52, %v1767_v36  ;;  %v1868_v11 = vmax.f32 %v1852_v50, 0.0  ;;  %v1870_v0 = vmax.f32 %v1854_v51, 0.0  ;;  %v1749_v54 = vadd.f32 %v8479_v41, %v7051_v63  ;;  %v8485_v50 = vld [vmem:[#allocation113_spill] sm:$0xff] }
 0x142   : > { %v7308_v37 = vpack.c.bf16 %v1873_v55, %v1871_v32  ;;  %v1851_v22 = vadd.f32 %v8480_v12, %v6999_v16  ;;  %v7314_v31 = vpack.c.bf16 %v1766_v38, %v1764_v8  ;;  %v1763_v39 = vmax.f32 %v1747_v29, 0.0  ;;  %v8483_v16 = vld [vmem:[#allocation111_spill] sm:$0xff]  ;;  %v8487_v38 = vld [vmem:[#allocation118_spill] sm:$0xff]  ;;  %v8488_v41 = vld [vmem:[#allocation117_spill] sm:$0xff] }
 0x143   : > { %v1853_v47 = vadd.f32 %v8481_v7, %v7051_v63  ;;  %v1744_v5 = vadd.f32 %v8482_v14, %v8456_v4  ;;  %v7324_v17 = vpack.c.bf16 %v1870_v0, %v1868_v11  ;;  %v1765_v25 = vmax.f32 %v1749_v54, 0.0  ;;  %v8490_v14 = vld [vmem:[#allocation120_spill] sm:$0xff] }
 0x144   : > { %5305 = vmatmul.mubr.msk.bf16.gmra.mxu1 %vm2391_vm2, %v7300_v10  ;;  %5309 = vmatmul.mubr.msk.bf16.gmra.mxu0 %vm2391_vm2, %v7300_v10  ;;  %v1867_v36 = vmax.f32 %v1851_v22, 0.0  ;;  %v1746_v52 = vadd.f32 %v8483_v16, %v6974_v33  ;;  %v1848_v53 = vadd.f32 %v8484_v18, %v8456_v4  ;;  %v1850_v32 = vadd.f32 %v8485_v50, %v6974_v33  ;;  %v8489_v22 = vld [vmem:[#allocation119_spill] sm:$0xff]  ;;  %v8494_v50 = vld [vmem:[#allocation114_spill] sm:$0xff] }
 0x145   : > { %2582 = vmatprep.mubr.bf16.mxu1 %v8443_v42  ;;  %2655 = vmatprep.mubr.bf16.mxu0 %v8443_v42  ;;  %v1869_v63 = vmax.f32 %v1853_v47, 0.0  ;;  %v1760_v3 = vmax.f32 %v1744_v5, 0.0  ;;  %v7334_v55 = vpack.c.bf16 %v1765_v25, %v1763_v39  ;;  %v1743_v51 = vadd.f32 %v8486_v62, %v6926_v44  ;;  %v8491_v25 = vld [vmem:[#allocation121_spill] sm:$0xff] }
 0x146   : > { %v1762_v8 = vmax.f32 %v1746_v52, 0.0  ;;  %v1745_v11 = vadd.f32 %v8487_v38, %v6960_v34  ;;  %v1864_v29 = vmax.f32 %v1848_v53, 0.0  ;;  %v1866_v0 = vmax.f32 %v1850_v32, 0.0  ;;  %v8495_v32 = vld [vmem:[#allocation125_spill] sm:$0xff] }
 0x147   : > { %v7340_v2 = vpack.c.bf16 %v1869_v63, %v1867_v36  ;;  %v1847_v54 = vadd.f32 %v8488_v41, %v6926_v44  ;;  %v1759_v12 = vmax.f32 %v1743_v51, 0.0  ;;  %v1849_v39 = vadd.f32 %v8489_v22, %v6960_v34  ;;  %v8492_v44 = vld [vmem:[#allocation122_spill] sm:$0xff] }
 0x148   : > { %v7344_v4 = vpack.c.bf16 %v1762_v8, %v1760_v3  ;;  %v1761_v33 = vmax.f32 %v1745_v11, 0.0  ;;  %v7348_v7 = vpack.c.bf16 %v1866_v0, %v1864_v29  ;;  %v1740_v5 = vadd.f32 %v8490_v14, %v8466_v59  ;;  %v8493_v3 = vld [vmem:[#allocation123_spill] sm:$0xff] }
 0x149   : > { %v1863_v47 = vmax.f32 %v1847_v54, 0.0  ;;  %v1742_v36 = vadd.f32 %v8491_v25, %v8468_v19  ;;  %v1865_v52 = vmax.f32 %v1849_v39, 0.0  ;;  %v1844_v63 = vadd.f32 %v8492_v44, %v8466_v59 }
 0x14a   : > { %v7354_v16 = vpack.c.bf16 %v1761_v33, %v1759_v12  ;;  %v1846_v18 = vadd.f32 %v8493_v3, %v8468_v19  ;;  %v1756_v53 = vmax.f32 %v1740_v5, 0.0  ;;  %v1739_v8 = vadd.f32 %v8495_v32, %v8494_v50  ;;  %v8496_v19 = vld [vmem:[#allocation126_spill] sm:$0xff]  ;;  %v8500_v5 = vld [vmem:[#allocation96_spill] sm:$0xff] }
 0x14b   : > { %v1758_v34 = vmax.f32 %v1742_v36, 0.0  ;;  %v1741_v62 = vadd.f32 %v7243_v40, %v6886_v48  ;;  %v7368_v51 = vpack.c.bf16 %v1865_v52, %v1863_v47  ;;  %v1860_v38 = vmax.f32 %v1844_v63, 0.0  ;;  %v8497_v33 = vld [vmem:[#allocation90_spill] sm:$0xff]  ;;  %v8501_v36 = vld [vmem:[#allocation97_spill] sm:$0xff] }
 0x14c   : > { %5310 = vmatmul.mubr.msk.bf16.vlgmr.msra.gmra.mxu1 %vm2391_vm2, %v7143_v56  ;;  %5314 = vmatmul.mubr.msk.bf16.vlgmr.msra.gmra.mxu0 %vm2391_vm2, %v7143_v56  ;;  %v1862_v11 = vmax.f32 %v1846_v18, 0.0  ;;  %v1843_v29 = vadd.f32 %v8496_v19, %v8494_v50  ;;  %v1755_v40 = vmax.f32 %v1739_v8, 0.0  ;;  %v1845_v54 = vadd.f32 %v7270_v13, %v6886_v48  ;;  %v8499_v13 = vld [vmem:[#allocation94_spill] sm:$0xff]  ;;  %v8502_v63 = vld [vmem:[#allocation93_spill] sm:$0xff]  ;;  %v8505_v8 = vld [vmem:[#allocation131_spill] sm:$0xff] }
 0x14d   : > { %2705 = vmatpush1.bf16.msra.mxu1 %v7219_v27  ;;  %2778 = vmatpush1.bf16.msra.mxu0 %v7228_v9  ;;  %v7374_v0 = vpack.c.bf16 %v1758_v34, %v1756_v53  ;;  %v1757_v41 = vmax.f32 %v1741_v62, 0.0  ;;  %v1657_v12 = vmax.f32 %v7263_v28, 0.0  ;;  %v1636_v22 = vadd.f32 %v8497_v33, %v8466_v59  ;;  %v8498_v27 = vld [vmem:[#allocation92_spill] sm:$0xff] }
 0x14e   : > { %2706 = vmatprep.subr.bf16.mxu1 %v7230_v57  ;;  %2779 = vmatprep.subr.bf16.mxu0 %v7236_v60  ;;  %v1533_v39 = vadd.f32 %v8498_v27, %v6886_v48  ;;  %v7385_v9 = vpack.c.bf16 %v1862_v11, %v1860_v38  ;;  %v1637_v47 = vadd.f32 %v8499_v13, %v6886_v48  ;;  %v1859_v60 = vmax.f32 %v1843_v29, 0.0  ;;  %v7525_v27 = vpop.permute.xlu0 %2043 }
 0x14f   : > { %2592 = vmatprep.mubr.bf16.mxu1 %v8443_v42  ;;  %2665 = vmatprep.mubr.bf16.mxu0 %v8443_v42  ;;  %v7391_v57 = vpack.c.bf16 %v1757_v41, %v1755_v40  ;;  %v1861_v14 = vmax.f32 %v1845_v54, 0.0  ;;  %v1550_v28 = vmax.f32 %v7279_v1, 0.0  ;;  %v1654_v59 = vmax.f32 %v7285_v43, 0.0 }
 0x150   : > { %v1754_v25 = vadd.f32 %v8500_v5, %v7068_v35  ;;  %v1858_v52 = vadd.f32 %v8501_v36, %v7068_v35  ;;  %v1551_v48 = vmax.f32 %v7249_v23, 0.0  ;;  %v1655_v44 = vmax.f32 %v7259_v45, 0.0 }
 0x151   : > { %2707 = vmatpush1.bf16.msra.mxu1 %v7238_v15  ;;  %2780 = vmatpush1.bf16.msra.mxu0 %v7240_v30  ;;  %v1635_v3 = vadd.f32 %v8502_v63, %v8494_v50  ;;  %v7405_v1 = vpack.c.bf16 %v1861_v14, %v1859_v60  ;;  %v1548_v43 = vmax.f32 %v7267_v24, 0.0  ;;  %v1652_v35 = vmax.f32 %v1636_v22, 0.0  ;;  %v8503_v15 = vld [vmem:[#allocation95_spill] sm:$0xff]  ;;  %v8504_v30 = vld [vmem:[#allocation30_spill] sm:$0xff] }
 0x152   : > { %2708 = vmatprep.subr.bf16.mxu1 %v7245_v58  ;;  %2781 = vmatprep.subr.bf16.mxu0 %v7274_v21  ;;  %v1752_v18 = vadd.f32 %v8503_v15, %v7031_v20  ;;  %v1856_v23 = vadd.f32 %v8504_v30, %v7031_v20  ;;  %v5659_v45 = vpack.c.bf16 %v1553_v26, %v1551_v48  ;;  %v1549_v34 = vmax.f32 %v1533_v39, 0.0 }
 0x153   : > { %v5661_v53 = vpack.c.bf16 %v1657_v12, %v1655_v44  ;;  %v1653_v50 = vmax.f32 %v1637_v47, 0.0  ;;  %v5644_v58 = vpack.c.bf16 %v1550_v28, %v1548_v43  ;;  %v5646_v24 = vpack.c.bf16 %v1654_v59, %v1652_v35  ;;  %v7521_v12 = vpop.permute.xlu1 %2048  ;;  %v7535_v28 = vpop.permute.xlu0 %2033 }
 0x154   : > { %5311 = vmatmul.mubr.msk.bf16.gmra.mxu1 %vm2391_vm2, %v7185_v46  ;;  %5315 = vmatmul.mubr.msk.bf16.gmra.mxu0 %vm2391_vm2, %v7185_v46  ;;  %v1770_v21 = vmax.f32 %v1754_v25, 0.0  ;;  %v1874_v32 = vmax.f32 %v1858_v52, 0.0  ;;  %v1547_v20 = vmax.f32 %v8505_v8, 0.0  ;;  %v1651_v62 = vmax.f32 %v1635_v3, 0.0 }
 0x155   : > { %2709 = vmatpush1.bf16.msra.mxu1 %v5659_v45  ;;  %2782 = vmatpush1.bf16.msra.mxu0 %v5661_v53  ;;  %v1768_v6 = vmax.f32 %v1752_v18, 0.0  ;;  %v1872_v26 = vmax.f32 %v1856_v23, 0.0 }
 0x156   : > { %2710 = vmatprep.subr.bf16.mxu1 %v5644_v58  ;;  %2783 = vmatprep.subr.bf16.mxu0 %v5646_v24  ;;  %v5643_v38 = vpack.c.bf16 %v1549_v34, %v1547_v20  ;;  %v5645_v11 = vpack.c.bf16 %v1653_v50, %v1651_v62 }
 0x157   : > { %2602 = vmatprep.mubr.bf16.mxu1 %v8443_v42  ;;  %2675 = vmatprep.mubr.bf16.mxu0 %v8443_v42  ;;  %v5696_v19 = vpack.c.bf16 %v1770_v21, %v1768_v6  ;;  %v5698_v29 = vpack.c.bf16 %v1874_v32, %v1872_v26  ;;  %v7545_v35 = vpop.permute.xlu0 %2023 }
 0x159   : > { %2711 = vmatpush1.bf16.msra.mxu1 %v5643_v38  ;;  %2784 = vmatpush1.bf16.msra.mxu0 %v5645_v11 }
 0x15a   : > { %2850 = vmatprep.subr.bf16.mxu1 %v5696_v19  ;;  %2923 = vmatprep.subr.bf16.mxu0 %v5698_v29 }
 0x15c   : > { %5312 = vmatmul.mubr.msk.bf16.gmra.mxu1 %vm2391_vm2, %v7226_v49  ;;  %5316 = vmatmul.mubr.msk.bf16.gmra.mxu0 %vm2391_vm2, %v7226_v49 }
 0x15d   : > { %2612 = vmatprep.mubr.bf16.mxu1 %v8443_v42  ;;  %2685 = vmatprep.mubr.bf16.mxu0 %v8443_v42 }
 0x164   : > { %5313 = vmatmul.mubr.msk.bf16.gmra.mxu1 %vm2391_vm2, %v7300_v10  ;;  %5317 = vmatmul.mubr.msk.bf16.gmra.mxu0 %vm2391_vm2, %v7300_v10 }
 0x165   : > { %2728 = vmatprep.mubr.bf16.mxu1 %v8443_v42  ;;  %2801 = vmatprep.mubr.bf16.mxu0 %v8443_v42 }
 0x16c   : > { %5318 = vmatmul.mubr.msk.bf16.vlgmr.msra.gmra.mxu1 %vm2391_vm2, %v7143_v56  ;;  %5322 = vmatmul.mubr.msk.bf16.vlgmr.msra.gmra.mxu0 %vm2391_vm2, %v7143_v56 }
 0x16d   : > { %2851 = vmatpush1.bf16.msra.mxu1 %v7304_v61  ;;  %2924 = vmatpush1.bf16.msra.mxu0 %v7308_v37 }
 0x16e   : > { %2852 = vmatprep.subr.bf16.mxu1 %v7314_v31  ;;  %2925 = vmatprep.subr.bf16.mxu0 %v7324_v17 }
 0x16f   : > { %2738 = vmatprep.mubr.bf16.mxu1 %v8443_v42  ;;  %2811 = vmatprep.mubr.bf16.mxu0 %v8443_v42 }
 0x171   : > { %2853 = vmatpush1.bf16.msra.mxu1 %v7334_v55  ;;  %2926 = vmatpush1.bf16.msra.mxu0 %v7340_v2 }
 0x172   : > { %2854 = vmatprep.subr.bf16.mxu1 %v7344_v4  ;;  %2927 = vmatprep.subr.bf16.mxu0 %v7348_v7 }
 0x174   : > { %5319 = vmatmul.mubr.msk.bf16.gmra.mxu1 %vm2391_vm2, %v7185_v46  ;;  %5323 = vmatmul.mubr.msk.bf16.gmra.mxu0 %vm2391_vm2, %v7185_v46 }
 0x175   : > { %2855 = vmatpush1.bf16.msra.mxu1 %v7354_v16  ;;  %2928 = vmatpush1.bf16.msra.mxu0 %v7368_v51 }
 0x176   : > { %2856 = vmatprep.subr.bf16.mxu1 %v7374_v0  ;;  %2929 = vmatprep.subr.bf16.mxu0 %v7385_v9 }
 0x177   : > { %2748 = vmatprep.mubr.bf16.mxu1 %v8443_v42  ;;  %2821 = vmatprep.mubr.bf16.mxu0 %v8443_v42 }
 0x179   : > { %2857 = vmatpush1.bf16.msra.mxu1 %v7391_v57  ;;  %2930 = vmatpush1.bf16.msra.mxu0 %v7405_v1  ;;  %v7531_v57 = vpop.permute.xlu1 %2038 }
 0x17c   : > { %5320 = vmatmul.mubr.msk.bf16.gmra.mxu1 %vm2391_vm2, %v7226_v49  ;;  %5324 = vmatmul.mubr.msk.bf16.gmra.mxu0 %vm2391_vm2, %v7226_v49 }
 0x17d   : > { %2758 = vmatprep.mubr.bf16.mxu1 %v8443_v42  ;;  %2831 = vmatprep.mubr.bf16.mxu0 %v8443_v42  ;;  %v7539_v52 = vpop.permute.xlu1 %2028 }
 0x181   : > { %v7560_v62 = vpop.permute.xlu1 %2018 }
 0x184   : > { %5321 = vmatmul.mubr.msk.bf16.gmra.mxu1 %vm2391_vm2, %v7300_v10  ;;  %5325 = vmatmul.mubr.msk.bf16.gmra.mxu0 %vm2391_vm2, %v7300_v10 }
 0x185   : > { %2874 = vmatprep.mubr.bf16.mxu1 %v8443_v42  ;;  %2947 = vmatprep.mubr.bf16.mxu0 %v8443_v42 }
 0x18c   : > { %5326 = vmatmul.mubr.msk.bf16.vlgmr.msra.gmra.mxu1 %vm2391_vm2, %v7143_v56  ;;  %5330 = vmatmul.mubr.msk.bf16.vlgmr.msra.gmra.mxu0 %vm2391_vm2, %v7143_v56 }
 0x18d   : > { %2884 = vmatprep.mubr.bf16.mxu1 %v8443_v42  ;;  %2957 = vmatprep.mubr.bf16.mxu0 %v8443_v42 }
 0x194   : > { %5327 = vmatmul.mubr.msk.bf16.gmra.mxu1 %vm2391_vm2, %v7185_v46  ;;  %5331 = vmatmul.mubr.msk.bf16.gmra.mxu0 %vm2391_vm2, %v7185_v46 }
 0x195   : > { %2894 = vmatprep.mubr.bf16.mxu1 %v8443_v42  ;;  %2967 = vmatprep.mubr.bf16.mxu0 %v8443_v42 }
 0x19c   : > { %5328 = vmatmul.mubr.msk.bf16.gmra.mxu1 %vm2391_vm2, %v7226_v49  ;;  %5332 = vmatmul.mubr.msk.bf16.gmra.mxu0 %vm2391_vm2, %v7226_v49 }
 0x19d   : > { %2904 = vmatprep.mubr.bf16.mxu1 %v8443_v42  ;;  %2977 = vmatprep.mubr.bf16.mxu0 %v8443_v42 }
 0x1a4   : > { %5329 = vmatmul.mubr.msk.bf16.gmra.mxu1 %vm2391_vm2, %v7300_v10  ;;  %5333 = vmatmul.mubr.msk.bf16.gmra.mxu0 %vm2391_vm2, %v7300_v10 }
 0x1a5   : > { %3990 = vmatprep.mubr.bf16.mxu1 %v8443_v42  ;;  %4072 = vmatprep.mubr.bf16.mxu0 %v8443_v42 }
 0x1ec   : > { %v7497_v56 = vpop.f32.mrf.mxu1  ;;  %v7499_v46 = vpop.f32.mrf.mxu0 }
 0x1ee   : > { %v7501_v61 = vpop.f32.mrf.mxu1  ;;  %v7503_v49 = vpop.f32.mrf.mxu0 }
 0x1f0   : > { %v7505_v37 = vpop.f32.mrf.mxu1  ;;  %v7507_v31 = vpop.f32.mrf.mxu0 }
 0x1f2   : > { %v2444_v17 = vpop.f32.mrf.mxu1  ;;  %v7509_v55 = vpop.f32.mrf.mxu0 }
 0x1f4   : > { %v2448_v10 = vpop.f32.mrf.mxu1  ;;  %v7511_v2 = vpop.f32.mrf.mxu0 }
 0x1f6   : > { %v2450_v4 = vpop.f32.mrf.mxu1  ;;  %v7513_v7 = vpop.f32.mrf.mxu0 }
 0x1f7   : > { %v2451_v6 = vadd.f32 %v2450_v4, %v7545_v35 }
 0x1f8   : > { %v2452_v16 = vpop.f32.mrf.mxu1  ;;  %v7515_v51 = vpop.f32.mrf.mxu0 }
 0x1f9   : > { %v2453_v11 = vadd.f32 %v2452_v16, %v7539_v52 }
 0x1fa   : > { %v2454_v0 = vpop.f32.mrf.mxu1  ;;  %v7517_v40 = vpop.f32.mrf.mxu0 }
 0x1fb   : > { %v2455_v34 = vadd.f32 %v2454_v0, %v7539_v52 }
 0x1fc   : > { %v2458_v41 = vpop.f32.mrf.mxu1  ;;  %v7519_v54 = vpop.f32.mrf.mxu0 }
 0x1fd   : > { %v2459_v21 = vadd.f32 %v2458_v41, %v7535_v28  ;;  %v7568_v41 = vpop.permute.xlu0 %2013 }
 0x1fe   : > { %v2460_v33 = vpop.f32.mrf.mxu1  ;;  %v7523_v22 = vpop.f32.mrf.mxu0  ;;  %v2441_v16 = vadd.f32 %v7501_v61, %v7568_v41 }
 0x1ff   : > { %v2461_v15 = vadd.f32 %v2460_v33, %v7535_v28  ;;  %v3052_v4 = vmax.f32 %v2459_v21, 0.0 }
 0x200   : > { %v2462_v39 = vpop.f32.mrf.mxu1  ;;  %v7527_v9 = vpop.f32.mrf.mxu0 }
 0x201   : > { %v2463_v30 = vadd.f32 %v2462_v39, %v7531_v57  ;;  %v3053_v26 = vmax.f32 %v2461_v15, 0.0  ;;  %v2445_v39 = vadd.f32 %v2444_v17, %v7560_v62  ;;  %v3036_v17 = vmax.f32 %v2453_v11, 0.0 }
 0x202   : > { %v2464_v13 = vpop.f32.mrf.mxu1  ;;  %v7529_v47 = vpop.f32.mrf.mxu0 }
 0x203   : > { %v2465_v48 = vadd.f32 %v2464_v13, %v7531_v57  ;;  %v3068_v19 = vmax.f32 %v2463_v30, 0.0  ;;  %v3037_v13 = vmax.f32 %v2455_v34, 0.0 }
 0x204   : > { %v2468_v60 = vpop.f32.mrf.mxu1  ;;  %v7533_v14 = vpop.f32.mrf.mxu0 }
 0x205   : > { %v2469_v3 = vadd.f32 %v2468_v60, %v7525_v27  ;;  %v3069_v50 = vmax.f32 %v2465_v48, 0.0 }
 0x206   : > { %v2470_v59 = vpop.f32.mrf.mxu1  ;;  %v2543_v5 = vpop.f32.mrf.mxu0 }
 0x207   : > { %v2471_v44 = vadd.f32 %v2470_v59, %v7525_v27  ;;  %v3084_v32 = vmax.f32 %v2469_v3, 0.0  ;;  %v5732_v60 = vpack.c.bf16 %v3069_v50, %v3053_v26  ;;  %v2449_v59 = vadd.f32 %v2448_v10, %v7545_v35 }
 0x208   : > { %v2472_v25 = vpop.f32.mrf.mxu1  ;;  %v7537_v36 = vpop.f32.mrf.mxu0  ;;  %v5731_v3 = vpack.c.bf16 %v3068_v19, %v3052_v4  ;;  %v3005_v10 = vmax.f32 %v2445_v39, 0.0  ;;  %v2538_v26 = vadd.f32 %v7529_v47, %v7531_v57  ;;  %v2542_v19 = vadd.f32 %v7533_v14, %v7525_v27 }
 0x209   : > { %v2473_v63 = vadd.f32 %v2472_v25, %v7521_v12  ;;  %v3085_v58 = vmax.f32 %v2471_v44, 0.0  ;;  %v3021_v44 = vmax.f32 %v2451_v6, 0.0  ;;  %v3020_v34 = vmax.f32 %v2449_v59, 0.0 }
 0x20a   : > { %v2474_v1 = vpop.f32.mrf.mxu1  ;;  %v2547_v43 = vpop.f32.mrf.mxu0  ;;  %v2516_v14 = vadd.f32 %v7507_v31, %v7560_v62  ;;  %v7627_v31 = vld [vmem:[%s8231_s9] sm:$0xf] }
 0x20b   : > { %v2475_v18 = vadd.f32 %v2474_v1, %v7521_v12  ;;  %v3100_v23 = vmax.f32 %v2473_v63, 0.0  ;;  %v2443_v63 = vadd.f32 %v7505_v37, %v7560_v62  ;;  %v2548_v30 = vadd.f32 %v2547_v43, %v7521_v12 }
 0x20c   : > { %v7550_v45 = vpop.f32.mrf.mxu1  ;;  %v7552_v53 = vpop.f32.mrf.mxu0  ;;  %v2989_v37 = vmax.f32 %v2441_v16, 0.0  ;;  %v5715_v21 = vpack.c.bf16 %v3036_v17, %v3020_v34  ;;  %v2528_v16 = vadd.f32 %v7517_v40, %v7539_v52  ;;  %v2526_v17 = vadd.f32 %v7515_v51, %v7539_v52 }
 0x20d   : > { %v3101_v24 = vmax.f32 %v2475_v18, 0.0  ;;  %v5747_v29 = vpack.c.bf16 %v3100_v23, %v3084_v32  ;;  %v5716_v18 = vpack.c.bf16 %v3037_v13, %v3021_v44  ;;  %v2439_v23 = vadd.f32 %v7497_v56, %v7568_v41 }
 0x20e   : > { %v7556_v8 = vpop.f32.mrf.mxu1  ;;  %v7558_v20 = vpop.f32.mrf.mxu0  ;;  %v2546_v32 = vadd.f32 %v7537_v36, %v7521_v12  ;;  %v5700_v56 = vpack.c.bf16 %v3005_v10, %v2989_v37  ;;  %v2534_v36 = vadd.f32 %v7523_v22, %v7535_v28  ;;  %v3071_v44 = vmax.f32 %v2538_v26, 0.0 }
 0x20f   : > { %v5748_v38 = vpack.c.bf16 %v3101_v24, %v3085_v58  ;;  %v2544_v58 = vadd.f32 %v2543_v5, %v7525_v27  ;;  %v3004_v24 = vmax.f32 %v2443_v63, 0.0  ;;  %v2988_v11 = vmax.f32 %v2439_v23, 0.0 }
 0x210   : > { %v7564_v0 = vpop.f32.mrf.mxu1  ;;  %v7566_v33 = vpop.f32.mrf.mxu0  ;;  %v3102_v47 = vmax.f32 %v2546_v32, 0.0  ;;  %v2518_v22 = vadd.f32 %v7509_v55, %v7560_v62  ;;  %v2512_v40 = vadd.f32 %v7499_v46, %v7568_v41  ;;  %v2524_v55 = vadd.f32 %v7513_v7, %v7545_v35 }
 0x211   : > { %3966 = vmatprep.subr.bf16.mxu1 %v5748_v38  ;;  %v3103_v38 = vmax.f32 %v2548_v30, 0.0  ;;  %v3087_v39 = vmax.f32 %v2544_v58, 0.0  ;;  %v5699_v13 = vpack.c.bf16 %v3004_v24, %v2988_v11  ;;  %v3055_v30 = vmax.f32 %v2534_v36, 0.0 }
 0x212   : > { %v7572_v25 = vpop.f32.mrf.mxu1  ;;  %v7574_v48 = vpop.f32.mrf.mxu0  ;;  %3967 = vmatpush1.bf16.msra.mxu1 %v5747_v29  ;;  %v2514_v51 = vadd.f32 %v7503_v49, %v7568_v41  ;;  %v3006_v24 = vmax.f32 %v2516_v14, 0.0  ;;  %v3007_v46 = vmax.f32 %v2518_v22, 0.0  ;;  %v3038_v7 = vmax.f32 %v2526_v17, 0.0 }
 0x213   : > { %3968 = vmatprep.subr.bf16.mxu1 %v5732_v60  ;;  %v2536_v60 = vadd.f32 %v7527_v9, %v7531_v57  ;;  %v5750_v63 = vpack.c.bf16 %v3103_v38, %v3087_v39  ;;  %v2532_v9 = vadd.f32 %v7519_v54, %v7535_v28  ;;  %v2522_v54 = vadd.f32 %v7511_v2, %v7545_v35 }
 0x214   : > { %v7580_v1 = vpop.f32.mrf.mxu1  ;;  %v7582_v15 = vpop.f32.mrf.mxu0  ;;  %v5734_v32 = vpack.c.bf16 %v3071_v44, %v3055_v30  ;;  %v2990_v49 = vmax.f32 %v2512_v40, 0.0  ;;  %v3023_v2 = vmax.f32 %v2524_v55, 0.0  ;;  %v2991_v11 = vmax.f32 %v2514_v51, 0.0 }
 0x215   : > { %v3070_v23 = vmax.f32 %v2536_v60, 0.0  ;;  %v7642_v44 = vadd.f32 %v7550_v45, %v7568_v41  ;;  %v7658_v40 = vadd.f32 %v7580_v1, %v7545_v35 }
 0x216   : > { %v7587_v61 = vpop.f32.mrf.mxu1  ;;  %v7589_v50 = vpop.f32.mrf.mxu0  ;;  %3969 = vmatpush1.bf16.msra.mxu1 %v5731_v3  ;;  %v3086_v3 = vmax.f32 %v2542_v19, 0.0  ;;  %v3022_v19 = vmax.f32 %v2522_v54, 0.0  ;;  %v5701_v60 = vpack.c.bf16 %v3006_v24, %v2990_v49  ;;  %v5702_v14 = vpack.c.bf16 %v3007_v46, %v2991_v11 }
 0x217   : > { %3970 = vmatprep.subr.bf16.mxu1 %v5716_v18  ;;  %v7662_v45 = vadd.f32 %v7587_v61, %v7545_v35 }
 0x218   : > { %v7594_v6 = vpop.f32.mrf.mxu1  ;;  %v7596_v43 = vpop.f32.mrf.mxu0  ;;  %v5749_v34 = vpack.c.bf16 %v3102_v47, %v3086_v3  ;;  %v7654_v3 = vadd.f32 %v7574_v48, %v7560_v62 }
 0x21a   : > { %v7602_v5 = vpop.f32.mrf.mxu1  ;;  %v7604_v29 = vpop.f32.mrf.mxu0  ;;  %3971 = vmatpush1.bf16.msra.mxu1 %v5715_v21  ;;  %v3039_v21 = vmax.f32 %v2528_v16, 0.0  ;;  %v5717_v16 = vpack.c.bf16 %v3038_v7, %v3022_v19 }
 0x21b   : > { %3972 = vmatprep.subr.bf16.mxu1 %v5700_v56  ;;  %v3054_v56 = vmax.f32 %v2532_v9, 0.0  ;;  %v7650_v9 = vadd.f32 %v7572_v25, %v7560_v62  ;;  %v7670_v25 = vadd.f32 %v7602_v5, %v7539_v52  ;;  %v7676_v51 = vadd.f32 %v7604_v29, %v7539_v52 }
 0x21c   : > { %v7610_v59 = vpop.f32.mrf.mxu1  ;;  %v7612_v4 = vpop.f32.mrf.mxu0  ;;  %v5718_v47 = vpack.c.bf16 %v3039_v21, %v3023_v2 }
 0x21d   : > { %v5733_v36 = vpack.c.bf16 %v3070_v23, %v3054_v56 }
 0x21e   : > { %v2606_v10 = vpop.f32.mrf.mxu1  ;;  %v2679_v18 = vpop.f32.mrf.mxu0  ;;  %3973 = vmatpush1.bf16.msra.mxu1 %v5699_v13 }
 0x21f   : > { %4007 = vmatprep.subr.bf16.mxu1 %v5750_v63  ;;  %v7646_v63 = vadd.f32 %v7556_v8, %v7568_v41  ;;  %v7666_v8 = vadd.f32 %v7589_v50, %v7545_v35  ;;  %v2607_v23 = vadd.f32 %v2606_v10, %v7535_v28  ;;  %v2680_v5 = vadd.f32 %v2679_v18, %v7535_v28 }
 0x220   : > { %v2608_v37 = vpop.f32.mrf.mxu1  ;;  %v2681_v58 = vpop.f32.mrf.mxu0 }
 0x221   : > { %5462 = vmatmul.mubr.msk.bf16.vlgmr.msra.gmra.mxu1 %vm2391_vm2, %v7627_v31  ;;  %v2609_v29 = vadd.f32 %v2608_v37, %v7531_v57  ;;  %v2682_v10 = vadd.f32 %v2681_v58, %v7531_v57 }
 0x222   : > { %v2610_v26 = vpop.f32.mrf.mxu1  ;;  %v2683_v38 = vpop.f32.mrf.mxu0  ;;  %4008 = vmatpush1.bf16.msra.mxu1 %v5749_v34  ;;  %4031 = vmatprep.mubr.bf16.mxu1 %v8443_v42 }
 0x223   : > { %4009 = vmatprep.subr.bf16.mxu1 %v5734_v32  ;;  %v2611_v48 = vadd.f32 %v2610_v26, %v7531_v57  ;;  %v2684_v34 = vadd.f32 %v2683_v38, %v7531_v57 }
 0x224   : > { %v2614_v39 = vpop.f32.mrf.mxu1  ;;  %v2687_v13 = vpop.f32.mrf.mxu0 }
 0x225   : > { %v2615_v24 = vadd.f32 %v2614_v39, %v7525_v27  ;;  %v2688_v46 = vadd.f32 %v2687_v13, %v7525_v27  ;;  %v3073_v26 = vmax.f32 %v2611_v48, 0.0  ;;  %v2605_v39 = vadd.f32 %v7610_v59, %v7535_v28 }
 0x226   : > { %v2616_v22 = vpop.f32.mrf.mxu1  ;;  %v2689_v17 = vpop.f32.mrf.mxu0  ;;  %4010 = vmatpush1.bf16.msra.mxu1 %v5733_v36  ;;  %v2678_v13 = vadd.f32 %v7612_v4, %v7535_v28 }
 0x227   : > { %4011 = vmatprep.subr.bf16.mxu1 %v5718_v47  ;;  %v2617_v55 = vadd.f32 %v2616_v22, %v7525_v27  ;;  %v2690_v61 = vadd.f32 %v2689_v17, %v7525_v27  ;;  %v3075_v47 = vmax.f32 %v2684_v34, 0.0  ;;  %v3057_v22 = vmax.f32 %v2607_v23, 0.0 }
 0x228   : > { %v2618_v30 = vpop.f32.mrf.mxu1  ;;  %v2691_v1 = vpop.f32.mrf.mxu0  ;;  %v3090_v17 = vmax.f32 %v2688_v46, 0.0  ;;  %v3074_v34 = vmax.f32 %v2682_v10, 0.0  ;;  %v3041_v23 = vmax.f32 %v7670_v25, 0.0  ;;  %v2589_v46 = vadd.f32 %v7564_v0, %v7560_v62 }
 0x229   : > { %v2619_v54 = vadd.f32 %v2618_v30, %v7521_v12  ;;  %v2692_v50 = vadd.f32 %v2691_v1, %v7521_v12  ;;  %v3089_v18 = vmax.f32 %v2617_v55, 0.0  ;;  %v3091_v11 = vmax.f32 %v2690_v61, 0.0 }
 0x22a   : > { %v2620_v21 = vpop.f32.mrf.mxu1  ;;  %v2693_v32 = vpop.f32.mrf.mxu0  ;;  %4012 = vmatpush1.bf16.msra.mxu1 %v5717_v16  ;;  %v2599_v30 = vadd.f32 %v7594_v6, %v7539_v52  ;;  %v3059_v1 = vmax.f32 %v2680_v5, 0.0  ;;  %v3072_v61 = vmax.f32 %v2609_v29, 0.0  ;;  %v3043_v6 = vmax.f32 %v7676_v51, 0.0 }
 0x22b   : > { %v2621_v7 = vadd.f32 %v2620_v21, %v7521_v12  ;;  %v2694_v56 = vadd.f32 %v2693_v32, %v7521_v12  ;;  %4013 = vmatprep.subr.bf16.mxu1 %v5702_v14  ;;  %v3104_v49 = vmax.f32 %v2619_v54, 0.0  ;;  %v3106_v19 = vmax.f32 %v2692_v50, 0.0 }
 0x22c   : > { %v7690_v38 = vpop.f32.mrf.mxu1  ;;  %v7692_v2 = vpop.f32.mrf.mxu0  ;;  %v3088_v14 = vmax.f32 %v2615_v24, 0.0  ;;  %v2672_v50 = vadd.f32 %v7596_v43, %v7539_v52  ;;  %v5736_v24 = vpack.c.bf16 %v3073_v26, %v3057_v22  ;;  %v3056_v5 = vmax.f32 %v2605_v39, 0.0 }
 0x22d   : > { %v3105_v36 = vmax.f32 %v2621_v7, 0.0  ;;  %v3107_v37 = vmax.f32 %v2694_v56, 0.0  ;;  %v5738_v21 = vpack.c.bf16 %v3075_v47, %v3059_v1  ;;  %v2660_v43 = vadd.f32 %v7558_v20, %v7568_v41 }
 0x22e   : > { %v7698_v58 = vpop.f32.mrf.mxu1  ;;  %v7700_v16 = vpop.f32.mrf.mxu0  ;;  %4014 = vmatpush1.bf16.msra.mxu1 %v5701_v60  ;;  %v5751_v59 = vpack.c.bf16 %v3104_v49, %v3088_v14  ;;  %v5753_v60 = vpack.c.bf16 %v3106_v19, %v3090_v17  ;;  %v2668_v7 = vadd.f32 %v7582_v15, %v7545_v35  ;;  %v3058_v25 = vmax.f32 %v2678_v13, 0.0 }
 0x22f   : > { %v5752_v48 = vpack.c.bf16 %v3105_v36, %v3089_v18  ;;  %v5754_v55 = vpack.c.bf16 %v3107_v37, %v3091_v11  ;;  %v3025_v51 = vmax.f32 %v7662_v45, 0.0  ;;  %v3027_v56 = vmax.f32 %v7666_v8, 0.0 }
 0x230   : > { %v7704_v54 = vpop.f32.mrf.mxu1  ;;  %v7706_v4 = vpop.f32.mrf.mxu0  ;;  %v3040_v10 = vmax.f32 %v2599_v30, 0.0  ;;  %v5735_v26 = vpack.c.bf16 %v3072_v61, %v3056_v5  ;;  %v2662_v20 = vadd.f32 %v7566_v33, %v7560_v62  ;;  %v3009_v0 = vmax.f32 %v7650_v9, 0.0 }
 0x231   : > { %5463 = vmatmul.mubr.msk.bf16.vlgmr.msra.gmra.mxu1 %vm2391_vm2, %v7627_v31  ;;  %4048 = vmatprep.subr.bf16.mxu0 %v5752_v48  ;;  %v3042_v15 = vmax.f32 %v2672_v50, 0.0  ;;  %v5737_v11 = vpack.c.bf16 %v3074_v34, %v3058_v25  ;;  %v3011_v45 = vmax.f32 %v7654_v3, 0.0  ;;  %v3024_v8 = vmax.f32 %v7658_v40, 0.0 }
 0x232   : > { %4089 = vmatprep.subr.bf16.mxu1 %v5754_v55  ;;  %v7714_v32 = vpop.f32.mrf.mxu1  ;;  %v7716_v29 = vpop.f32.mrf.mxu0  ;;  %4049 = vmatpush1.bf16.msra.mxu0 %v5751_v59  ;;  %v5720_v19 = vpack.c.bf16 %v3041_v23, %v3025_v51  ;;  %v5722_v36 = vpack.c.bf16 %v3043_v6, %v3027_v56  ;;  %v2658_v13 = vadd.f32 %v7552_v53, %v7568_v41  ;;  %v2993_v47 = vmax.f32 %v7646_v63, 0.0 }
 0x233   : > { %4090 = vmatpush1.bf16.msra.mxu1 %v5753_v60  ;;  %4050 = vmatprep.subr.bf16.mxu0 %v5736_v24  ;;  %v3026_v14 = vmax.f32 %v2668_v7, 0.0  ;;  %v2995_v33 = vmax.f32 %v2660_v43, 0.0  ;;  %v3008_v9 = vmax.f32 %v2589_v46, 0.0  ;;  %v5719_v22 = vpack.c.bf16 %v3040_v10, %v3024_v8 }
 0x234   : > { %4091 = vmatprep.subr.bf16.mxu1 %v5738_v21  ;;  %v7726_v18 = vpop.f32.mrf.mxu1  ;;  %v7728_v49 = vpop.f32.mrf.mxu0  ;;  %4113 = vmatprep.mubr.bf16.mxu1 %v8443_v42  ;;  %v3010_v40 = vmax.f32 %v2662_v20, 0.0  ;;  %v5704_v48 = vpack.c.bf16 %v3009_v0, %v2993_v47  ;;  %v2992_v30 = vmax.f32 %v7642_v44, 0.0  ;;  %v2994_v53 = vmax.f32 %v2658_v13, 0.0 }
 0x235   : > { %v5721_v55 = vpack.c.bf16 %v3042_v15, %v3026_v14  ;;  %v5706_v1 = vpack.c.bf16 %v3011_v45, %v2995_v33  ;;  %v7748_v7 = vadd.f32 %v7698_v58, %v7568_v41  ;;  %v7752_v25 = vadd.f32 %v7700_v16, %v7568_v41 }
 0x236   : > { %v2742_v37 = vpop.f32.mrf.mxu1  ;;  %v2815_v39 = vpop.f32.mrf.mxu0  ;;  %4051 = vmatpush1.bf16.msra.mxu0 %v5735_v26  ;;  %v5703_v63 = vpack.c.bf16 %v3008_v9, %v2992_v30  ;;  %v5705_v24 = vpack.c.bf16 %v3010_v40, %v2994_v53  ;;  %v7756_v51 = vadd.f32 %v7714_v32, %v7560_v62  ;;  %v7760_v56 = vadd.f32 %v7716_v29, %v7560_v62 }
 0x237   : > { %4092 = vmatpush1.bf16.msra.mxu1 %v5737_v11  ;;  %4052 = vmatprep.subr.bf16.mxu0 %v5720_v19  ;;  %v7763_v20 = vadd.f32 %v2742_v37, %v7545_v35  ;;  %v7766_v58 = vadd.f32 %v2815_v39, %v7545_v35 }
 0x238   : > { %4093 = vmatprep.subr.bf16.mxu1 %v5722_v36  ;;  %v2744_v3 = vpop.f32.mrf.mxu1  ;;  %v2817_v17 = vpop.f32.mrf.mxu0 }
 0x239   : > { %v7769_v0 = vadd.f32 %v2744_v3, %v7539_v52  ;;  %v7772_v16 = vadd.f32 %v2817_v17, %v7539_v52 }
 0x23a   : > { %v2746_v61 = vpop.f32.mrf.mxu1  ;;  %v2819_v59 = vpop.f32.mrf.mxu0  ;;  %4053 = vmatpush1.bf16.msra.mxu0 %v5719_v22 }
 0x23b   : > { %4094 = vmatpush1.bf16.msra.mxu1 %v5721_v55  ;;  %4054 = vmatprep.subr.bf16.mxu0 %v5704_v48  ;;  %v7775_v32 = vadd.f32 %v2746_v61, %v7539_v52  ;;  %v7778_v29 = vadd.f32 %v2819_v59, %v7539_v52 }
 0x23c   : > { %4095 = vmatprep.subr.bf16.mxu1 %v5706_v1  ;;  %v2750_v50 = vpop.f32.mrf.mxu1  ;;  %v2823_v34 = vpop.f32.mrf.mxu0 }
 0x23e   : > { %v2752_v60 = vpop.f32.mrf.mxu1  ;;  %v2825_v23 = vpop.f32.mrf.mxu0  ;;  %4055 = vmatpush1.bf16.msra.mxu0 %v5703_v63 }
 0x23f   : > { %4096 = vmatpush1.bf16.msra.mxu1 %v5705_v24  ;;  %v2753_v13 = vadd.f32 %v2752_v60, %v7535_v28  ;;  %v2826_v47 = vadd.f32 %v2825_v23, %v7535_v28 }
 0x240   : > { %v2754_v6 = vpop.f32.mrf.mxu1  ;;  %v2827_v5 = vpop.f32.mrf.mxu0 }
 0x241   : > { %5464 = vmatmul.mubr.msk.bf16.vlgmr.msra.gmra.mxu0 %vm2391_vm2, %v7627_v31  ;;  %v2755_v3 = vadd.f32 %v2754_v6, %v7531_v57  ;;  %v2828_v17 = vadd.f32 %v2827_v5, %v7531_v57  ;;  %v2751_v6 = vadd.f32 %v2750_v50, %v7535_v28  ;;  %v2824_v5 = vadd.f32 %v2823_v34, %v7535_v28 }
 0x242   : > { %5465 = vmatmul.mubr.msk.bf16.vlgmr.msra.gmra.mxu1 %vm2391_vm2, %v7627_v31  ;;  %v2756_v44 = vpop.f32.mrf.mxu1  ;;  %v2829_v21 = vpop.f32.mrf.mxu0  ;;  %4154 = vmatprep.mubr.bf16.mxu0 %v8443_v42  ;;  %v2741_v50 = vadd.f32 %v7726_v18, %v7545_v35  ;;  %v3045_v34 = vmax.f32 %v7775_v32, 0.0  ;;  %v2735_v18 = vadd.f32 %v7704_v54, %v7560_v62  ;;  %v2808_v32 = vadd.f32 %v7706_v4, %v7560_v62 }
 0x243   : > { %4195 = vmatprep.mubr.bf16.mxu1 %v8443_v42  ;;  %v2757_v15 = vadd.f32 %v2756_v44, %v7531_v57  ;;  %v2830_v11 = vadd.f32 %v2829_v21, %v7531_v57  ;;  %v2731_v54 = vadd.f32 %v7690_v38, %v7568_v41  ;;  %v3013_v4 = vmax.f32 %v7756_v51, 0.0 }
 0x244   : > { %v2760_v43 = vpop.f32.mrf.mxu1  ;;  %v2833_v46 = vpop.f32.mrf.mxu0  ;;  %v3012_v38 = vmax.f32 %v2735_v18, 0.0  ;;  %v3014_v51 = vmax.f32 %v2808_v32, 0.0 }
 0x245   : > { %v2761_v14 = vadd.f32 %v2760_v43, %v7525_v27  ;;  %v2834_v33 = vadd.f32 %v2833_v46, %v7525_v27  ;;  %v3077_v55 = vmax.f32 %v2757_v15, 0.0  ;;  %v3079_v30 = vmax.f32 %v2830_v11, 0.0 }
 0x246   : > { %v2762_v10 = vpop.f32.mrf.mxu1  ;;  %v2835_v26 = vpop.f32.mrf.mxu0 }
 0x247   : > { %v2763_v19 = vadd.f32 %v2762_v10, %v7525_v27  ;;  %v2836_v36 = vadd.f32 %v2835_v26, %v7525_v27  ;;  %v3092_v44 = vmax.f32 %v2761_v14, 0.0  ;;  %v3094_v21 = vmax.f32 %v2834_v33, 0.0 }
 0x248   : > { %v2764_v45 = vpop.f32.mrf.mxu1  ;;  %v2837_v8 = vpop.f32.mrf.mxu0  ;;  %v3061_v10 = vmax.f32 %v2753_v13, 0.0  ;;  %v3063_v26 = vmax.f32 %v2826_v47, 0.0  ;;  %v2814_v13 = vadd.f32 %v7728_v49, %v7545_v35  ;;  %v3047_v47 = vmax.f32 %v7778_v29, 0.0 }
 0x249   : > { %v2765_v37 = vadd.f32 %v2764_v45, %v7521_v12  ;;  %v2838_v39 = vadd.f32 %v2837_v8, %v7521_v12  ;;  %v3093_v63 = vmax.f32 %v2763_v19, 0.0  ;;  %v3095_v24 = vmax.f32 %v2836_v36, 0.0 }
 0x24a   : > { %v2766_v9 = vpop.f32.mrf.mxu1  ;;  %v2839_v22 = vpop.f32.mrf.mxu0  ;;  %v3076_v45 = vmax.f32 %v2755_v3, 0.0  ;;  %v3078_v8 = vmax.f32 %v2828_v17, 0.0  ;;  %v5740_v14 = vpack.c.bf16 %v3077_v55, %v3061_v10  ;;  %v5742_v33 = vpack.c.bf16 %v3079_v30, %v3063_v26 }
 0x24b   : > { %v2767_v40 = vadd.f32 %v2766_v9, %v7521_v12  ;;  %v2840_v48 = vadd.f32 %v2839_v22, %v7521_v12  ;;  %v3108_v1 = vmax.f32 %v2765_v37, 0.0  ;;  %v3110_v61 = vmax.f32 %v2838_v39, 0.0 }
 0x24c   : > { %v7794_v59 = vpop.f32.mrf.mxu1  ;;  %v7796_v53 = vpop.f32.mrf.mxu0  ;;  %v3060_v9 = vmax.f32 %v2751_v6, 0.0  ;;  %v3062_v22 = vmax.f32 %v2824_v5, 0.0  ;;  %v3031_v49 = vmax.f32 %v7766_v58, 0.0  ;;  %v3044_v29 = vmax.f32 %v7769_v0, 0.0 }
 0x24d   : > { %v3109_v60 = vmax.f32 %v2767_v40, 0.0  ;;  %v3111_v23 = vmax.f32 %v2840_v48, 0.0  ;;  %v5755_v19 = vpack.c.bf16 %v3108_v1, %v3092_v44  ;;  %v5757_v36 = vpack.c.bf16 %v3110_v61, %v3094_v21 }
 0x24e   : > { %v7800_v43 = vpop.f32.mrf.mxu1  ;;  %v7802_v46 = vpop.f32.mrf.mxu0  ;;  %v3029_v40 = vmax.f32 %v7763_v20, 0.0  ;;  %v3046_v48 = vmax.f32 %v7772_v16, 0.0  ;;  %v5739_v55 = vpack.c.bf16 %v3076_v45, %v3060_v9  ;;  %v5741_v30 = vpack.c.bf16 %v3078_v8, %v3062_v22 }
 0x24f   : > { %v5756_v15 = vpack.c.bf16 %v3109_v60, %v3093_v63  ;;  %v5758_v11 = vpack.c.bf16 %v3111_v23, %v3095_v24  ;;  %v3015_v20 = vmax.f32 %v7760_v56, 0.0  ;;  %v2804_v63 = vadd.f32 %v7692_v2, %v7568_v41 }
 0x250   : > { %v7804_v37 = vpop.f32.mrf.mxu1  ;;  %v7806_v39 = vpop.f32.mrf.mxu0  ;;  %v5724_v58 = vpack.c.bf16 %v3045_v34, %v3029_v40  ;;  %v3028_v0 = vmax.f32 %v2741_v50, 0.0  ;;  %v3030_v24 = vmax.f32 %v2814_v13, 0.0  ;;  %v5726_v16 = vpack.c.bf16 %v3047_v47, %v3031_v49 }
 0x251   : > { %4130 = vmatprep.subr.bf16.mxu0 %v5756_v15  ;;  %4171 = vmatprep.subr.bf16.mxu1 %v5758_v11  ;;  %v2997_v6 = vmax.f32 %v7748_v7, 0.0  ;;  %v2999_v5 = vmax.f32 %v7752_v25, 0.0  ;;  %v2996_v15 = vmax.f32 %v2731_v54, 0.0  ;;  %v2998_v11 = vmax.f32 %v2804_v63, 0.0 }
 0x252   : > { %v7814_v3 = vpop.f32.mrf.mxu1  ;;  %v7816_v17 = vpop.f32.mrf.mxu0  ;;  %4131 = vmatpush1.bf16.msra.mxu0 %v5755_v19  ;;  %4172 = vmatpush1.bf16.msra.mxu1 %v5757_v36  ;;  %v5723_v44 = vpack.c.bf16 %v3044_v29, %v3028_v0  ;;  %v5725_v56 = vpack.c.bf16 %v3046_v48, %v3030_v24  ;;  %v7846_v18 = vadd.f32 %v7800_v43, %v7568_v41 }
 0x253   : > { %4132 = vmatprep.subr.bf16.mxu0 %v5740_v14  ;;  %4173 = vmatprep.subr.bf16.mxu1 %v5742_v33  ;;  %v5708_v2 = vpack.c.bf16 %v3013_v4, %v2997_v6  ;;  %v5710_v26 = vpack.c.bf16 %v3015_v20, %v2999_v5  ;;  %v5707_v7 = vpack.c.bf16 %v3012_v38, %v2996_v15 }
 0x254   : > { %v7826_v1 = vpop.f32.mrf.mxu1  ;;  %v7828_v61 = vpop.f32.mrf.mxu0  ;;  %v5709_v25 = vpack.c.bf16 %v3014_v51, %v2998_v11  ;;  %v7850_v32 = vadd.f32 %v7802_v46, %v7568_v41  ;;  %v7854_v40 = vadd.f32 %v7814_v3, %v7560_v62  ;;  %v7858_v49 = vadd.f32 %v7816_v17, %v7560_v62 }
 0x256   : > { %v2888_v60 = vpop.f32.mrf.mxu1  ;;  %v2961_v23 = vpop.f32.mrf.mxu0  ;;  %4133 = vmatpush1.bf16.msra.mxu0 %v5739_v55  ;;  %4174 = vmatpush1.bf16.msra.mxu1 %v5741_v30 }
 0x257   : > { %4134 = vmatprep.subr.bf16.mxu0 %v5724_v58  ;;  %4175 = vmatprep.subr.bf16.mxu1 %v5726_v16  ;;  %v7861_v48 = vadd.f32 %v2888_v60, %v7545_v35  ;;  %v7864_v43 = vadd.f32 %v2961_v23, %v7545_v35 }
 0x258   : > { %v2890_v21 = vpop.f32.mrf.mxu1  ;;  %v2963_v10 = vpop.f32.mrf.mxu0 }
 0x259   : > { %v7867_v55 = vadd.f32 %v2890_v21, %v7539_v52  ;;  %v7870_v46 = vadd.f32 %v2963_v10, %v7539_v52 }
 0x25a   : > { %v2892_v45 = vpop.f32.mrf.mxu1  ;;  %v2965_v8 = vpop.f32.mrf.mxu0  ;;  %4135 = vmatpush1.bf16.msra.mxu0 %v5723_v44  ;;  %4176 = vmatpush1.bf16.msra.mxu1 %v5725_v56 }
 0x25b   : > { %4136 = vmatprep.subr.bf16.mxu0 %v5708_v2  ;;  %4177 = vmatprep.subr.bf16.mxu1 %v5710_v26  ;;  %v7873_v3 = vadd.f32 %v2892_v45, %v7539_v52  ;;  %v7876_v17 = vadd.f32 %v2965_v8, %v7539_v52 }
 0x25c   : > { %v2896_v19 = vpop.f32.mrf.mxu1  ;;  %v2969_v36 = vpop.f32.mrf.mxu0 }
 0x25e   : > { %v2898_v50 = vpop.f32.mrf.mxu1  ;;  %v2971_v34 = vpop.f32.mrf.mxu0  ;;  %4137 = vmatpush1.bf16.msra.mxu0 %v5707_v7  ;;  %4178 = vmatpush1.bf16.msra.mxu1 %v5709_v25  ;;  %v2970_v7 = vadd.f32 %v2969_v36, %v7535_v28 }
 0x25f   : > { %v2899_v16 = vadd.f32 %v2898_v50, %v7535_v28  ;;  %v2972_v60 = vadd.f32 %v2971_v34, %v7535_v28 }
 0x260   : > { %v2900_v14 = vpop.f32.mrf.mxu1  ;;  %v2973_v33 = vpop.f32.mrf.mxu0 }
 0x261   : > { %5466 = vmatmul.mubr.msk.bf16.vlgmr.msra.gmra.mxu0 %vm2391_vm2, %v7627_v31  ;;  %5467 = vmatmul.mubr.msk.bf16.vlgmr.msra.gmra.mxu1 %vm2391_vm2, %v7627_v31  ;;  %v2901_v38 = vadd.f32 %v2900_v14, %v7531_v57  ;;  %v2974_v51 = vadd.f32 %v2973_v33, %v7531_v57  ;;  %v3065_v34 = vmax.f32 %v2899_v16, 0.0 }
 0x262   : > { %v2902_v13 = vpop.f32.mrf.mxu1  ;;  %v2975_v47 = vpop.f32.mrf.mxu0  ;;  %4236 = vmatprep.mubr.bf16.mxu0 %v8443_v42  ;;  %4277 = vmatprep.mubr.bf16.mxu1 %v8443_v42 }
 0x263   : > { %v2903_v30 = vadd.f32 %v2902_v13, %v7531_v57  ;;  %v2976_v54 = vadd.f32 %v2975_v47, %v7531_v57  ;;  %v3067_v57 = vmax.f32 %v2972_v60, 0.0  ;;  %v3080_v13 = vmax.f32 %v2901_v38, 0.0 }
 0x264   : > { %v2906_v9 = vpop.f32.mrf.mxu1  ;;  %v2979_v22 = vpop.f32.mrf.mxu0 }
 0x265   : > { %v2907_v52 = vadd.f32 %v2906_v9, %v7525_v27  ;;  %v2980_v23 = vadd.f32 %v2979_v22, %v7525_v27  ;;  %v3081_v21 = vmax.f32 %v2903_v30, 0.0  ;;  %v3083_v10 = vmax.f32 %v2976_v54, 0.0 }
 0x266   : > { %v2908_v29 = vpop.f32.mrf.mxu1  ;;  %v2981_v42 = vpop.f32.mrf.mxu0  ;;  %v3049_v22 = vmax.f32 %v7873_v3, 0.0  ;;  %v3066_v54 = vmax.f32 %v2970_v7, 0.0  ;;  %v2954_v3 = vadd.f32 %v7806_v39, %v7560_v62  ;;  %v2950_v39 = vadd.f32 %v7796_v53, %v7568_v41 }
 0x267   : > { %v2909_v58 = vadd.f32 %v2908_v29, %v7525_v27  ;;  %v2982_v63 = vadd.f32 %v2981_v42, %v7525_v27  ;;  %v2897_v27 = vadd.f32 %v2896_v19, %v7535_v28  ;;  %v3096_v25 = vmax.f32 %v2907_v52, 0.0 }
 0x268   : > { %v2910_v4 = vpop.f32.mrf.mxu1  ;;  %v2983_v20 = vpop.f32.mrf.mxu0  ;;  %v3098_v50 = vmax.f32 %v2980_v23, 0.0  ;;  %v3051_v29 = vmax.f32 %v7876_v17, 0.0  ;;  %v5744_v42 = vpack.c.bf16 %v3081_v21, %v3065_v34  ;;  %v5746_v30 = vpack.c.bf16 %v3083_v10, %v3067_v57 }
 0x269   : > { %v2911_v0 = vadd.f32 %v2910_v4, %v7521_v12  ;;  %v2984_v24 = vadd.f32 %v2983_v20, %v7521_v12  ;;  %v3097_v15 = vmax.f32 %v2909_v58, 0.0  ;;  %v3099_v11 = vmax.f32 %v2982_v63, 0.0  ;;  %v7930_v34 = vpop.permute.xlu0 %3632 }
 0x26a   : > { %v2912_v6 = vpop.f32.mrf.mxu1  ;;  %v2985_v5 = vpop.f32.mrf.mxu0  ;;  %v2887_v28 = vadd.f32 %v7826_v1, %v7545_v35  ;;  %v2960_v19 = vadd.f32 %v7828_v61, %v7545_v35  ;;  %v3064_v36 = vmax.f32 %v2897_v27, 0.0  ;;  %v2881_v4 = vadd.f32 %v7804_v37, %v7560_v62 }
 0x26b   : > { %v2913_v44 = vadd.f32 %v2912_v6, %v7521_v12  ;;  %v2986_v56 = vadd.f32 %v2985_v5, %v7521_v12  ;;  %v3112_v2 = vmax.f32 %v2911_v0, 0.0  ;;  %v3114_v26 = vmax.f32 %v2984_v24, 0.0  ;;  %v7926_v5 = vld [vmem:[%s6225_s14 + $0x8] sm:$0xff] }
 0x26c   : > { %v3082_v12 = vmax.f32 %v2974_v51, 0.0  ;;  %v3033_v17 = vmax.f32 %v7861_v48, 0.0  ;;  %v3035_v20 = vmax.f32 %v7864_v43, 0.0  ;;  %v3048_v1 = vmax.f32 %v7867_v55, 0.0 }
 0x26d   : > { %v3113_v45 = vmax.f32 %v2913_v44, 0.0  ;;  %v3115_v8 = vmax.f32 %v2986_v56, 0.0  ;;  %v5759_v47 = vpack.c.bf16 %v3112_v2, %v3096_v25  ;;  %v5761_v9 = vpack.c.bf16 %v3114_v26, %v3098_v50 }
 0x26e   : > { %v3050_v35 = vmax.f32 %v7870_v46, 0.0  ;;  %v5743_v61 = vpack.c.bf16 %v3080_v13, %v3064_v36  ;;  %v5745_v58 = vpack.c.bf16 %v3082_v12, %v3066_v54  ;;  %v3017_v63 = vmax.f32 %v7854_v40, 0.0 }
 0x26f   : > { %v5760_v14 = vpack.c.bf16 %v3113_v45, %v3097_v15  ;;  %v5762_v33 = vpack.c.bf16 %v3115_v8, %v3099_v11  ;;  %v3019_v0 = vmax.f32 %v7858_v49, 0.0  ;;  %v5728_v37 = vpack.c.bf16 %v3049_v22, %v3033_v17 }
 0x270   : > { %v5730_v24 = vpack.c.bf16 %v3051_v29, %v3035_v20  ;;  %v2877_v62 = vadd.f32 %v7794_v59, %v7568_v41  ;;  %v3032_v48 = vmax.f32 %v2887_v28, 0.0  ;;  %v3034_v43 = vmax.f32 %v2960_v19, 0.0 }
 0x271   : > { %4212 = vmatprep.subr.bf16.mxu0 %v5760_v14  ;;  %4253 = vmatprep.subr.bf16.mxu1 %v5762_v33  ;;  %v3001_v55 = vmax.f32 %v7846_v18, 0.0  ;;  %v3003_v46 = vmax.f32 %v7850_v32, 0.0  ;;  %v3016_v40 = vmax.f32 %v2881_v4, 0.0  ;;  %v3018_v49 = vmax.f32 %v2954_v3, 0.0  ;;  %v7921_v32 = vld [vmem:[%s6225_s14] sm:$0xff] }
 0x272   : > { %4213 = vmatpush1.bf16.msra.mxu0 %v5759_v47  ;;  %4254 = vmatpush1.bf16.msra.mxu1 %v5761_v9  ;;  %v5727_v16 = vpack.c.bf16 %v3048_v1, %v3032_v48  ;;  %v5729_v60 = vpack.c.bf16 %v3050_v35, %v3034_v43  ;;  %v3000_v23 = vmax.f32 %v2877_v62, 0.0  ;;  %v3002_v41 = vmax.f32 %v2950_v39, 0.0 }
 0x273   : > { %4214 = vmatprep.subr.bf16.mxu0 %v5744_v42  ;;  %4255 = vmatprep.subr.bf16.mxu1 %v5746_v30  ;;  %v5712_v52 = vpack.c.bf16 %v3017_v63, %v3001_v55  ;;  %v5714_v59 = vpack.c.bf16 %v3019_v0, %v3003_v46  ;;  %v483_v6 = vmul.f32 %v7921_v32, %v7921_v32  ;;  %v5941_v63 = vmov 1966171168  }
 0x274   : > { %v5711_v53 = vpack.c.bf16 %v3016_v40, %v3000_v23  ;;  %v5713_v18 = vpack.c.bf16 %v3018_v49, %v3002_v41  ;;  %v484_v38 = vmul.f32 %v7926_v5, %v7926_v5  ;;  %v4334_v0 = vunpack.c.l.s4 %v5941_v63 }
 0x275   : > { %v487_v51 = vrot.slane %v483_v6, 1  ;;  %v493_v21 = vrot.slane %v483_v6, 2 }
 0x276   : > { %4215 = vmatpush1.bf16.msra.mxu0 %v5743_v61  ;;  %4256 = vmatpush1.bf16.msra.mxu1 %v5745_v58  ;;  %v488_v44 = vrot.slane %v484_v38, 1  ;;  %v494_v2 = vrot.slane %v484_v38, 2 }
 0x277   : > { %4216 = vmatprep.subr.bf16.mxu0 %v5728_v37  ;;  %4257 = vmatprep.subr.bf16.mxu1 %v5730_v24  ;;  %v491_v56 = vadd.f32 %v487_v51, %v483_v6 }
 0x278   : > { %v492_v10 = vadd.f32 %v488_v44, %v484_v38  ;;  %v8506_v44 = vld [vmem:[#allocation9_spill] sm:$0xff] }
 0x279   : > { %v497_v26 = vadd.f32 %v493_v21, %v491_v56 }
 0x27a   : > { %4217 = vmatpush1.bf16.msra.mxu0 %v5727_v16  ;;  %4258 = vmatpush1.bf16.msra.mxu1 %v5729_v60  ;;  %v498_v15 = vadd.f32 %v494_v2, %v492_v10 }
 0x27b   : > { %4218 = vmatprep.subr.bf16.mxu0 %v5712_v52  ;;  %4259 = vmatprep.subr.bf16.mxu1 %v5714_v59  ;;  %5805 = vrsqrt.f32 %v497_v26  ;;  %vm501_vm3 = vcmp.eq.f32.partialorder %v497_v26, inf  ;;  %v504_v27 = vand.u32 2147483648, %v497_v26  ;;  %vm503_vm5 = vcmp.eq.f32.partialorder %v497_v26, 0.0 }
 0x27c   : > { %5807 = vrsqrt.f32 %v498_v15  ;;  %vm508_vm4 = vcmp.eq.f32.partialorder %v498_v15, inf  ;;  %v511_v25 = vand.u32 2147483648, %v498_v15  ;;  %vm510_vm6 = vcmp.eq.f32.partialorder %v498_v15, 0.0 }
 0x27d   : > { %v4335_v52 = vunpack.c.0.s8 %v4334_v0 }
 0x27e   : > { %4219 = vmatpush1.bf16.msra.mxu0 %v5711_v53  ;;  %4260 = vmatpush1.bf16.msra.mxu1 %v5713_v18 }
 0x27f   : > { %v7955_v56 = vsub.s32 %v4335_v52, %v8506_v44 }
 0x281   : > { %5468 = vmatmul.mubr.msk.bf16.vlgmr.msra.gmra.mxu0 %vm2391_vm2, %v7627_v31  ;;  %5469 = vmatmul.mubr.msk.bf16.vlgmr.msra.gmra.mxu1 %vm2391_vm2, %v7627_v31 }
 0x288   : > { %v5806_v31 = vpop.eup %5805 }
 0x289   : > { %v5808_v11 = vpop.eup %5807  ;;  %v500_v45 = vmul.f32 %v5806_v31, %v497_v26 }
 0x28a   : > { %v507_v8 = vmul.f32 %v5808_v11, %v498_v15 }
 0x28b   : > { %v502_v7 = vsel %vm501_vm3, %v497_v26, %v500_v45 }
 0x28c   : > { %v509_v50 = vsel %vm508_vm4, %v498_v15, %v507_v8  ;;  %v7932_v57 = vsel %vm503_vm5, %v504_v27, %v502_v7  ;;  %v8507_v15 = vld [vmem:[#allocation10_spill] sm:$0xff] }
 0x28d   : > { %v7935_v13 = vsel %vm510_vm6, %v511_v25, %v509_v50  ;;  %v7938_v22 = vmul.f32 0.5714286, %v7932_v57 }
 0x28e   : > { %v7942_v42 = vmul.f32 0.5714286, %v7935_v13 }
 0x2e1   : > { %v3992_v14 = vpop.f32.mrf.mxu1 }
 0x2e2   : > { %v3993_v33 = vadd.f32 %v3992_v14, %v7930_v34 }
 0x2e3   : > { %v3994_v12 = vpop.f32.mrf.mxu1 }
 0x2e4   : > { %v5470_v47 = vmul.f32 -1.442695, %v3993_v33  ;;  %v4316_v9 = vmax.f32 %v3993_v33, 0.0  ;;  %v3995_v29 = vadd.f32 %v3994_v12, %v7930_v34 }
 0x2e5   : > { %v3996_v30 = vpop.f32.mrf.mxu1 }
 0x2e6   : > { %5809 = vpow2.f32 %v5470_v47  ;;  %v4318_v28 = vsub.f32 0.0, %v4316_v9  ;;  %v5471_v19 = vmul.f32 -1.442695, %v3995_v29  ;;  %v4317_v36 = vmax.f32 %v3995_v29, 0.0 }
 0x2e7   : > { %v3997_v54 = vpop.f32.mrf.mxu1 }
 0x2e8   : > { %v4322_v4 = vmul.f32 %v7938_v22, %v4318_v28  ;;  %5811 = vpow2.f32 %v5471_v19  ;;  %v4319_v3 = vsub.f32 0.0, %v4317_v36 }
 0x2ea   : > { %v4324_v17 = vmul.f32 1.442695, %v4322_v4  ;;  %v4323_v20 = vmul.f32 %v7942_v42, %v4319_v3 }
 0x2ec   : > { %5813 = vpow2.f32 %v4324_v17  ;;  %v4326_v1 = vmul.f32 1.442695, %v4323_v20 }
 0x2ee   : > { %5815 = vpow2.f32 %v4326_v1 }
 0x2f1   : > { %v4033_v35 = vpop.f32.mrf.mxu1 }
 0x2f2   : > { %v4034_v61 = vadd.f32 %v4033_v35, %v7930_v34 }
 0x2f3   : > { %v5810_v58 = vpop.eup %5809  ;;  %v4035_v37 = vpop.f32.mrf.mxu1 }
 0x2f4   : > { %v4310_v24 = vadd.f32 1.0, %v5810_v58  ;;  %v5473_v62 = vmul.f32 -1.442695, %v4034_v61  ;;  %v4393_v39 = vmax.f32 %v4034_v61, 0.0  ;;  %v4036_v48 = vadd.f32 %v4035_v37, %v7930_v34 }
 0x2f5   : > { %v5812_v43 = vpop.eup %5811  ;;  %v4037_v55 = vpop.f32.mrf.mxu1 }
 0x2f6   : > { %5817 = vrcp.f32 %v4310_v24  ;;  %v4311_v46 = vadd.f32 1.0, %v5812_v43  ;;  %v4395_v40 = vsub.f32 0.0, %v4393_v39  ;;  %v5474_v49 = vmul.f32 -1.442695, %v4036_v48 }
 0x2f7   : > { %5819 = vpow2.f32 %v5473_v62  ;;  %v4394_v16 = vmax.f32 %v4036_v48, 0.0  ;;  %v4038_v60 = vpop.f32.mrf.mxu1 }
 0x2f8   : > { %5821 = vrcp.f32 %v4311_v46  ;;  %v4397_v59 = vmul.f32 %v4395_v40, %v7938_v22 }
 0x2f9   : > { %v5814_v23 = vpop.eup %5813  ;;  %5823 = vpow2.f32 %v5474_v49  ;;  %v4396_v41 = vsub.f32 0.0, %v4394_v16 }
 0x2fa   : > { %v4399_v53 = vmul.f32 1.442695, %v4397_v59  ;;  %v7950_v38 = vsub.f32 1.0, %v5814_v23 }
 0x2fb   : > { %v5816_v18 = vpop.eup %5815  ;;  %v4398_v6 = vmul.f32 %v4396_v41, %v7942_v42 }
 0x2fc   : > { %v7952_v51 = vsub.f32 1.0, %v5816_v18  ;;  %5825 = vpow2.f32 %v4399_v53  ;;  %v4360_v31 = vrot.slane %v7950_v38, %v8507_v15  ;;  %v4375_v17 = vsub.f32 1.0, %v7950_v38 }
 0x2fd   : > { %v4401_v21 = vmul.f32 1.442695, %v4398_v6 }
 0x2fe   : > { %v4332_v10 = vcombine.low %v7950_v38, %v7952_v51  ;;  %v4364_v12 = vrot.slane %v7952_v51, %v8507_v15  ;;  %v4376_v48 = vsub.f32 1.0, %v7952_v51  ;;  %v4377_v16 = vadd.f32 1e-10, %v4375_v17 }
 0x2ff   : > { %5827 = vpow2.f32 %v4401_v21 }
 0x300   : > { %v4339_v2 = vrot.slane %v4332_v10, %v7955_v56  ;;  %v4378_v6 = vadd.f32 1e-10, %v4376_v48  ;;  %v4369_v10 = vmul.f32 2.0, %v7950_v38 }
 0x301   : > { %v4074_v26 = vpop.f32.mrf.mxu0 }
 0x302   : > { %v4340_v11 = vcombine.high %v4339_v2, %v4339_v2  ;;  %v7963_v45 = vadd.f32 %v4074_v26, %v7930_v34  ;;  %v4115_v8 = vpop.f32.mrf.mxu1 }
 0x303   : > { %v5818_v27 = vpop.eup %5817  ;;  %v7966_v7 = vadd.f32 %v4115_v8, %v7930_v34  ;;  %v4076_v25 = vpop.f32.mrf.mxu0  ;;  %v4370_v8 = vmul.f32 2.0, %v7952_v51 }
 0x304   : > { %v5820_v50 = vpop.eup %5819  ;;  %v7968_v14 = vmul.f32 %v5818_v27, %v4360_v31  ;;  %v4347_v33 = vrot.slane %v4340_v11, %v7955_v56  ;;  %v4468_v47 = vmax.f32 %v7963_v45, 0.0  ;;  %v4117_v9 = vpop.f32.mrf.mxu1  ;;  %v4077_v19 = vadd.f32 %v4076_v25, %v7930_v34 }
 0x305   : > { %v5822_v29 = vpop.eup %5821  ;;  %v4387_v30 = vadd.f32 1.0, %v5820_v50  ;;  %v4543_v28 = vmax.f32 %v7966_v7, 0.0  ;;  %v4078_v36 = vpop.f32.mrf.mxu0  ;;  %v4118_v62 = vadd.f32 %v4117_v9, %v7930_v34 }
 0x306   : > { %v5824_v54 = vpop.eup %5823  ;;  %v4348_v4 = vcombine.high %v4347_v33, %v4347_v33  ;;  %v7976_v3 = vmul.f32 %v5822_v29, %v4364_v12  ;;  %v4470_v20 = vsub.f32 0.0, %v4468_v47  ;;  %v4119_v1 = vpop.f32.mrf.mxu1  ;;  %v5477_v58 = vmul.f32 -1.442695, %v4077_v19 }
 0x307   : > { %5829 = vrcp.f32 %v4387_v30  ;;  %v4388_v35 = vadd.f32 1.0, %v5824_v54  ;;  %v4545_v61 = vsub.f32 0.0, %v4543_v28  ;;  %v4079_v63 = vpop.f32.mrf.mxu0  ;;  %v4469_v24 = vmax.f32 %v4077_v19, 0.0 }
 0x308   : > { %5472 = vst.msk [vmem:[%s6083_s28 + $0x10] ss:$8 sm:$0x3] %vm6075_vm0, %v4348_v4  ;;  %v4472_v37 = vmul.f32 %v4470_v20, %v7938_v22  ;;  %v4120_v39 = vpop.f32.mrf.mxu1  ;;  %v5480_v49 = vmul.f32 -1.442695, %v4118_v62  ;;  %v4544_v59 = vmax.f32 %v4118_v62, 0.0 }
 0x309   : > { %5831 = vrcp.f32 %v4388_v35  ;;  %v4547_v43 = vmul.f32 %v4545_v61, %v7938_v22  ;;  %v5826_v55 = vpop.eup %5825  ;;  %v4471_v40 = vsub.f32 0.0, %v4469_v24 }
 0x30a   : > { %v4474_v46 = vmul.f32 1.442695, %v4472_v37  ;;  %5833 = vpow2.f32 %v5477_v58  ;;  %v4403_v60 = vsub.f32 1.0, %v5826_v55  ;;  %v4546_v21 = vsub.f32 0.0, %v4544_v59 }
 0x30b   : > { %v4549_v52 = vmul.f32 1.442695, %v4547_v43  ;;  %v4473_v41 = vmul.f32 %v4471_v40, %v7942_v42 }
 0x30c   : > { %v5828_v23 = vpop.eup %5827  ;;  %5835 = vpow2.f32 %v4474_v46  ;;  %v4405_v53 = vmul.f32 %v4403_v60, %v4377_v16  ;;  %v4548_v11 = vmul.f32 %v4546_v21, %v7942_v42  ;;  %v4448_v25 = vsub.f32 1.0, %v4403_v60 }
 0x30d   : > { %v4404_v18 = vsub.f32 1.0, %v5828_v23  ;;  %v4476_v44 = vmul.f32 1.442695, %v4473_v41  ;;  %5837 = vpow2.f32 %v5480_v49 }
 0x30e   : > { %v4442_v2 = vmul.f32 2.5714285, %v4405_v53  ;;  %v4446_v26 = vadd.f32 %v4405_v53, %v7950_v38  ;;  %5839 = vpow2.f32 %v4549_v52  ;;  %v4433_v47 = vrot.slane %v4405_v53, %v8507_v15 }
 0x30f   : > { %v4406_v31 = vmul.f32 %v4404_v18, %v4378_v6  ;;  %5841 = vpow2.f32 %v4476_v44  ;;  %v4551_v9 = vmul.f32 1.442695, %v4548_v11  ;;  %v4450_v54 = vadd.f32 1e-10, %v4448_v25 }
 0x310   : > { %v4444_v27 = vadd.f32 %v4442_v2, %v4369_v10 }
 0x311   : > { %v4409_v50 = vcombine.low %v4405_v53, %v4406_v31  ;;  %v4443_v33 = vmul.f32 2.5714285, %v4406_v31  ;;  %v4447_v12 = vadd.f32 %v4406_v31, %v7952_v51  ;;  %v4437_v19 = vrot.slane %v4406_v31, %v8507_v15 }
 0x312   : > { %v4449_v51 = vsub.f32 1.0, %v4404_v18  ;;  %5843 = vpow2.f32 %v4551_v9  ;;  %v4452_v24 = vmul.f32 %v4450_v54, %v4377_v16 }
 0x313   : > { %v4416_v30 = vrot.slane %v4409_v50, %v7955_v56  ;;  %v4445_v38 = vadd.f32 %v4443_v33, %v4370_v8 }
 0x314   : > { %v5830_v29 = vpop.eup %5829  ;;  %v4451_v48 = vadd.f32 1e-10, %v4449_v51 }
 0x315   : > { %v4438_v28 = vmul.f32 %v5830_v29, %v4433_v47  ;;  %v4417_v4 = vcombine.high %v4416_v30, %v4416_v30 }
 0x316   : > { %v5832_v36 = vpop.eup %5831  ;;  %v4453_v16 = vmul.f32 %v4451_v48, %v4378_v6 }
 0x317   : > { %v5834_v17 = vpop.eup %5833  ;;  %v7996_v20 = vadd.f32 %v4438_v28, %v7968_v14  ;;  %v4439_v1 = vmul.f32 %v5832_v36, %v4437_v19  ;;  %v4424_v35 = vrot.slane %v4417_v4, %v7955_v56 }
 0x318   : > { %v4463_v61 = vadd.f32 1.0, %v5834_v17 }
 0x319   : > { %v5836_v58 = vpop.eup %5835  ;;  %v4441_v63 = vadd.f32 %v4439_v1, %v7976_v3  ;;  %v4425_v37 = vcombine.high %v4424_v35, %v4424_v35 }
 0x31a   : > { %v4478_v62 = vsub.f32 1.0, %v5836_v58  ;;  %5845 = vrcp.f32 %v4463_v61  ;;  %v5838_v39 = vpop.eup %5837  ;;  %v5476_v58 = vmul.f32 -1.442695, %v7963_v45 }
 0x31b   : > { %v8000_v43 = vpop.eup %5839  ;;  %5475 = vst.msk [vmem:[%s6083_s28 + $0x11] ss:$8 sm:$0x3] %vm6075_vm0, %v4425_v37  ;;  %v4538_v46 = vadd.f32 1.0, %v5838_v39 }
 0x31c   : > { %v8005_v14 = vmul.f32 %v4478_v62, %v4452_v24  ;;  %v4523_v55 = vsub.f32 1.0, %v4478_v62  ;;  %v5842_v40 = vpop.eup %5841  ;;  %v4553_v41 = vsub.f32 1.0, %v8000_v43 }
 0x31d   : > { %v4479_v52 = vsub.f32 1.0, %v5842_v40  ;;  %5847 = vrcp.f32 %v4538_v46 }
 0x31e   : > { %v4517_v49 = vmul.f32 3.142857, %v8005_v14  ;;  %v4521_v3 = vadd.f32 %v8005_v14, %v4446_v26  ;;  %v4525_v60 = vadd.f32 1e-10, %v4523_v55  ;;  %5849 = vpow2.f32 %v5476_v58 }
 0x31f   : > { %v4481_v53 = vmul.f32 %v4479_v52, %v4453_v16  ;;  %v4524_v18 = vsub.f32 1.0, %v4479_v52 }
 0x320   : > { %v8009_v59 = vadd.f32 %v4517_v49, %v4444_v27  ;;  %v8011_v23 = vmul.f32 %v4525_v60, %v4452_v24  ;;  %v8021_v27 = vpop.eup %5843 }
 0x321   : > { %v4156_v44 = vpop.f32.mrf.mxu0  ;;  %v4197_v21 = vpop.f32.mrf.mxu1  ;;  %v4484_v2 = vcombine.low %v8005_v14, %v4481_v53  ;;  %v4518_v6 = vmul.f32 3.142857, %v4481_v53  ;;  %v4522_v26 = vadd.f32 %v4481_v53, %v4447_v12  ;;  %v4526_v47 = vadd.f32 1e-10, %v4524_v18 }
 0x322   : > { %v8017_v10 = vmul.f32 %v4553_v41, %v8011_v23  ;;  %v4157_v31 = vadd.f32 %v4156_v44, %v7930_v34  ;;  %v4512_v30 = vrot.slane %v4481_v53, %v8507_v15  ;;  %v4198_v12 = vadd.f32 %v4197_v21, %v7930_v34 }
 0x323   : > { %v4158_v11 = vpop.f32.mrf.mxu0  ;;  %v4199_v8 = vpop.f32.mrf.mxu1  ;;  %v4491_v50 = vrot.slane %v4484_v2, %v7955_v56  ;;  %v8027_v33 = vadd.f32 %v4518_v6, %v4445_v38  ;;  %v8031_v36 = vmul.f32 %v4526_v47, %v4453_v16  ;;  %v4554_v54 = vsub.f32 1.0, %v8021_v27 }
 0x324   : > { %v8024_v25 = vadd.f32 %v8017_v10, %v4521_v3  ;;  %v4618_v4 = vmax.f32 %v4157_v31, 0.0  ;;  %v4159_v24 = vadd.f32 %v4158_v11, %v7930_v34  ;;  %v4693_v55 = vmax.f32 %v4198_v12, 0.0 }
 0x325   : > { %v4160_v9 = vpop.f32.mrf.mxu0  ;;  %v4201_v29 = vpop.f32.mrf.mxu1  ;;  %v4492_v19 = vcombine.high %v4491_v50, %v4491_v50  ;;  %v8036_v35 = vmul.f32 %v4554_v54, %v8031_v36  ;;  %v4200_v16 = vadd.f32 %v4199_v8, %v7930_v34  ;;  %v5479_v21 = vmul.f32 -1.442695, %v7966_v7 }
 0x326   : > { %v4620_v61 = vsub.f32 0.0, %v4618_v4  ;;  %v4619_v60 = vmax.f32 %v4159_v24, 0.0  ;;  %v4695_v18 = vsub.f32 0.0, %v4693_v55  ;;  %v5482_v27 = vmul.f32 -1.442695, %v4157_v31 }
 0x327   : > { %v5846_v28 = vpop.eup %5845  ;;  %v4161_v17 = vpop.f32.mrf.mxu0  ;;  %v4499_v38 = vrot.slane %v4492_v19, %v7955_v56  ;;  %v4559_v39 = vcombine.low %v8017_v10, %v8036_v35  ;;  %v4587_v48 = vrot.slane %v8036_v35, %v8507_v15  ;;  %v8045_v40 = vadd.f32 %v8036_v35, %v4522_v26 }
 0x328   : > { %v4202_v1 = vpop.f32.mrf.mxu1  ;;  %v4514_v51 = vmul.f32 %v5846_v28, %v4512_v30  ;;  %v4622_v49 = vmul.f32 %v4620_v61, %v7938_v22  ;;  %v4621_v44 = vsub.f32 0.0, %v4619_v60  ;;  %v4694_v6 = vmax.f32 %v4200_v16, 0.0 }
 0x329   : > { %v4500_v62 = vcombine.high %v4499_v38, %v4499_v38  ;;  %v4566_v45 = vrot.slane %v4559_v39, %v7955_v56  ;;  %v4697_v50 = vmul.f32 %v4695_v18, %v7938_v22  ;;  %v5485_v30 = vmul.f32 -1.442695, %v4198_v12 }
 0x32a   : > { %v4516_v37 = vadd.f32 %v4514_v51, %v4441_v63  ;;  %v5848_v46 = vpop.eup %5847  ;;  %v4624_v3 = vmul.f32 1.442695, %v4622_v49  ;;  %v4623_v26 = vmul.f32 %v4621_v44, %v7942_v42  ;;  %v4696_v8 = vsub.f32 0.0, %v4694_v6 }
 0x32b   : > { %5478 = vst.msk [vmem:[%s6083_s28 + $0x12] ss:$8 sm:$0x3] %vm6075_vm0, %v4500_v62  ;;  %v4589_v63 = vmul.f32 %v5848_v46, %v4587_v48  ;;  %v4567_v52 = vcombine.high %v4566_v45, %v4566_v45  ;;  %v4699_v7 = vmul.f32 1.442695, %v4697_v50  ;;  %v5850_v28 = vpop.eup %5849  ;;  %v4599_v4 = vsub.f32 1.0, %v4554_v54 }
 0x32c   : > { %5851 = vpow2.f32 %v4624_v3  ;;  %v4626_v47 = vmul.f32 1.442695, %v4623_v26  ;;  %v4698_v9 = vmul.f32 %v4696_v8, %v7942_v42  ;;  %v5483_v19 = vmul.f32 -1.442695, %v4159_v24 }
 0x32d   : > { %v8053_v53 = vadd.f32 %v4589_v63, %v4516_v37  ;;  %v4574_v2 = vrot.slane %v4567_v52, %v7955_v56  ;;  %5853 = vpow2.f32 %v5479_v21  ;;  %v4598_v1 = vsub.f32 1.0, %v4553_v41 }
 0x32e   : > { %5855 = vpow2.f32 %v4626_v47  ;;  %v4701_v29 = vmul.f32 1.442695, %v4698_v9  ;;  %v4462_v51 = vadd.f32 1.0, %v5850_v28  ;;  %v4601_v37 = vadd.f32 1e-10, %v4599_v4 }
 0x32f   : > { %v4575_v11 = vcombine.high %v4574_v2, %v4574_v2  ;;  %5857 = vpow2.f32 %v5482_v27  ;;  %v5486_v39 = vmul.f32 -1.442695, %v4200_v16  ;;  %v4600_v48 = vadd.f32 1e-10, %v4598_v1 }
 0x330   : > { %5859 = vpow2.f32 %v4699_v7  ;;  %v4603_v43 = vmul.f32 %v4601_v37, %v8031_v36  ;;  %v4847_v47 = vmul.f32 1e+10, %v7932_v57 }
 0x331   : > { %5481 = vst.msk [vmem:[%s6083_s28 + $0x13] ss:$8 sm:$0x3] %vm6075_vm0, %v4575_v11  ;;  %5861 = vpow2.f32 %v4701_v29  ;;  %v4602_v63 = vmul.f32 %v4600_v48, %v8011_v23 }
 0x332   : > { %5863 = vpow2.f32 %v5485_v30 }
 0x333   : > { %5865 = vpow2.f32 %v5483_v19 }
 0x334   : > { %5867 = vrcp.f32 %v4462_v51 }
 0x335   : > { %5869 = vpow2.f32 %v5486_v39 }
 0x339   : > { %v5852_v31 = vpop.eup %5851 }
 0x33a   : > { %v4628_v17 = vsub.f32 1.0, %v5852_v31  ;;  %v5854_v58 = vpop.eup %5853 }
 0x33b   : > { %v5856_v12 = vpop.eup %5855  ;;  %v4537_v45 = vadd.f32 1.0, %v5854_v58 }
 0x33c   : > { %v4673_v62 = vsub.f32 1.0, %v4628_v17  ;;  %v5858_v54 = vpop.eup %5857  ;;  %v4629_v41 = vsub.f32 1.0, %v5856_v12  ;;  %v8071_v6 = vmul.f32 %v4628_v17, %v4602_v63 }
 0x33d   : > { %v4612_v2 = vadd.f32 1.0, %v5858_v54  ;;  %v5860_v27 = vpop.eup %5859 }
 0x33e   : > { %v4675_v18 = vadd.f32 1e-10, %v4673_v62  ;;  %v8069_v44 = vmul.f32 %v4629_v41, %v4603_v43  ;;  %v4674_v21 = vsub.f32 1.0, %v4629_v41  ;;  %v8073_v8 = vpop.eup %5861  ;;  %v4703_v4 = vsub.f32 1.0, %v5860_v27 }
 0x33f   : > { %v5864_v31 = vpop.eup %5863  ;;  %v4704_v1 = vsub.f32 1.0, %v8073_v8 }
 0x340   : > { %v4634_v23 = vcombine.low %v8071_v6, %v8069_v44  ;;  %v8078_v9 = vmul.f32 %v4675_v18, %v4602_v63  ;;  %v4676_v7 = vadd.f32 1e-10, %v4674_v21  ;;  %v5866_v57 = vpop.eup %5865  ;;  %v4687_v48 = vadd.f32 1.0, %v5864_v31 }
 0x341   : > { %v4238_v38 = vpop.f32.mrf.mxu0  ;;  %v4279_v61 = vpop.f32.mrf.mxu1 }
 0x342   : > { %v4239_v24 = vadd.f32 %v4238_v38, %v7930_v34  ;;  %v4280_v49 = vadd.f32 %v4279_v61, %v7930_v34  ;;  %v4641_v30 = vrot.slane %v4634_v23, %v7955_v56  ;;  %v8083_v17 = vmul.f32 %v4676_v7, %v4603_v43  ;;  %v5868_v54 = vpop.eup %5867 }
 0x343   : > { %v4240_v55 = vpop.f32.mrf.mxu0  ;;  %v4281_v46 = vpop.f32.mrf.mxu1  ;;  %v8087_v58 = vmul.f32 %v4703_v4, %v8078_v9 }
 0x344   : > { %v5488_v3 = vmul.f32 -1.442695, %v4239_v24  ;;  %v4768_v60 = vmax.f32 %v4239_v24, 0.0  ;;  %v4843_v50 = vmax.f32 %v4280_v49, 0.0  ;;  %v4241_v29 = vadd.f32 %v4240_v55, %v7930_v34 }
 0x345   : > { %v4242_v52 = vpop.f32.mrf.mxu0  ;;  %v4283_v16 = vpop.f32.mrf.mxu1  ;;  %v5491_v19 = vmul.f32 -1.442695, %v4280_v49  ;;  %v4642_v38 = vcombine.high %v4641_v30, %v4641_v30  ;;  %v8092_v37 = vmul.f32 %v4704_v1, %v8083_v17  ;;  %v4613_v24 = vadd.f32 1.0, %v5866_v57 }
 0x346   : > { %5871 = vpow2.f32 %v5488_v3  ;;  %v4770_v36 = vsub.f32 0.0, %v4768_v60  ;;  %v4845_v51 = vsub.f32 0.0, %v4843_v50  ;;  %v5489_v62 = vmul.f32 -1.442695, %v4241_v29  ;;  %v5870_v3 = vpop.eup %5869 }
 0x347   : > { %v4243_v26 = vpop.f32.mrf.mxu0  ;;  %v4284_v11 = vpop.f32.mrf.mxu1  ;;  %5873 = vrcp.f32 %v4537_v45  ;;  %v4649_v39 = vrot.slane %v4642_v38, %v7955_v56  ;;  %v4769_v12 = vmax.f32 %v4241_v29, 0.0  ;;  %v4709_v55 = vcombine.low %v8087_v58, %v8092_v37 }
 0x348   : > { %5875 = vrcp.f32 %v4612_v2  ;;  %v4772_v28 = vmul.f32 %v4770_v36, %v7938_v22  ;;  %v4849_v22 = vmul.f32 %v4847_v47, %v4845_v51  ;;  %v4282_v63 = vadd.f32 %v4281_v46, %v7930_v34 }
 0x349   : > { %5877 = vpow2.f32 %v5491_v19  ;;  %v4650_v43 = vcombine.high %v4649_v39, %v4649_v39  ;;  %v4771_v49 = vsub.f32 0.0, %v4769_v12  ;;  %v4716_v45 = vrot.slane %v4709_v55, %v7955_v56 }
 0x34a   : > { %v4774_v61 = vmul.f32 1.442695, %v4772_v28  ;;  %v4851_v41 = vmul.f32 1.442695, %v4849_v22  ;;  %v4848_v52 = vmul.f32 1e+10, %v7935_v13  ;;  %v4508_v36 = vrot.slane %v8005_v14, %v8507_v15 }
 0x34b   : > { %5484 = vst.msk [vmem:[%s6083_s28 + $0x14] ss:$8 sm:$0x3] %vm6075_vm0, %v4650_v43  ;;  %v4773_v60 = vmul.f32 %v4771_v49, %v7942_v42  ;;  %v4717_v18 = vcombine.high %v4716_v45, %v4716_v45  ;;  %v5492_v21 = vmul.f32 -1.442695, %v4282_v63  ;;  %v4844_v2 = vmax.f32 %v4282_v63, 0.0 }
 0x34c   : > { %5879 = vpow2.f32 %v4774_v61  ;;  %v4513_v27 = vmul.f32 %v5868_v54, %v4508_v36  ;;  %v4748_v13 = vsub.f32 1.0, %v4703_v4  ;;  %v4688_v50 = vadd.f32 1.0, %v5870_v3  ;;  %v481_v28 = vld [vmem:[%s6225_s14 + $0x10] sm:$0xff]  ;;  %v8117_v61 = vld [vmem:[%s6225_s14 + $0x18] sm:$0xff] }
 0x34d   : > { %5881 = vpow2.f32 %v5489_v62  ;;  %v4776_v34 = vmul.f32 1.442695, %v4773_v60  ;;  %v4724_v46 = vrot.slane %v4717_v18, %v7955_v56  ;;  %v4846_v11 = vsub.f32 0.0, %v4844_v2 }
 0x34e   : > { %5883 = vpow2.f32 %v4851_v41  ;;  %v4583_v47 = vrot.slane %v8017_v10, %v8507_v15  ;;  %v4750_v19 = vadd.f32 1e-10, %v4748_v13  ;;  %v4515_v51 = vadd.f32 %v4513_v27, %v7996_v20 }
 0x34f   : > { %5885 = vrcp.f32 %v4687_v48  ;;  %v4725_v14 = vcombine.high %v4724_v46, %v4724_v46  ;;  %v4850_v7 = vmul.f32 %v4848_v52, %v4846_v11  ;;  %v4658_v38 = vrot.slane %v8071_v6, %v8507_v15 }
 0x350   : > { %5887 = vrcp.f32 %v4613_v24  ;;  %v4752_v22 = vmul.f32 %v4750_v19, %v8078_v9  ;;  %v4915_v12 = vrot.slane %v7921_v32, 6  ;;  %v4916_v48 = vrot.slane %v481_v28, 6 }
 0x351   : > { %5889 = vpow2.f32 %v5492_v21  ;;  %5487 = vst.msk [vmem:[%s6083_s28 + $0x15] ss:$8 sm:$0x3] %vm6075_vm0, %v4725_v14  ;;  %v4853_v30 = vmul.f32 1.442695, %v4850_v7  ;;  %v4918_v24 = vrot.slane %v7926_v5, 6  ;;  %v4733_v20 = vrot.slane %v8087_v58, %v8507_v15 }
 0x352   : > { %v4919_v45 = vrot.slane %v8117_v61, 6  ;;  %v4671_v63 = vadd.f32 %v8071_v6, %v8024_v25  ;;  %v4749_v32 = vsub.f32 1.0, %v4704_v1  ;;  %v4592_v60 = vmul.f32 3.7142856, %v8017_v10 }
 0x353   : > { %v5872_v16 = vpop.eup %5871  ;;  %v4593_v52 = vmul.f32 3.7142856, %v8036_v35  ;;  %v4662_v36 = vrot.slane %v8069_v44, %v8507_v15  ;;  %v4917_v10 = vsel %vm4914_vm7, %v4915_v12, %v4916_v48  ;;  %v4667_v35 = vmul.f32 4.285714, %v8071_v6 }
 0x354   : > { %v4762_v26 = vadd.f32 1.0, %v5872_v16  ;;  %v5874_v42 = vpop.eup %5873  ;;  %v4746_v2 = vadd.f32 %v8087_v58, %v4671_v63  ;;  %v4751_v11 = vadd.f32 1e-10, %v4749_v32  ;;  %v4737_v14 = vrot.slane %v8092_v37, %v8507_v15 }
 0x355   : > { %v5876_v23 = vpop.eup %5875  ;;  %v4588_v57 = vmul.f32 %v5874_v42, %v4583_v47 }
 0x356   : > { %5891 = vrcp.f32 %v4762_v26  ;;  %v5878_v29 = vpop.eup %5877  ;;  %v4663_v55 = vmul.f32 %v5876_v23, %v4658_v38  ;;  %v4753_v7 = vmul.f32 %v4751_v11, %v8083_v17  ;;  %v4595_v17 = vadd.f32 %v4593_v52, %v8027_v33 }
 0x357   : > { %5893 = vpow2.f32 %v4776_v34  ;;  %v4837_v31 = vadd.f32 1.0, %v5878_v29  ;;  %v4590_v9 = vadd.f32 %v4588_v57, %v4515_v51  ;;  %v4668_v51 = vmul.f32 4.285714, %v8069_v44 }
 0x358   : > { %5895 = vrcp.f32 %v4688_v50 }
 0x359   : > { %v5880_v4 = vpop.eup %5879  ;;  %5897 = vpow2.f32 %v4853_v30  ;;  %v4665_v21 = vadd.f32 %v4663_v55, %v4590_v9  ;;  %v4594_v30 = vadd.f32 %v4592_v60, %v8009_v59  ;;  %v4743_v55 = vmul.f32 4.857143, %v8092_v37 }
 0x35a   : > { %v4778_v62 = vsub.f32 1.0, %v5880_v4  ;;  %5899 = vrcp.f32 %v4837_v31  ;;  %v5882_v39 = vpop.eup %5881  ;;  %v4742_v4 = vmul.f32 4.857143, %v8087_v58  ;;  %v4670_v9 = vadd.f32 %v4668_v51, %v4595_v17 }
 0x35b   : > { %v4763_v41 = vadd.f32 1.0, %v5882_v39  ;;  %v5884_v49 = vpop.eup %5883 }
 0x35c   : > { %v8124_v54 = vmul.f32 %v4778_v62, %v4752_v22  ;;  %v4823_v43 = vsub.f32 1.0, %v4778_v62  ;;  %v5886_v3 = vpop.eup %5885  ;;  %v4855_v1 = vsub.f32 1.0, %v5884_v49  ;;  %v4669_v62 = vadd.f32 %v4667_v35, %v4594_v30 }
 0x35d   : > { %v5888_v18 = vpop.eup %5887  ;;  %5901 = vrcp.f32 %v4763_v41  ;;  %v4738_v34 = vmul.f32 %v5886_v3, %v4733_v20  ;;  %v4672_v20 = vadd.f32 %v8069_v44, %v8045_v40 }
 0x35e   : > { %v4825_v16 = vadd.f32 1e-10, %v4823_v43  ;;  %v5890_v26 = vpop.eup %5889  ;;  %v4808_v25 = vrot.slane %v8124_v54, %v8507_v15  ;;  %v4664_v13 = vmul.f32 %v5888_v18, %v4662_v36  ;;  %v4821_v23 = vadd.f32 %v8124_v54, %v4746_v2 }
 0x35f   : > { %v4838_v42 = vadd.f32 1.0, %v5890_v26  ;;  %v4740_v28 = vadd.f32 %v4738_v34, %v4665_v21  ;;  %v4817_v43 = vmul.f32 5.428571, %v8124_v54  ;;  %v4744_v33 = vadd.f32 %v4742_v4, %v4669_v62 }
 0x360   : > { %v4827_v8 = vmul.f32 %v4825_v16, %v4752_v22  ;;  %v4666_v12 = vadd.f32 %v4664_v13, %v8053_v53  ;;  %v4747_v53 = vadd.f32 %v8092_v37, %v4672_v20  ;;  %v4745_v18 = vadd.f32 %v4743_v55, %v4670_v9 }
 0x361   : > { %5903 = vrcp.f32 %v4838_v42 }
 0x362   : > { %v4857_v47 = vmul.f32 %v4855_v1, %v4827_v8 }
 0x363   : > { %v5892_v46 = vpop.eup %5891 }
 0x364   : > { %v5894_v27 = vpop.eup %5893  ;;  %v4813_v50 = vmul.f32 %v5892_v46, %v4808_v25  ;;  %v4885_v6 = vrot.slane %v4857_v47, %v8507_v15  ;;  %v8146_v19 = vadd.f32 %v4857_v47, %v4821_v23  ;;  %v4894_v2 = vmul.f32 6.0, %v4857_v47 }
 0x365   : > { %v4779_v29 = vsub.f32 1.0, %v5894_v27  ;;  %v5896_v31 = vpop.eup %5895 }
 0x366   : > { %v5898_v22 = vpop.eup %5897  ;;  %v4815_v39 = vadd.f32 %v4813_v50, %v4740_v28  ;;  %5905 = vrcp.f32 %v8146_v19  ;;  %v4739_v48 = vmul.f32 %v5896_v31, %v4737_v14 }
 0x367   : > { %v4781_v57 = vmul.f32 %v4779_v29, %v4753_v7  ;;  %v4824_v38 = vsub.f32 1.0, %v4779_v29  ;;  %v5900_v59 = vpop.eup %5899  ;;  %v4856_v52 = vsub.f32 1.0, %v5898_v22 }
 0x368   : > { %v4890_v41 = vmul.f32 %v5900_v59, %v4885_v6  ;;  %v4741_v16 = vadd.f32 %v4739_v48, %v4666_v12 }
 0x369   : > { %v4784_v58 = vcombine.low %v8124_v54, %v4781_v57  ;;  %v4826_v49 = vadd.f32 1e-10, %v4824_v38  ;;  %v4818_v32 = vmul.f32 5.428571, %v4781_v57  ;;  %v4812_v40 = vrot.slane %v4781_v57, %v8507_v15 }
 0x36a   : > { %v4892_v3 = vadd.f32 %v4890_v41, %v4815_v39  ;;  %v5902_v44 = vpop.eup %5901  ;;  %v4819_v54 = vadd.f32 %v4817_v43, %v4744_v33  ;;  %v4822_v37 = vadd.f32 %v4781_v57, %v4747_v53 }
 0x36b   : > { %v4791_v63 = vrot.slane %v4784_v58, %v7955_v56  ;;  %v4828_v60 = vmul.f32 %v4826_v49, %v4753_v7  ;;  %v4814_v25 = vmul.f32 %v5902_v44, %v4812_v40  ;;  %v4820_v8 = vadd.f32 %v4818_v32, %v4745_v18 }
 0x36c   : > { %v4923_v36 = vsub.f32 %v4892_v3, %v4917_v10  ;;  %4942 = vst [vmem:[%s6083_s28] sm:$0x7] %v4892_v3  ;;  %v4896_v23 = vadd.f32 %v4894_v2, %v4819_v54 }
 0x36d   : > { %v4792_v21 = vcombine.high %v4791_v63, %v4791_v63  ;;  %v4858_v26 = vmul.f32 %v4856_v52, %v4828_v60  ;;  %v4816_v27 = vadd.f32 %v4814_v25, %v4741_v16 }
 0x36e   : > { %v4925_v1 = vmul.f32 %v4923_v36, %v4923_v36  ;;  %v5904_v50 = vpop.eup %5903 }
 0x36f   : > { %v4799_v34 = vrot.slane %v4792_v21, %v7955_v56  ;;  %v4861_v46 = vcombine.low %v4857_v47, %v4858_v26  ;;  %v4889_v35 = vrot.slane %v4858_v26, %v8507_v15  ;;  %v4895_v11 = vmul.f32 6.0, %v4858_v26 }
 0x370   : > { %v4899_v13 = vadd.f32 %v4858_v26, %v4822_v37  ;;  %v4928_v10 = vsel %vm4927_vm8, %v4925_v1, 0.0  ;;  %v4920_v47 = vsel %vm4914_vm7, %v4918_v24, %v4919_v45 }
 0x371   : > { %v4800_v42 = vcombine.high %v4799_v34, %v4799_v34  ;;  %v4868_v14 = vrot.slane %v4861_v46, %v7955_v56  ;;  %v4897_v7 = vadd.f32 %v4895_v11, %v4820_v8  ;;  %v4929_v29 = vrot.slane %v4928_v10, 4 }
 0x372   : > { %v4891_v30 = vmul.f32 %v5904_v50, %v4889_v35  ;;  %5907 = vrcp.f32 %v4899_v13  ;;  %v4969_v15 = vcombine.low %v8146_v19, %v4899_v13 }
 0x373   : > { %5490 = vst.msk [vmem:[%s6083_s28 + $0x16] ss:$8 sm:$0x3] %vm6075_vm0, %v4800_v42  ;;  %v4869_v28 = vcombine.high %v4868_v14, %v4868_v14  ;;  %v4992_v6 = vcombine.low %v4896_v23, %v4897_v7  ;;  %v5906_v31 = vpop.eup %5905  ;;  %v4930_v38 = vadd.f32 %v4929_v29, %v4928_v10 }
 0x374   : > { %v4893_v4 = vadd.f32 %v4891_v30, %v4816_v27  ;;  %v4976_v51 = vrot.slane %v4969_v15, %v7955_v56  ;;  %v4901_v57 = vmul.f32 %v5906_v31, %v4896_v23 }
 0x375   : > { %v4876_v22 = vrot.slane %v4869_v28, %v7955_v56  ;;  %v4999_v19 = vrot.slane %v4992_v6, %v7955_v56  ;;  %v4931_v39 = vrot.slane %v4930_v38, 2 }
 0x376   : > { %v4924_v17 = vsub.f32 %v4893_v4, %v4920_v47  ;;  %4943 = vst [vmem:[%s6083_s28 + $0x8] sm:$0x7] %v4893_v4  ;;  %v4977_v5 = vcombine.high %v4976_v51, %v4976_v51  ;;  %v4904_v49 = vmax.f32 %v4901_v57, 1e-10 }
 0x377   : > { %v4877_v61 = vcombine.high %v4876_v22, %v4876_v22  ;;  %v5000_v24 = vcombine.high %v4999_v19, %v4999_v19  ;;  %v4932_v20 = vadd.f32 %v4931_v39, %v4930_v38 }
 0x378   : > { %v4926_v45 = vmul.f32 %v4924_v17, %v4924_v17  ;;  %v4984_v62 = vrot.slane %v4977_v5, %v7955_v56  ;;  %5909 = vrcp.f32 %v4904_v49 }
 0x379   : > { %5493 = vst.msk [vmem:[%s6083_s28 + $0x17] ss:$8 sm:$0x3] %vm6075_vm0, %v4877_v61  ;;  %v5007_v59 = vrot.slane %v5000_v24, %v7955_v56  ;;  %v4933_v63 = vrot.slane %v4932_v20, 1 }
 0x37a   : > { %v4935_v12 = vsel %vm4927_vm8, %v4926_v45, 0.0  ;;  %v4985_v48 = vcombine.high %v4984_v62, %v4984_v62 }
 0x37b   : > { %v4936_v55 = vrot.slane %v4935_v12, 4  ;;  %v5008_v58 = vcombine.high %v5007_v59, %v5007_v59  ;;  %v4934_v60 = vadd.f32 %v4933_v63, %v4932_v20 }
 0x37c   : > { %5495 = vst.msk [vmem:[%s6083_s28 + $0x4] ss:$8 sm:$0x3] %vm6075_vm0, %v4985_v48 }
 0x37d   : > { %v4937_v43 = vadd.f32 %v4936_v55, %v4935_v12  ;;  %5496 = vst.msk [vmem:[%s6083_s28 + $0x5] ss:$8 sm:$0x3] %vm6075_vm0, %v5008_v58 }
 0x37f   : > { %v5908_v41 = vpop.eup %5907  ;;  %v4938_v33 = vrot.slane %v4937_v43, 2 }
 0x380   : > { %v4903_v9 = vmul.f32 %v5908_v41, %v4897_v7  ;;  %v5063_v37 = vld [vmem:[%s6083_s28 + $0x10] sm:$0xff] (%p6036_p5) }
 0x381   : > { %v4939_v32 = vadd.f32 %v4938_v33, %v4937_v43  ;;  %5064 = vst [vmem:[%s5046_s16 + $0x20] sm:$0xff] (%p6036_p5), %v5063_v37 }
 0x382   : > { %v4905_v53 = vmax.f32 %v4903_v9, 1e-10 }
 0x383   : > { %v4940_v3 = vrot.slane %v4939_v32, 1 }
 0x384   : > { %5911 = vrcp.f32 %v4905_v53 }
 0x385   : > { %v4941_v52 = vadd.f32 %v4940_v3, %v4939_v32  ;;  %v5910_v40 = vpop.eup %5909 }
 0x387   : > { %v5015_v16 = vcombine.low %v4934_v60, %v4941_v52 }
 0x389   : > { %v5022_v18 = vrot.slane %v5015_v16, %v7955_v56 }
 0x38b   : > { %v5029_v21 = vrot.slane %v5022_v18, %v7955_v56 }
 0x38d   : > { %5497 = vst.msk [vmem:[%s6083_s28 + $0x6] ss:$8 sm:$0x3] %vm6075_vm0, %v5029_v21 }
 0x391   : > { %v5912_v44 = vpop.eup %5911 }
 0x392   : > { %v4946_v54 = vcombine.low %v5910_v40, %v5912_v44 }
 0x394   : > { %v4953_v2 = vrot.slane %v4946_v54, %v7955_v56 }
 0x396   : > { %v4954_v36 = vcombine.high %v4953_v2, %v4953_v2 }
 0x398   : > { %v4961_v26 = vrot.slane %v4954_v36, %v7955_v56  ;;  %5043 = sbr.rel (!%p6036_p5) target bundleno = 933 (0x3a5), region = 129  ;;  %v5065_v56 = vld [vmem:[%s6083_s28 + $0x18] sm:$0xff] (%p6036_p5) }
 0x399   : > { %5066 = vst [vmem:[%s5046_s16 + $0x28] sm:$0xff] (%p6036_p5), %v5065_v56 }
 0x39a   : > { %v4962_v34 = vcombine.high %v4961_v26, %v4961_v26 }
 0x39c   : > { %5494 = vst.msk [vmem:[%s6083_s28 + $0x3] ss:$8 sm:$0x3] %vm6075_vm0, %v4962_v34 }
 0x3a3   : > { %v5059_v25 = vld [vmem:[%s6083_s28] sm:$0xff]  ;;  %v5061_v8 = vld [vmem:[%s6083_s28 + $0x8] sm:$0xff] }
 0x3a4   : > { %5060 = vst [vmem:[%s5046_s16] sm:$0xff] %v5059_v25  ;;  %5062 = vst [vmem:[%s5046_s16 + $0x8] sm:$0xff] %v5061_v8 }
 0x3a5 PF: > { %p18_p10 = scmp.ge.s32.totalorder %s6019_s21, 4   ;;  %s8509_s17 = smov %s5933_s18 }
 0x3a6   : > { %s8510_s18 = smov %s6030_s24  ;;  %s8511_s19 = smov %s6019_s21 }
 0x3a7   :  { %20 = sbr.rel (!%p18_p10) target bundleno = 2 (0x2), region = 204 }

</bundles_post_ra>
